<compile_context>
chip_gen: v7x
topology: tpu7x:2x2x1
jax: 0.10.0
libtpu: 0.0.40
codegen_flags: <defaults>
</compile_context>

<pallas_src>
import math

import jax
import jax.numpy as jnp
from jax import lax
from jax.experimental import pallas as pl
from jax.experimental.pallas import tpu as pltpu

LN_EPS = 1e-5
NEG_BIG = 1e9  # additive softmax key-mask value (finite -> exp underflows to exactly 0)
VMEM_LIMIT_BYTES = 48 * 1024 * 1024  # headroom under v7x's 64 MiB physical VMEM


# ----------------------------------------------------------------------------
# Small helpers
# ----------------------------------------------------------------------------

def _layer_norm(x, gamma, beta, eps=LN_EPS):
    mu = jnp.mean(x, axis=-1, keepdims=True)
    var = jnp.mean((x - mu) ** 2, axis=-1, keepdims=True)
    return (x - mu) * lax.rsqrt(var + eps) * gamma + beta


def _choose_query_tile(n, de, dff_e, n_head, budget_bytes=20 * 1024 * 1024):
    """Pick a query-row tile tq that divides n (multiple of 8 unless tq == n)."""
    def tile_bytes(tq):
        # E-in + E-out (double-buffered) + LN/FFN temporaries + per-head scores.
        per_elem = 4.0 * (4 * de + dff_e + 5 * n_head + 8)
        return tq * n * per_elem

    if tile_bytes(n) <= budget_bytes:
        return n
    # Largest multiple-of-8 divisor of n that fits the budget.
    for tq in range(n - (n % 8), 7, -8):
        if n % tq == 0 and tile_bytes(tq) <= budget_bytes:
            return tq
    # Otherwise the smallest multiple-of-8 divisor (best effort).
    for tq in range(8, n, 8):
        if n % tq == 0:
            return tq
    return n  # no multiple-of-8 divisor (tiny / odd n): fall back to full rows


# ----------------------------------------------------------------------------
# Fused kernel: NodeEdgeBlock attention + X/E residual-LN-FFN-LN epilogues
# ----------------------------------------------------------------------------

def xey_attention_ffn(X, E, y, node_mask, fp):
    """Returns Xout (bs,n,dx), Eout (bs,n,n,de) and per-tile partial statistics
    xpart (bs,nq,4dx), epart (bs,nq,4de) laid out as [sum | min | max | sumsq]."""
    bs, n, dx = X.shape
    de = E.shape[-1]
    dy = y.shape[-1]
    H = fp['H']
    df = dx // H
    dff_e = fp['wle1'].shape[1]
    scale = 1.0 / math.sqrt(df)

    tq = _choose_query_tile(n, de, dff_e, H)
    nq = n // tq

    y3 = y.reshape(bs, 1, dy)
    mask_col = node_mask.astype(jnp.float32).reshape(bs, n, 1)
    mask_row = node_mask.astype(jnp.float32).reshape(bs, 1, n)

    def kernel(xq_ref, xfull_ref, e_ref, y_ref, mq_ref, mcol_ref, mrow_ref,
               wq_ref, bq_ref, wkv_ref, bkv_ref, we_ref, be_ref,
               wfilm_ref, bfilm_ref, weout_ref, beout_ref, wxout_ref, bxout_ref,
               lnx_ref, wlx1_ref, blx1_ref, wlx2_ref, blx2_ref,
               lne_ref, wle1_ref, ble1_ref, wle2_ref, ble2_ref,
               xout_ref, eout_ref, xpart_ref, epart_ref,
               wv_scratch):
        xq = xq_ref[0]          # (tq, dx)    query-tile node features
        xfull = xfull_ref[0]    # (n, dx)     all node features (for K/V)
        e3 = e_ref[0]           # (tq, n, de) edge tile
        yrow = y_ref[0]         # (1, dy)
        m_q = mq_ref[0]         # (tq, 1)     query-row mask
        m_col = mcol_ref[0]     # (n, 1)
        m_row = mrow_ref[0]     # (1, n)

        # ---- projections --------------------------------------------------
        q_proj = (jnp.dot(xq, wq_ref[...], preferred_element_type=jnp.float32)
                  + bq_ref[...]) * m_q                             # (tq, dx)
        kv = (jnp.dot(xfull, wkv_ref[...], preferred_element_type=jnp.float32)
              + bkv_ref[...]) * m_col                              # (n, 2dx) [K|V]

        # Fused edge projection [e_mul | e_add]; intermediate e_mask dropped
        # (masked logits get -1e9; masked newE entries are re-masked below).
        e2d = e3.reshape(tq * n, de)
        ep3 = (jnp.dot(e2d, we_ref[...], preferred_element_type=jnp.float32)
               + be_ref[...]).reshape(tq, n, 2 * H)

        # FiLM projection of y: [y_e_add | y_e_mul | y_x_add | y_x_mul].
        film = (jnp.dot(yrow, wfilm_ref[...],
                        preferred_element_type=jnp.float32) + bfilm_ref[...])
        ye_add = film[:, 0:H]                                      # (1, H)
        ye_mul = film[:, H:2 * H]                                  # (1, H)
        yx_add = film[:, 2 * H:2 * H + dx]                         # (1, dx)
        yx_mul = film[:, 2 * H + dx:2 * H + 2 * dx]                # (1, dx)

        # Fold FiLM scales into the output projections (identical math; removes
        # the O(n^2*H)/O(n*dx) activation scaling and the big pre-proj temporary).
        weout_s = weout_ref[...] * (ye_mul.reshape(H, 1) + 1.0)    # (H, de)
        bias_e = (jnp.dot(ye_add, weout_ref[...],
                          preferred_element_type=jnp.float32) + beout_ref[...])
        wxout_s = wxout_ref[...] * (yx_mul.reshape(dx, 1) + 1.0)   # (dx, dx)
        bias_x = (jnp.dot(yx_add, wxout_ref[...],
                          preferred_element_type=jnp.float32) + bxout_ref[...])

        # ---- per-head attention (head-major, lane-dense (tq, n) score tiles) --
        addmask = (m_row - 1.0) * NEG_BIG                          # (1, n)
        z_heads = []
        for h in range(H):
            qh = q_proj[:, h * df:(h + 1) * df]                    # (tq, df)
            kh = kv[:, h * df:(h + 1) * df]                        # (n, df)
            vh = kv[:, dx + h * df:dx + (h + 1) * df]              # (n, df)
            s = lax.dot_general(qh, kh, (((1,), (1,)), ((), ())),
                                preferred_element_type=jnp.float32) * scale
            s = s * (ep3[:, :, h] + 1.0) + ep3[:, :, H + h]        # edge modulation
            z_heads.append(s)                                      # for newE
            logits = s + addmask
            mx = jnp.max(logits, axis=-1, keepdims=True)           # lane reduction
            ex = jnp.exp(logits - mx)
            den = jnp.sum(ex, axis=-1, keepdims=True)
            attn = ex / den                                        # exact reciprocal
            wv_scratch[:, h * df:(h + 1) * df] = jnp.dot(
                attn, vh, preferred_element_type=jnp.float32)

        # ---- newX + fused X residual / LN / FFN / LN epilogue -----------------
        wv = wv_scratch[...]                                       # (tq, dx)
        newX = (jnp.dot(wv, wxout_s, preferred_element_type=jnp.float32)
                + bias_x) * m_q
        xn = _layer_norm(xq + newX, lnx_ref[0:1, :], lnx_ref[1:2, :])
        hx = jnp.maximum(jnp.dot(xn, wlx1_ref[...],
                                 preferred_element_type=jnp.float32)
                         + blx1_ref[...], 0.0)
        ffx = (jnp.dot(hx, wlx2_ref[...],
                       preferred_element_type=jnp.float32) + blx2_ref[...])
        xout_ref[0] = _layer_norm(xn + ffx, lnx_ref[2:3, :],
                                  lnx_ref[3:4, :]).astype(xout_ref.dtype)

        # ---- newE + fused E residual / LN / FFN / LN epilogue -----------------
        # (E never round-trips through HBM between attention and its FFN.)
        z2d = jnp.stack(z_heads, axis=-1).reshape(tq * n, H)
        emask = m_q.reshape(tq, 1, 1) * m_col.reshape(1, n, 1)     # (tq, n, 1)
        newE = ((jnp.dot(z2d, weout_s, preferred_element_type=jnp.float32)
                 + bias_e).reshape(tq, n, de)) * emask
        en = _layer_norm(e3 + newE, lne_ref[0:1, :], lne_ref[1:2, :])
        he = jnp.maximum(jnp.dot(en.reshape(tq * n, de), wle1_ref[...],
                                 preferred_element_type=jnp.float32)
                         + ble1_ref[...], 0.0)
        ffe = (jnp.dot(he, wle2_ref[...],
                       preferred_element_type=jnp.float32)
               + ble2_ref[...]).reshape(tq, n, de)
        eout_ref[0] = _layer_norm(en + ffe, lne_ref[2:3, :],
                                  lne_ref[3:4, :]).astype(eout_ref.dtype)

        # ---- Xtoy / Etoy partial statistics (data already VMEM-resident) ------
        xpart_ref[0] = jnp.concatenate(
            [jnp.sum(xq, axis=0, keepdims=True),
             jnp.min(xq, axis=0, keepdims=True),
             jnp.max(xq, axis=0, keepdims=True),
             jnp.sum(xq * xq, axis=0, keepdims=True)],
            axis=1).astype(xpart_ref.dtype)
        epart_ref[0] = jnp.concatenate(
            [jnp.sum(e2d, axis=0, keepdims=True),
             jnp.min(e2d, axis=0, keepdims=True),
             jnp.max(e2d, axis=0, keepdims=True),
             jnp.sum(e2d * e2d, axis=0, keepdims=True)],
            axis=1).astype(epart_ref.dtype)

    def const_spec(a):
        nd = a.ndim
        return pl.BlockSpec(tuple(a.shape), lambda b, qi, _nd=nd: (0,) * _nd)

    weights = (fp['wq'], fp['bq'], fp['wkv'], fp['bkv'], fp['we'], fp['be'],
               fp['wfilm'], fp['bfilm'], fp['weout'], fp['beout'],
               fp['wxout'], fp['bxout'],
               fp['ln_x'], fp['wlx1'], fp['blx1'], fp['wlx2'], fp['blx2'],
               fp['ln_e'], fp['wle1'], fp['ble1'], fp['wle2'], fp['ble2'])

    in_specs = [
        pl.BlockSpec((1, tq, dx), lambda b, qi: (b, qi, 0)),        # X (query rows)
        pl.BlockSpec((1, n, dx), lambda b, qi: (b, 0, 0)),          # X (all rows, K/V)
        pl.BlockSpec((1, tq, n, de), lambda b, qi: (b, qi, 0, 0)),  # E tile
        pl.BlockSpec((1, 1, dy), lambda b, qi: (b, 0, 0)),          # y
        pl.BlockSpec((1, tq, 1), lambda b, qi: (b, qi, 0)),         # mask (query rows)
        pl.BlockSpec((1, n, 1), lambda b, qi: (b, 0, 0)),           # mask (column)
        pl.BlockSpec((1, 1, n), lambda b, qi: (b, 0, 0)),           # mask (row/keys)
    ] + [const_spec(w) for w in weights]

    out_specs = (
        pl.BlockSpec((1, tq, dx), lambda b, qi: (b, qi, 0)),
        pl.BlockSpec((1, tq, n, de), lambda b, qi: (b, qi, 0, 0)),
        pl.BlockSpec((1, 1, 4 * dx), lambda b, qi: (b * nq + qi, 0, 0)),
        pl.BlockSpec((1, 1, 4 * de), lambda b, qi: (b * nq + qi, 0, 0)),
    )
    out_shape = (
        jax.ShapeDtypeStruct((bs, n, dx), jnp.float32),
        jax.ShapeDtypeStruct((bs, n, n, de), jnp.float32),
        jax.ShapeDtypeStruct((bs * nq, 1, 4 * dx), jnp.float32),
        jax.ShapeDtypeStruct((bs * nq, 1, 4 * de), jnp.float32),
    )

    Xout, Eout, xpart, epart = pl.pallas_call(
        kernel,
        grid=(bs, nq),
        in_specs=in_specs,
        out_specs=out_specs,
        out_shape=out_shape,
        scratch_shapes=[pltpu.VMEM((tq, dx), jnp.float32)],
        compiler_params=pltpu.CompilerParams(
            dimension_semantics=("parallel", "parallel"),
            vmem_limit_bytes=VMEM_LIMIT_BYTES),
    )(X, X, E, y3, mask_col, mask_col, mask_row, *weights)

    return (Xout, Eout,
            xpart.reshape(bs, nq, 4 * dx),
            epart.reshape(bs, nq, 4 * de))


# ----------------------------------------------------------------------------
# Tiny y path: stats finalization + y update in plain JAX (XLA fuses this fine)
# ----------------------------------------------------------------------------

def finalize_stats(part, count):
    """part: (bs, nq, 4d) partials [sum|min|max|sumsq] -> (bs, 4d) [mean|min|max|std]."""
    d = part.shape[-1] // 4
    total = jnp.sum(part[..., 0 * d:1 * d], axis=1)
    mn = jnp.min(part[..., 1 * d:2 * d], axis=1)
    mx = jnp.max(part[..., 2 * d:3 * d], axis=1)
    sumsq = jnp.sum(part[..., 3 * d:4 * d], axis=1)
    mean = total / count
    var = jnp.maximum(sumsq - count * mean * mean, 0.0) / (count - 1.0)
    return jnp.concatenate([mean, mn, mx, jnp.sqrt(var)], axis=-1)


def y_update(params, y, xstats, estats):
    def lin(v, name):
        return v @ params[name + '_w'] + params[name + '_b']

    def ln(v, g, b):
        mu = v.mean(axis=-1, keepdims=True)
        var = ((v - mu) ** 2).mean(axis=-1, keepdims=True)
        return (v - mu) * lax.rsqrt(var + LN_EPS) * g + b

    new_y = lin(y, 'y_y') + lin(xstats, 'x_y') + lin(estats, 'e_y')
    new_y = lin(jax.nn.relu(lin(new_y, 'y_out1')), 'y_out2')
    yn = ln(y + new_y, params['norm_y1_g'], params['norm_y1_b'])
    ffy = lin(jax.nn.relu(lin(yn, 'lin_y1')), 'lin_y2')
    return ln(yn + ffy, params['norm_y2_g'], params['norm_y2_b'])


# ----------------------------------------------------------------------------
# Full forward pass (XEyTransformerLayer): one fused pallas_call + tiny JAX tail
# ----------------------------------------------------------------------------

def xey_transformer_layer(params, fp, X, E, y, t_init, node_mask):
    del t_init  # only used by the (un-exercised) E_reg branch
    bs, n, _ = X.shape
    Xout, Eout, xpart, epart = xey_attention_ffn(X, E, y, node_mask, fp)
    xstats = finalize_stats(xpart, float(n))
    estats = finalize_stats(epart, float(n * n))
    yout = y_update(params, y, xstats, estats)
    return Xout, Eout, yout


# ----------------------------------------------------------------------------
# Parameters (deterministic synthetic init, PyTorch-Linear-like uniform)
# ----------------------------------------------------------------------------

def init_params(key, dx, de, dy, H, dffX, dffE, dffy):
    # TODO(synk): e_reg_*/e_llm_*/y_e_reg_* Linears and the cosine noise schedule
    # belong to the E_reg branch which is not exercised (E_reg=None); omitted.
    specs = {
        'q': (dx, dx), 'k': (dx, dx), 'v': (dx, dx),
        'e_add': (de, H), 'e_mul': (de, H),
        'y_e_mul': (dy, H), 'y_e_add': (dy, H),
        'y_x_mul': (dy, dx), 'y_x_add': (dy, dx),
        'y_y': (dy, dy),
        'x_y': (4 * dx, dy), 'e_y': (4 * de, dy),
        'x_out': (dx, dx), 'e_out': (H, de),
        'y_out1': (dy, dy), 'y_out2': (dy, dy),
        'linX1': (dx, dffX), 'linX2': (dffX, dx),
        'linE1': (de, dffE), 'linE2': (dffE, de),
        'lin_y1': (dy, dffy), 'lin_y2': (dffy, dy),
    }
    params = {}
    names = sorted(specs.keys())
    keys = jax.random.split(key, len(names))
    for k_, name in zip(keys, names):
        fi, fo = specs[name]
        kw, kb = jax.random.split(k_)
        bound = 1.0 / math.sqrt(fi)
        params[name + '_w'] = jax.random.uniform(kw, (fi, fo), jnp.float32, -bound, bound)
        params[name + '_b'] = jax.random.uniform(kb, (fo,), jnp.float32, -bound, bound)
    for ln, d in [('normX1', dx), ('normX2', dx), ('normE1', de),
                  ('normE2', de), ('norm_y1', dy), ('norm_y2', dy)]:
        params[ln + '_g'] = jnp.ones((d,), jnp.float32)
        params[ln + '_b'] = jnp.zeros((d,), jnp.float32)
    return params


def fuse_params(p, H):
    """Precompute concatenated / packed weights for the fused kernel."""
    fp = {'H': H}
    fp['wq'], fp['bq'] = p['q_w'], p['q_b'].reshape(1, -1)
    fp['wkv'] = jnp.concatenate([p['k_w'], p['v_w']], axis=1)
    fp['bkv'] = jnp.concatenate([p['k_b'], p['v_b']]).reshape(1, -1)
    fp['we'] = jnp.concatenate([p['e_mul_w'], p['e_add_w']], axis=1)
    fp['be'] = jnp.concatenate([p['e_mul_b'], p['e_add_b']]).reshape(1, -1)
    fp['wfilm'] = jnp.concatenate([p['y_e_add_w'], p['y_e_mul_w'],
                                   p['y_x_add_w'], p['y_x_mul_w']], axis=1)
    fp['bfilm'] = jnp.concatenate([p['y_e_add_b'], p['y_e_mul_b'],
                                   p['y_x_add_b'], p['y_x_mul_b']]).reshape(1, -1)
    fp['weout'], fp['beout'] = p['e_out_w'], p['e_out_b'].reshape(1, -1)
    fp['wxout'], fp['bxout'] = p['x_out_w'], p['x_out_b'].reshape(1, -1)
    fp['ln_x'] = jnp.stack([p['normX1_g'], p['normX1_b'],
                            p['normX2_g'], p['normX2_b']], axis=0)
    fp['ln_e'] = jnp.stack([p['normE1_g'], p['normE1_b'],
                            p['normE2_g'], p['normE2_b']], axis=0)
    fp['wlx1'], fp['blx1'] = p['linX1_w'], p['linX1_b'].reshape(1, -1)
    fp['wlx2'], fp['blx2'] = p['linX2_w'], p['linX2_b'].reshape(1, -1)
    fp['wle1'], fp['ble1'] = p['linE1_w'], p['linE1_b'].reshape(1, -1)
    fp['wle2'], fp['ble2'] = p['linE2_w'], p['linE2_b'].reshape(1, -1)
    return fp


# ----------------------------------------------------------------------------
# Pure-JAX reference (for correctness check)
# ----------------------------------------------------------------------------

def reference_forward(p, X, E, y, node_mask, H):
    bs, n, dx = X.shape
    de = E.shape[-1]
    df = dx // H
    xmk = node_mask[:, :, None]
    em1 = xmk[:, :, None, :]
    em2 = xmk[:, None, :, :]

    def lin(v, name):
        return v @ p[name + '_w'] + p[name + '_b']

    Q = lin(X, 'q') * xmk
    K = lin(X, 'k') * xmk
    V = lin(X, 'v') * xmk
    Qh = Q.reshape(bs, n, H, df)
    Kh = K.reshape(bs, n, H, df)
    Vh = V.reshape(bs, n, H, df)
    Y = jnp.einsum('bihd,bjhd->bijh', Qh, Kh) / math.sqrt(df)
    E1 = lin(E, 'e_mul') * em1 * em2
    E2 = lin(E, 'e_add') * em1 * em2
    Y = Y * (E1 + 1.0) + E2
    ye1 = lin(y, 'y_e_add')[:, None, None, :]
    ye2 = lin(y, 'y_e_mul')[:, None, None, :]
    newE = ye1 + (ye2 + 1.0) * Y
    smask = node_mask[:, None, :, None]
    Ymask = jnp.where(smask > 0, Y, -jnp.inf)
    attn = jax.nn.softmax(Ymask, axis=2)
    wV = jnp.einsum('bijh,bjhd->bihd', attn, Vh).reshape(bs, n, dx)
    yx1 = lin(y, 'y_x_add')[:, None, :]
    yx2 = lin(y, 'y_x_mul')[:, None, :]
    newX = yx1 + (yx2 + 1.0) * wV

    xmean = X.mean(axis=1)
    xmin = X.min(axis=1)
    xmax = X.max(axis=1)
    xstd = jnp.sqrt(((X - xmean[:, None, :]) ** 2).sum(axis=1) / (n - 1))
    xz = jnp.concatenate([xmean, xmin, xmax, xstd], axis=-1)
    Ef = E.reshape(bs, n * n, de)
    emean = Ef.mean(axis=1)
    emin = Ef.min(axis=1)
    emax = Ef.max(axis=1)
    estd = jnp.sqrt(((Ef - emean[:, None, :]) ** 2).sum(axis=1) / (n * n - 1))
    ez = jnp.concatenate([emean, emin, emax, estd], axis=-1)
    new_y = lin(y, 'y_y') + lin(xz, 'x_y') + lin(ez, 'e_y')

    newX = lin(newX, 'x_out') * xmk
    newE = lin(newE, 'e_out') * em1 * em2
    new_y = lin(jax.nn.relu(lin(new_y, 'y_out1')), 'y_out2')

    def ln(v, g, b):
        mu = v.mean(axis=-1, keepdims=True)
        var = ((v - mu) ** 2).mean(axis=-1, keepdims=True)
        return (v - mu) / jnp.sqrt(var + LN_EPS) * g + b

    Xn = ln(X + newX, p['normX1_g'], p['normX1_b'])
    En = ln(E + newE, p['normE1_g'], p['normE1_b'])
    yn = ln(y + new_y, p['norm_y1_g'], p['norm_y1_b'])
    Xo = ln(Xn + lin(jax.nn.relu(lin(Xn, 'linX1')), 'linX2'),
            p['normX2_g'], p['normX2_b'])
    Eo = ln(En + lin(jax.nn.relu(lin(En, 'linE1')), 'linE2'),
            p['normE2_g'], p['normE2_b'])
    yo = ln(yn + lin(jax.nn.relu(lin(yn, 'lin_y1')), 'lin_y2'),
            p['norm_y2_g'], p['norm_y2_b'])
    return Xo, Eo, yo


# ----------------------------------------------------------------------------
# Main
# ----------------------------------------------------------------------------

if __name__ == "__main__":
    bs, n = 2, 8
    dx, de, dy, H = 16, 8, 16, 4
    dim_ffX, dim_ffE, dim_ffy = 32, 16, 32

    key = jax.random.PRNGKey(0)
    k1, k2, k3 = jax.random.split(key, 3)
    X = jax.random.normal(k1, (bs, n, dx), jnp.float32)
    E = jax.random.normal(k2, (bs, n, n, de), jnp.float32)
    y = jax.random.normal(k3, (bs, dy), jnp.float32)
    t_init = jnp.full((bs, 1), 0.5, jnp.float32)
    node_mask = jnp.array([[1, 1, 1, 1, 1, 1, 0, 0],
                           [1, 1, 1, 1, 1, 1, 1, 1]], dtype=jnp.float32)

    params = init_params(jax.random.PRNGKey(42), dx, de, dy, H,
                         dim_ffX, dim_ffE, dim_ffy)
    fparams = fuse_params(params, H)

    Xo, Eo, yo = xey_transformer_layer(params, fparams, X, E, y, t_init, node_mask)
    jax.block_until_ready((Xo, Eo, yo))

    assert Xo.shape == X.shape and Eo.shape == E.shape and yo.shape == y.shape
    assert jnp.all(jnp.isfinite(Xo)) and jnp.all(jnp.isfinite(Eo)) and jnp.all(jnp.isfinite(yo))

    # Correctness vs. pure-JAX reference (exact softmax reciprocal; only fp
    # reassociation from the fused/folded weights remains).
    Xr, Er, yr = reference_forward(params, X, E, y, node_mask, H)
    for name, a, b in (("X", Xo, Xr), ("E", Eo, Er), ("y", yo, yr)):
        err = float(jnp.max(jnp.abs(a - b)))
        assert err < 2e-2, f"{name} mismatch vs reference: max abs err {err}"

    print("KERNEL_OK")
</pallas_src>

<mosaic_0001>
module attributes {stable_mosaic.version = 11 : i64} {
  func.func @kernel(%arg0: i32, %arg1: i32, %arg2: memref<1x8x16xf32, #tpu.memory_space<vmem>>, %arg3: memref<1x8x16xf32, #tpu.memory_space<vmem>>, %arg4: memref<1x8x8x8xf32, #tpu.memory_space<vmem>>, %arg5: memref<1x1x16xf32, #tpu.memory_space<vmem>>, %arg6: memref<1x8x1xf32, #tpu.memory_space<vmem>>, %arg7: memref<1x8x1xf32, #tpu.memory_space<vmem>>, %arg8: memref<1x1x8xf32, #tpu.memory_space<vmem>>, %arg9: memref<16x16xf32, #tpu.memory_space<vmem>>, %arg10: memref<1x16xf32, #tpu.memory_space<vmem>>, %arg11: memref<16x32xf32, #tpu.memory_space<vmem>>, %arg12: memref<1x32xf32, #tpu.memory_space<vmem>>, %arg13: memref<8x8xf32, #tpu.memory_space<vmem>>, %arg14: memref<1x8xf32, #tpu.memory_space<vmem>>, %arg15: memref<16x40xf32, #tpu.memory_space<vmem>>, %arg16: memref<1x40xf32, #tpu.memory_space<vmem>>, %arg17: memref<4x8xf32, #tpu.memory_space<vmem>>, %arg18: memref<1x8xf32, #tpu.memory_space<vmem>>, %arg19: memref<16x16xf32, #tpu.memory_space<vmem>>, %arg20: memref<1x16xf32, #tpu.memory_space<vmem>>, %arg21: memref<4x16xf32, #tpu.memory_space<vmem>>, %arg22: memref<16x32xf32, #tpu.memory_space<vmem>>, %arg23: memref<1x32xf32, #tpu.memory_space<vmem>>, %arg24: memref<32x16xf32, #tpu.memory_space<vmem>>, %arg25: memref<1x16xf32, #tpu.memory_space<vmem>>, %arg26: memref<4x8xf32, #tpu.memory_space<vmem>>, %arg27: memref<8x16xf32, #tpu.memory_space<vmem>>, %arg28: memref<1x16xf32, #tpu.memory_space<vmem>>, %arg29: memref<16x8xf32, #tpu.memory_space<vmem>>, %arg30: memref<1x8xf32, #tpu.memory_space<vmem>>, %arg31: memref<1x8x16xf32, #tpu.memory_space<vmem>>, %arg32: memref<1x8x8x8xf32, #tpu.memory_space<vmem>>, %arg33: memref<1x1x64xf32, #tpu.memory_space<vmem>>, %arg34: memref<1x1x32xf32, #tpu.memory_space<vmem>>, %arg35: memref<8x16xf32, #tpu.memory_space<vmem>>) attributes {dimension_semantics = [#tpu.dimension_semantics<parallel>, #tpu.dimension_semantics<parallel>], iteration_bounds = array<i64: 2, 1>, scalar_prefetch = 0 : i64, scratch_operands = 1 : i64, tpu.core_type = #tpu.core_type<tc>, window_params = [{transform_indices = @transform_0, window_bounds = array<i64: 1, 8, 16>}, {transform_indices = @transform_1, window_bounds = array<i64: 1, 8, 16>}, {transform_indices = @transform_2, window_bounds = array<i64: 1, 8, 8, 8>}, {transform_indices = @transform_3, window_bounds = array<i64: 1, 1, 16>}, {transform_indices = @transform_4, window_bounds = array<i64: 1, 8, 1>}, {transform_indices = @transform_5, window_bounds = array<i64: 1, 8, 1>}, {transform_indices = @transform_6, window_bounds = array<i64: 1, 1, 8>}, {pipeline_mode = #tpu.pipeline_mode<synchronous>, transform_indices = @transform_7, window_bounds = array<i64: 16, 16>}, {pipeline_mode = #tpu.pipeline_mode<synchronous>, transform_indices = @transform_8, window_bounds = array<i64: 1, 16>}, {pipeline_mode = #tpu.pipeline_mode<synchronous>, transform_indices = @transform_9, window_bounds = array<i64: 16, 32>}, {pipeline_mode = #tpu.pipeline_mode<synchronous>, transform_indices = @transform_10, window_bounds = array<i64: 1, 32>}, {pipeline_mode = #tpu.pipeline_mode<synchronous>, transform_indices = @transform_11, window_bounds = array<i64: 8, 8>}, {pipeline_mode = #tpu.pipeline_mode<synchronous>, transform_indices = @transform_12, window_bounds = array<i64: 1, 8>}, {pipeline_mode = #tpu.pipeline_mode<synchronous>, transform_indices = @transform_13, window_bounds = array<i64: 16, 40>}, {pipeline_mode = #tpu.pipeline_mode<synchronous>, transform_indices = @transform_14, window_bounds = array<i64: 1, 40>}, {pipeline_mode = #tpu.pipeline_mode<synchronous>, transform_indices = @transform_15, window_bounds = array<i64: 4, 8>}, {pipeline_mode = #tpu.pipeline_mode<synchronous>, transform_indices = @transform_16, window_bounds = array<i64: 1, 8>}, {pipeline_mode = #tpu.pipeline_mode<synchronous>, transform_indices = @transform_17, window_bounds = array<i64: 16, 16>}, {pipeline_mode = #tpu.pipeline_mode<synchronous>, transform_indices = @transform_18, window_bounds = array<i64: 1, 16>}, {pipeline_mode = #tpu.pipeline_mode<synchronous>, transform_indices = @transform_19, window_bounds = array<i64: 4, 16>}, {pipeline_mode = #tpu.pipeline_mode<synchronous>, transform_indices = @transform_20, window_bounds = array<i64: 16, 32>}, {pipeline_mode = #tpu.pipeline_mode<synchronous>, transform_indices = @transform_21, window_bounds = array<i64: 1, 32>}, {pipeline_mode = #tpu.pipeline_mode<synchronous>, transform_indices = @transform_22, window_bounds = array<i64: 32, 16>}, {pipeline_mode = #tpu.pipeline_mode<synchronous>, transform_indices = @transform_23, window_bounds = array<i64: 1, 16>}, {pipeline_mode = #tpu.pipeline_mode<synchronous>, transform_indices = @transform_24, window_bounds = array<i64: 4, 8>}, {pipeline_mode = #tpu.pipeline_mode<synchronous>, transform_indices = @transform_25, window_bounds = array<i64: 8, 16>}, {pipeline_mode = #tpu.pipeline_mode<synchronous>, transform_indices = @transform_26, window_bounds = array<i64: 1, 16>}, {pipeline_mode = #tpu.pipeline_mode<synchronous>, transform_indices = @transform_27, window_bounds = array<i64: 16, 8>}, {pipeline_mode = #tpu.pipeline_mode<synchronous>, transform_indices = @transform_28, window_bounds = array<i64: 1, 8>}, {transform_indices = @transform_29, window_bounds = array<i64: 1, 8, 16>}, {transform_indices = @transform_30, window_bounds = array<i64: 1, 8, 8, 8>}, {transform_indices = @transform_31, window_bounds = array<i64: 1, 1, 64>}, {transform_indices = @transform_32, window_bounds = array<i64: 1, 1, 32>}]} {
    %c0 = arith.constant 0 : index
    %c0_0 = arith.constant 0 : index
    %c0_1 = arith.constant 0 : index
    %0 = vector.load %arg2[%c0, %c0_0, %c0_1] : memref<1x8x16xf32, #tpu.memory_space<vmem>>, vector<1x8x16xf32>
    %1 = vector.shape_cast %0 : vector<1x8x16xf32> to vector<8x16xf32>
    %c0_2 = arith.constant 0 : index
    %c0_3 = arith.constant 0 : index
    %c0_4 = arith.constant 0 : index
    %2 = vector.load %arg3[%c0_2, %c0_3, %c0_4] : memref<1x8x16xf32, #tpu.memory_space<vmem>>, vector<1x8x16xf32>
    %3 = vector.shape_cast %2 : vector<1x8x16xf32> to vector<8x16xf32>
    %c0_5 = arith.constant 0 : index
    %c0_6 = arith.constant 0 : index
    %c0_7 = arith.constant 0 : index
    %c0_8 = arith.constant 0 : index
    %4 = vector.load %arg4[%c0_5, %c0_6, %c0_7, %c0_8] : memref<1x8x8x8xf32, #tpu.memory_space<vmem>>, vector<1x8x8x8xf32>
    %5 = vector.shape_cast %4 : vector<1x8x8x8xf32> to vector<8x8x8xf32>
    %c0_9 = arith.constant 0 : index
    %c0_10 = arith.constant 0 : index
    %c0_11 = arith.constant 0 : index
    %6 = vector.load %arg5[%c0_9, %c0_10, %c0_11] : memref<1x1x16xf32, #tpu.memory_space<vmem>>, vector<1x1x16xf32>
    %7 = vector.shape_cast %6 : vector<1x1x16xf32> to vector<1x16xf32>
    %c0_12 = arith.constant 0 : index
    %c0_13 = arith.constant 0 : index
    %c0_14 = arith.constant 0 : index
    %8 = vector.load %arg6[%c0_12, %c0_13, %c0_14] : memref<1x8x1xf32, #tpu.memory_space<vmem>>, vector<1x8x1xf32>
    %9 = vector.shape_cast %8 : vector<1x8x1xf32> to vector<8x1xf32>
    %c0_15 = arith.constant 0 : index
    %c0_16 = arith.constant 0 : index
    %c0_17 = arith.constant 0 : index
    %10 = vector.load %arg7[%c0_15, %c0_16, %c0_17] : memref<1x8x1xf32, #tpu.memory_space<vmem>>, vector<1x8x1xf32>
    %11 = vector.shape_cast %10 : vector<1x8x1xf32> to vector<8x1xf32>
    %c0_18 = arith.constant 0 : index
    %c0_19 = arith.constant 0 : index
    %c0_20 = arith.constant 0 : index
    %12 = vector.load %arg8[%c0_18, %c0_19, %c0_20] : memref<1x1x8xf32, #tpu.memory_space<vmem>>, vector<1x1x8xf32>
    %13 = vector.shape_cast %12 : vector<1x1x8xf32> to vector<1x8xf32>
    %c0_21 = arith.constant 0 : index
    %c0_22 = arith.constant 0 : index
    %14 = vector.load %arg9[%c0_21, %c0_22] : memref<16x16xf32, #tpu.memory_space<vmem>>, vector<16x16xf32>
    %cst = arith.constant dense<0.000000e+00> : vector<8x16xf32>
    %15 = tpu.matmul %1, %14, %cst {dimension_numbers = #tpu.dot_dimension_numbers<[1], [0], [0], [1], [0, 0, 1, 1], [], []>} : vector<8x16xf32>, vector<16x16xf32>, vector<8x16xf32> -> vector<8x16xf32>
    %c0_23 = arith.constant 0 : index
    %c0_24 = arith.constant 0 : index
    %16 = vector.load %arg10[%c0_23, %c0_24] : memref<1x16xf32, #tpu.memory_space<vmem>>, vector<1x16xf32>
    %17 = vector.broadcast %16 : vector<1x16xf32> to vector<8x16xf32>
    %18 = arith.addf %15, %17 : vector<8x16xf32>
    %19 = vector.broadcast %9 : vector<8x1xf32> to vector<8x16xf32>
    %20 = arith.mulf %18, %19 : vector<8x16xf32>
    %c0_25 = arith.constant 0 : index
    %c0_26 = arith.constant 0 : index
    %21 = vector.load %arg11[%c0_25, %c0_26] : memref<16x32xf32, #tpu.memory_space<vmem>>, vector<16x32xf32>
    %cst_27 = arith.constant dense<0.000000e+00> : vector<8x32xf32>
    %22 = tpu.matmul %3, %21, %cst_27 {dimension_numbers = #tpu.dot_dimension_numbers<[1], [0], [0], [1], [0, 0, 1, 1], [], []>} : vector<8x16xf32>, vector<16x32xf32>, vector<8x32xf32> -> vector<8x32xf32>
    %c0_28 = arith.constant 0 : index
    %c0_29 = arith.constant 0 : index
    %23 = vector.load %arg12[%c0_28, %c0_29] : memref<1x32xf32, #tpu.memory_space<vmem>>, vector<1x32xf32>
    %24 = vector.broadcast %23 : vector<1x32xf32> to vector<8x32xf32>
    %25 = arith.addf %22, %24 : vector<8x32xf32>
    %26 = vector.broadcast %11 : vector<8x1xf32> to vector<8x32xf32>
    %27 = arith.mulf %25, %26 : vector<8x32xf32>
    %28 = vector.shape_cast %5 : vector<8x8x8xf32> to vector<64x8xf32>
    %c0_30 = arith.constant 0 : index
    %c0_31 = arith.constant 0 : index
    %29 = vector.load %arg13[%c0_30, %c0_31] : memref<8x8xf32, #tpu.memory_space<vmem>>, vector<8x8xf32>
    %cst_32 = arith.constant dense<0.000000e+00> : vector<64x8xf32>
    %30 = tpu.matmul %28, %29, %cst_32 {dimension_numbers = #tpu.dot_dimension_numbers<[1], [0], [0], [1], [0, 0, 1, 1], [], []>} : vector<64x8xf32>, vector<8x8xf32>, vector<64x8xf32> -> vector<64x8xf32>
    %c0_33 = arith.constant 0 : index
    %c0_34 = arith.constant 0 : index
    %31 = vector.load %arg14[%c0_33, %c0_34] : memref<1x8xf32, #tpu.memory_space<vmem>>, vector<1x8xf32>
    %32 = vector.broadcast %31 : vector<1x8xf32> to vector<64x8xf32>
    %33 = arith.addf %30, %32 : vector<64x8xf32>
    %34 = vector.shape_cast %33 : vector<64x8xf32> to vector<8x8x8xf32>
    %c0_35 = arith.constant 0 : index
    %c0_36 = arith.constant 0 : index
    %35 = vector.load %arg15[%c0_35, %c0_36] : memref<16x40xf32, #tpu.memory_space<vmem>>, vector<16x40xf32>
    %cst_37 = arith.constant dense<0.000000e+00> : vector<1x40xf32>
    %36 = tpu.matmul %7, %35, %cst_37 {dimension_numbers = #tpu.dot_dimension_numbers<[1], [0], [0], [1], [0, 0, 1, 1], [], []>} : vector<1x16xf32>, vector<16x40xf32>, vector<1x40xf32> -> vector<1x40xf32>
    %c0_38 = arith.constant 0 : index
    %c0_39 = arith.constant 0 : index
    %37 = vector.load %arg16[%c0_38, %c0_39] : memref<1x40xf32, #tpu.memory_space<vmem>>, vector<1x40xf32>
    %38 = arith.addf %36, %37 : vector<1x40xf32>
    %39 = vector.extract_strided_slice %38 {offsets = [0, 0], sizes = [1, 4], strides = [1, 1]} : vector<1x40xf32> to vector<1x4xf32>
    %40 = vector.extract_strided_slice %38 {offsets = [0, 4], sizes = [1, 4], strides = [1, 1]} : vector<1x40xf32> to vector<1x4xf32>
    %41 = vector.extract_strided_slice %38 {offsets = [0, 8], sizes = [1, 16], strides = [1, 1]} : vector<1x40xf32> to vector<1x16xf32>
    %42 = vector.extract_strided_slice %38 {offsets = [0, 24], sizes = [1, 16], strides = [1, 1]} : vector<1x40xf32> to vector<1x16xf32>
    %c0_40 = arith.constant 0 : index
    %c0_41 = arith.constant 0 : index
    %43 = vector.load %arg17[%c0_40, %c0_41] : memref<4x8xf32, #tpu.memory_space<vmem>>, vector<4x8xf32>
    %44 = vector.shape_cast %40 : vector<1x4xf32> to vector<4x1xf32>
    %cst_42 = arith.constant 1.000000e+00 : f32
    %45 = vector.broadcast %cst_42 : f32 to vector<4x1xf32>
    %46 = arith.addf %44, %45 : vector<4x1xf32>
    %47 = vector.broadcast %46 : vector<4x1xf32> to vector<4x8xf32>
    %48 = arith.mulf %43, %47 : vector<4x8xf32>
    %c0_43 = arith.constant 0 : index
    %c0_44 = arith.constant 0 : index
    %49 = vector.load %arg17[%c0_43, %c0_44] : memref<4x8xf32, #tpu.memory_space<vmem>>, vector<4x8xf32>
    %cst_45 = arith.constant dense<0.000000e+00> : vector<1x8xf32>
    %50 = tpu.matmul %39, %49, %cst_45 {dimension_numbers = #tpu.dot_dimension_numbers<[1], [0], [0], [1], [0, 0, 1, 1], [], []>} : vector<1x4xf32>, vector<4x8xf32>, vector<1x8xf32> -> vector<1x8xf32>
    %c0_46 = arith.constant 0 : index
    %c0_47 = arith.constant 0 : index
    %51 = vector.load %arg18[%c0_46, %c0_47] : memref<1x8xf32, #tpu.memory_space<vmem>>, vector<1x8xf32>
    %52 = arith.addf %50, %51 : vector<1x8xf32>
    %c0_48 = arith.constant 0 : index
    %c0_49 = arith.constant 0 : index
    %53 = vector.load %arg19[%c0_48, %c0_49] : memref<16x16xf32, #tpu.memory_space<vmem>>, vector<16x16xf32>
    %54 = vector.shape_cast %42 : vector<1x16xf32> to vector<16x1xf32>
    %cst_50 = arith.constant 1.000000e+00 : f32
    %55 = vector.broadcast %cst_50 : f32 to vector<16x1xf32>
    %56 = arith.addf %54, %55 : vector<16x1xf32>
    %57 = vector.broadcast %56 : vector<16x1xf32> to vector<16x16xf32>
    %58 = arith.mulf %53, %57 : vector<16x16xf32>
    %c0_51 = arith.constant 0 : index
    %c0_52 = arith.constant 0 : index
    %59 = vector.load %arg19[%c0_51, %c0_52] : memref<16x16xf32, #tpu.memory_space<vmem>>, vector<16x16xf32>
    %cst_53 = arith.constant dense<0.000000e+00> : vector<1x16xf32>
    %60 = tpu.matmul %41, %59, %cst_53 {dimension_numbers = #tpu.dot_dimension_numbers<[1], [0], [0], [1], [0, 0, 1, 1], [], []>} : vector<1x16xf32>, vector<16x16xf32>, vector<1x16xf32> -> vector<1x16xf32>
    %c0_54 = arith.constant 0 : index
    %c0_55 = arith.constant 0 : index
    %61 = vector.load %arg20[%c0_54, %c0_55] : memref<1x16xf32, #tpu.memory_space<vmem>>, vector<1x16xf32>
    %62 = arith.addf %60, %61 : vector<1x16xf32>
    %cst_56 = arith.constant 1.000000e+00 : f32
    %63 = vector.broadcast %cst_56 : f32 to vector<1x8xf32>
    %64 = arith.subf %13, %63 : vector<1x8xf32>
    %cst_57 = arith.constant 1.000000e+09 : f32
    %65 = vector.broadcast %cst_57 : f32 to vector<1x8xf32>
    %66 = arith.mulf %64, %65 : vector<1x8xf32>
    %67 = vector.extract_strided_slice %20 {offsets = [0, 0], sizes = [8, 4], strides = [1, 1]} : vector<8x16xf32> to vector<8x4xf32>
    %68 = vector.extract_strided_slice %27 {offsets = [0, 0], sizes = [8, 4], strides = [1, 1]} : vector<8x32xf32> to vector<8x4xf32>
    %69 = vector.extract_strided_slice %27 {offsets = [0, 16], sizes = [8, 4], strides = [1, 1]} : vector<8x32xf32> to vector<8x4xf32>
    %cst_58 = arith.constant dense<0.000000e+00> : vector<8x8xf32>
    %70 = tpu.matmul %67, %68, %cst_58 {dimension_numbers = #tpu.dot_dimension_numbers<[1], [1], [0], [0], [0, 0, 1, 0], [], []>} : vector<8x4xf32>, vector<8x4xf32>, vector<8x8xf32> -> vector<8x8xf32>
    %cst_59 = arith.constant 5.000000e-01 : f32
    %71 = vector.broadcast %cst_59 : f32 to vector<8x8xf32>
    %72 = arith.mulf %70, %71 : vector<8x8xf32>
    %73 = vector.extract_strided_slice %34 {offsets = [0, 0, 0], sizes = [8, 8, 1], strides = [1, 1, 1]} : vector<8x8x8xf32> to vector<8x8x1xf32>
    %74 = vector.shape_cast %73 : vector<8x8x1xf32> to vector<8x8xf32>
    %cst_60 = arith.constant 1.000000e+00 : f32
    %75 = vector.broadcast %cst_60 : f32 to vector<8x8xf32>
    %76 = arith.addf %74, %75 : vector<8x8xf32>
    %77 = arith.mulf %72, %76 : vector<8x8xf32>
    %78 = vector.extract_strided_slice %34 {offsets = [0, 0, 4], sizes = [8, 8, 1], strides = [1, 1, 1]} : vector<8x8x8xf32> to vector<8x8x1xf32>
    %79 = vector.shape_cast %78 : vector<8x8x1xf32> to vector<8x8xf32>
    %80 = arith.addf %77, %79 : vector<8x8xf32>
    %81 = vector.broadcast %66 : vector<1x8xf32> to vector<8x8xf32>
    %82 = arith.addf %80, %81 : vector<8x8xf32>
    %cst_61 = arith.constant dense<0xFF800000> : vector<8xf32>
    %83 = vector.multi_reduction <maximumf>, %82, %cst_61 [1] : vector<8x8xf32> to vector<8xf32>
    %84 = vector.shape_cast %83 : vector<8xf32> to vector<8x1xf32>
    %85 = vector.broadcast %84 : vector<8x1xf32> to vector<8x8xf32>
    %86 = arith.subf %82, %85 : vector<8x8xf32>
    %87 = math.exp %86 : vector<8x8xf32>
    %cst_62 = arith.constant dense<0.000000e+00> : vector<8xf32>
    %88 = vector.multi_reduction <add>, %87, %cst_62 [1] : vector<8x8xf32> to vector<8xf32>
    %89 = vector.shape_cast %88 : vector<8xf32> to vector<8x1xf32>
    %90 = vector.broadcast %89 : vector<8x1xf32> to vector<8x8xf32>
    %91 = arith.divf %87, %90 : vector<8x8xf32>
    %cst_63 = arith.constant dense<0.000000e+00> : vector<8x4xf32>
    %92 = tpu.matmul %91, %69, %cst_63 {dimension_numbers = #tpu.dot_dimension_numbers<[1], [0], [0], [1], [0, 0, 1, 1], [], []>} : vector<8x8xf32>, vector<8x4xf32>, vector<8x4xf32> -> vector<8x4xf32>
    %c0_64 = arith.constant 0 : index
    %c0_65 = arith.constant 0 : index
    %93 = vector.load %arg35[%c0_64, %c0_65] : memref<8x16xf32, #tpu.memory_space<vmem>>, vector<8x4xf32>
    tpu.vector_store %arg35[%c0_64, %c0_65], %92 {strides = array<i32>} : memref<8x16xf32, #tpu.memory_space<vmem>>, vector<8x4xf32>,
    %94 = vector.extract_strided_slice %20 {offsets = [0, 4], sizes = [8, 4], strides = [1, 1]} : vector<8x16xf32> to vector<8x4xf32>
    %95 = vector.extract_strided_slice %27 {offsets = [0, 4], sizes = [8, 4], strides = [1, 1]} : vector<8x32xf32> to vector<8x4xf32>
    %96 = vector.extract_strided_slice %27 {offsets = [0, 20], sizes = [8, 4], strides = [1, 1]} : vector<8x32xf32> to vector<8x4xf32>
    %cst_66 = arith.constant dense<0.000000e+00> : vector<8x8xf32>
    %97 = tpu.matmul %94, %95, %cst_66 {dimension_numbers = #tpu.dot_dimension_numbers<[1], [1], [0], [0], [0, 0, 1, 0], [], []>} : vector<8x4xf32>, vector<8x4xf32>, vector<8x8xf32> -> vector<8x8xf32>
    %cst_67 = arith.constant 5.000000e-01 : f32
    %98 = vector.broadcast %cst_67 : f32 to vector<8x8xf32>
    %99 = arith.mulf %97, %98 : vector<8x8xf32>
    %100 = vector.extract_strided_slice %34 {offsets = [0, 0, 1], sizes = [8, 8, 1], strides = [1, 1, 1]} : vector<8x8x8xf32> to vector<8x8x1xf32>
    %101 = vector.shape_cast %100 : vector<8x8x1xf32> to vector<8x8xf32>
    %cst_68 = arith.constant 1.000000e+00 : f32
    %102 = vector.broadcast %cst_68 : f32 to vector<8x8xf32>
    %103 = arith.addf %101, %102 : vector<8x8xf32>
    %104 = arith.mulf %99, %103 : vector<8x8xf32>
    %105 = vector.extract_strided_slice %34 {offsets = [0, 0, 5], sizes = [8, 8, 1], strides = [1, 1, 1]} : vector<8x8x8xf32> to vector<8x8x1xf32>
    %106 = vector.shape_cast %105 : vector<8x8x1xf32> to vector<8x8xf32>
    %107 = arith.addf %104, %106 : vector<8x8xf32>
    %108 = vector.broadcast %66 : vector<1x8xf32> to vector<8x8xf32>
    %109 = arith.addf %107, %108 : vector<8x8xf32>
    %cst_69 = arith.constant dense<0xFF800000> : vector<8xf32>
    %110 = vector.multi_reduction <maximumf>, %109, %cst_69 [1] : vector<8x8xf32> to vector<8xf32>
    %111 = vector.shape_cast %110 : vector<8xf32> to vector<8x1xf32>
    %112 = vector.broadcast %111 : vector<8x1xf32> to vector<8x8xf32>
    %113 = arith.subf %109, %112 : vector<8x8xf32>
    %114 = math.exp %113 : vector<8x8xf32>
    %cst_70 = arith.constant dense<0.000000e+00> : vector<8xf32>
    %115 = vector.multi_reduction <add>, %114, %cst_70 [1] : vector<8x8xf32> to vector<8xf32>
    %116 = vector.shape_cast %115 : vector<8xf32> to vector<8x1xf32>
    %117 = vector.broadcast %116 : vector<8x1xf32> to vector<8x8xf32>
    %118 = arith.divf %114, %117 : vector<8x8xf32>
    %cst_71 = arith.constant dense<0.000000e+00> : vector<8x4xf32>
    %119 = tpu.matmul %118, %96, %cst_71 {dimension_numbers = #tpu.dot_dimension_numbers<[1], [0], [0], [1], [0, 0, 1, 1], [], []>} : vector<8x8xf32>, vector<8x4xf32>, vector<8x4xf32> -> vector<8x4xf32>
    %c0_72 = arith.constant 0 : index
    %c4 = arith.constant 4 : index
    %120 = vector.load %arg35[%c0_72, %c4] : memref<8x16xf32, #tpu.memory_space<vmem>>, vector<8x4xf32>
    tpu.vector_store %arg35[%c0_72, %c4], %119 {strides = array<i32>} : memref<8x16xf32, #tpu.memory_space<vmem>>, vector<8x4xf32>,
    %121 = vector.extract_strided_slice %20 {offsets = [0, 8], sizes = [8, 4], strides = [1, 1]} : vector<8x16xf32> to vector<8x4xf32>
    %122 = vector.extract_strided_slice %27 {offsets = [0, 8], sizes = [8, 4], strides = [1, 1]} : vector<8x32xf32> to vector<8x4xf32>
    %123 = vector.extract_strided_slice %27 {offsets = [0, 24], sizes = [8, 4], strides = [1, 1]} : vector<8x32xf32> to vector<8x4xf32>
    %cst_73 = arith.constant dense<0.000000e+00> : vector<8x8xf32>
    %124 = tpu.matmul %121, %122, %cst_73 {dimension_numbers = #tpu.dot_dimension_numbers<[1], [1], [0], [0], [0, 0, 1, 0], [], []>} : vector<8x4xf32>, vector<8x4xf32>, vector<8x8xf32> -> vector<8x8xf32>
    %cst_74 = arith.constant 5.000000e-01 : f32
    %125 = vector.broadcast %cst_74 : f32 to vector<8x8xf32>
    %126 = arith.mulf %124, %125 : vector<8x8xf32>
    %127 = vector.extract_strided_slice %34 {offsets = [0, 0, 2], sizes = [8, 8, 1], strides = [1, 1, 1]} : vector<8x8x8xf32> to vector<8x8x1xf32>
    %128 = vector.shape_cast %127 : vector<8x8x1xf32> to vector<8x8xf32>
    %cst_75 = arith.constant 1.000000e+00 : f32
    %129 = vector.broadcast %cst_75 : f32 to vector<8x8xf32>
    %130 = arith.addf %128, %129 : vector<8x8xf32>
    %131 = arith.mulf %126, %130 : vector<8x8xf32>
    %132 = vector.extract_strided_slice %34 {offsets = [0, 0, 6], sizes = [8, 8, 1], strides = [1, 1, 1]} : vector<8x8x8xf32> to vector<8x8x1xf32>
    %133 = vector.shape_cast %132 : vector<8x8x1xf32> to vector<8x8xf32>
    %134 = arith.addf %131, %133 : vector<8x8xf32>
    %135 = vector.broadcast %66 : vector<1x8xf32> to vector<8x8xf32>
    %136 = arith.addf %134, %135 : vector<8x8xf32>
    %cst_76 = arith.constant dense<0xFF800000> : vector<8xf32>
    %137 = vector.multi_reduction <maximumf>, %136, %cst_76 [1] : vector<8x8xf32> to vector<8xf32>
    %138 = vector.shape_cast %137 : vector<8xf32> to vector<8x1xf32>
    %139 = vector.broadcast %138 : vector<8x1xf32> to vector<8x8xf32>
    %140 = arith.subf %136, %139 : vector<8x8xf32>
    %141 = math.exp %140 : vector<8x8xf32>
    %cst_77 = arith.constant dense<0.000000e+00> : vector<8xf32>
    %142 = vector.multi_reduction <add>, %141, %cst_77 [1] : vector<8x8xf32> to vector<8xf32>
    %143 = vector.shape_cast %142 : vector<8xf32> to vector<8x1xf32>
    %144 = vector.broadcast %143 : vector<8x1xf32> to vector<8x8xf32>
    %145 = arith.divf %141, %144 : vector<8x8xf32>
    %cst_78 = arith.constant dense<0.000000e+00> : vector<8x4xf32>
    %146 = tpu.matmul %145, %123, %cst_78 {dimension_numbers = #tpu.dot_dimension_numbers<[1], [0], [0], [1], [0, 0, 1, 1], [], []>} : vector<8x8xf32>, vector<8x4xf32>, vector<8x4xf32> -> vector<8x4xf32>
    %c0_79 = arith.constant 0 : index
    %c8 = arith.constant 8 : index
    %147 = vector.load %arg35[%c0_79, %c8] : memref<8x16xf32, #tpu.memory_space<vmem>>, vector<8x4xf32>
    tpu.vector_store %arg35[%c0_79, %c8], %146 {strides = array<i32>} : memref<8x16xf32, #tpu.memory_space<vmem>>, vector<8x4xf32>,
    %148 = vector.extract_strided_slice %20 {offsets = [0, 12], sizes = [8, 4], strides = [1, 1]} : vector<8x16xf32> to vector<8x4xf32>
    %149 = vector.extract_strided_slice %27 {offsets = [0, 12], sizes = [8, 4], strides = [1, 1]} : vector<8x32xf32> to vector<8x4xf32>
    %150 = vector.extract_strided_slice %27 {offsets = [0, 28], sizes = [8, 4], strides = [1, 1]} : vector<8x32xf32> to vector<8x4xf32>
    %cst_80 = arith.constant dense<0.000000e+00> : vector<8x8xf32>
    %151 = tpu.matmul %148, %149, %cst_80 {dimension_numbers = #tpu.dot_dimension_numbers<[1], [1], [0], [0], [0, 0, 1, 0], [], []>} : vector<8x4xf32>, vector<8x4xf32>, vector<8x8xf32> -> vector<8x8xf32>
    %cst_81 = arith.constant 5.000000e-01 : f32
    %152 = vector.broadcast %cst_81 : f32 to vector<8x8xf32>
    %153 = arith.mulf %151, %152 : vector<8x8xf32>
    %154 = vector.extract_strided_slice %34 {offsets = [0, 0, 3], sizes = [8, 8, 1], strides = [1, 1, 1]} : vector<8x8x8xf32> to vector<8x8x1xf32>
    %155 = vector.shape_cast %154 : vector<8x8x1xf32> to vector<8x8xf32>
    %cst_82 = arith.constant 1.000000e+00 : f32
    %156 = vector.broadcast %cst_82 : f32 to vector<8x8xf32>
    %157 = arith.addf %155, %156 : vector<8x8xf32>
    %158 = arith.mulf %153, %157 : vector<8x8xf32>
    %159 = vector.extract_strided_slice %34 {offsets = [0, 0, 7], sizes = [8, 8, 1], strides = [1, 1, 1]} : vector<8x8x8xf32> to vector<8x8x1xf32>
    %160 = vector.shape_cast %159 : vector<8x8x1xf32> to vector<8x8xf32>
    %161 = arith.addf %158, %160 : vector<8x8xf32>
    %162 = vector.broadcast %66 : vector<1x8xf32> to vector<8x8xf32>
    %163 = arith.addf %161, %162 : vector<8x8xf32>
    %cst_83 = arith.constant dense<0xFF800000> : vector<8xf32>
    %164 = vector.multi_reduction <maximumf>, %163, %cst_83 [1] : vector<8x8xf32> to vector<8xf32>
    %165 = vector.shape_cast %164 : vector<8xf32> to vector<8x1xf32>
    %166 = vector.broadcast %165 : vector<8x1xf32> to vector<8x8xf32>
    %167 = arith.subf %163, %166 : vector<8x8xf32>
    %168 = math.exp %167 : vector<8x8xf32>
    %cst_84 = arith.constant dense<0.000000e+00> : vector<8xf32>
    %169 = vector.multi_reduction <add>, %168, %cst_84 [1] : vector<8x8xf32> to vector<8xf32>
    %170 = vector.shape_cast %169 : vector<8xf32> to vector<8x1xf32>
    %171 = vector.broadcast %170 : vector<8x1xf32> to vector<8x8xf32>
    %172 = arith.divf %168, %171 : vector<8x8xf32>
    %cst_85 = arith.constant dense<0.000000e+00> : vector<8x4xf32>
    %173 = tpu.matmul %172, %150, %cst_85 {dimension_numbers = #tpu.dot_dimension_numbers<[1], [0], [0], [1], [0, 0, 1, 1], [], []>} : vector<8x8xf32>, vector<8x4xf32>, vector<8x4xf32> -> vector<8x4xf32>
    %c0_86 = arith.constant 0 : index
    %c12 = arith.constant 12 : index
    %174 = vector.load %arg35[%c0_86, %c12] : memref<8x16xf32, #tpu.memory_space<vmem>>, vector<8x4xf32>
    tpu.vector_store %arg35[%c0_86, %c12], %173 {strides = array<i32>} : memref<8x16xf32, #tpu.memory_space<vmem>>, vector<8x4xf32>,
    %c0_87 = arith.constant 0 : index
    %c0_88 = arith.constant 0 : index
    %175 = vector.load %arg35[%c0_87, %c0_88] : memref<8x16xf32, #tpu.memory_space<vmem>>, vector<8x16xf32>
    %cst_89 = arith.constant dense<0.000000e+00> : vector<8x16xf32>
    %176 = tpu.matmul %175, %58, %cst_89 {dimension_numbers = #tpu.dot_dimension_numbers<[1], [0], [0], [1], [0, 0, 1, 1], [], []>} : vector<8x16xf32>, vector<16x16xf32>, vector<8x16xf32> -> vector<8x16xf32>
    %177 = vector.broadcast %62 : vector<1x16xf32> to vector<8x16xf32>
    %178 = arith.addf %176, %177 : vector<8x16xf32>
    %179 = vector.broadcast %9 : vector<8x1xf32> to vector<8x16xf32>
    %180 = arith.mulf %178, %179 : vector<8x16xf32>
    %181 = arith.addf %1, %180 : vector<8x16xf32>
    %c0_90 = arith.constant 0 : index
    %c0_91 = arith.constant 0 : index
    %182 = vector.load %arg21[%c0_90, %c0_91] : memref<4x16xf32, #tpu.memory_space<vmem>>, vector<1x16xf32>
    %c1 = arith.constant 1 : index
    %c0_92 = arith.constant 0 : index
    %183 = vector.load %arg21[%c1, %c0_92] : memref<4x16xf32, #tpu.memory_space<vmem>>, vector<1x16xf32>
    %cst_93 = arith.constant dense<0.000000e+00> : vector<8xf32>
    %184 = vector.multi_reduction <add>, %181, %cst_93 [1] : vector<8x16xf32> to vector<8xf32>
    %185 = vector.shape_cast %184 : vector<8xf32> to vector<8x1xf32>
    %cst_94 = arith.constant 1.600000e+01 : f32
    %186 = vector.broadcast %cst_94 : f32 to vector<8x1xf32>
    %187 = arith.divf %185, %186 : vector<8x1xf32>
    %188 = vector.broadcast %187 : vector<8x1xf32> to vector<8x16xf32>
    %189 = arith.subf %181, %188 : vector<8x16xf32>
    %190 = arith.mulf %189, %189 : vector<8x16xf32>
    %cst_95 = arith.constant dense<0.000000e+00> : vector<8xf32>
    %191 = vector.multi_reduction <add>, %190, %cst_95 [1] : vector<8x16xf32> to vector<8xf32>
    %192 = vector.shape_cast %191 : vector<8xf32> to vector<8x1xf32>
    %cst_96 = arith.constant 1.600000e+01 : f32
    %193 = vector.broadcast %cst_96 : f32 to vector<8x1xf32>
    %194 = arith.divf %192, %193 : vector<8x1xf32>
    %195 = vector.broadcast %187 : vector<8x1xf32> to vector<8x16xf32>
    %196 = arith.subf %181, %195 : vector<8x16xf32>
    %cst_97 = arith.constant 9.99999974E-6 : f32
    %197 = vector.broadcast %cst_97 : f32 to vector<8x1xf32>
    %198 = arith.addf %194, %197 : vector<8x1xf32>
    %199 = math.rsqrt %198 : vector<8x1xf32>
    %200 = vector.broadcast %199 : vector<8x1xf32> to vector<8x16xf32>
    %201 = arith.mulf %196, %200 : vector<8x16xf32>
    %202 = vector.broadcast %182 : vector<1x16xf32> to vector<8x16xf32>
    %203 = arith.mulf %201, %202 : vector<8x16xf32>
    %204 = vector.broadcast %183 : vector<1x16xf32> to vector<8x16xf32>
    %205 = arith.addf %203, %204 : vector<8x16xf32>
    %c0_98 = arith.constant 0 : index
    %c0_99 = arith.constant 0 : index
    %206 = vector.load %arg22[%c0_98, %c0_99] : memref<16x32xf32, #tpu.memory_space<vmem>>, vector<16x32xf32>
    %cst_100 = arith.constant dense<0.000000e+00> : vector<8x32xf32>
    %207 = tpu.matmul %205, %206, %cst_100 {dimension_numbers = #tpu.dot_dimension_numbers<[1], [0], [0], [1], [0, 0, 1, 1], [], []>} : vector<8x16xf32>, vector<16x32xf32>, vector<8x32xf32> -> vector<8x32xf32>
    %c0_101 = arith.constant 0 : index
    %c0_102 = arith.constant 0 : index
    %208 = vector.load %arg23[%c0_101, %c0_102] : memref<1x32xf32, #tpu.memory_space<vmem>>, vector<1x32xf32>
    %209 = vector.broadcast %208 : vector<1x32xf32> to vector<8x32xf32>
    %210 = arith.addf %207, %209 : vector<8x32xf32>
    %cst_103 = arith.constant 0.000000e+00 : f32
    %211 = vector.broadcast %cst_103 : f32 to vector<8x32xf32>
    %212 = arith.maximumf %210, %211 : vector<8x32xf32>
    %c0_104 = arith.constant 0 : index
    %c0_105 = arith.constant 0 : index
    %213 = vector.load %arg24[%c0_104, %c0_105] : memref<32x16xf32, #tpu.memory_space<vmem>>, vector<32x16xf32>
    %cst_106 = arith.constant dense<0.000000e+00> : vector<8x16xf32>
    %214 = tpu.matmul %212, %213, %cst_106 {dimension_numbers = #tpu.dot_dimension_numbers<[1], [0], [0], [1], [0, 0, 1, 1], [], []>} : vector<8x32xf32>, vector<32x16xf32>, vector<8x16xf32> -> vector<8x16xf32>
    %c0_107 = arith.constant 0 : index
    %c0_108 = arith.constant 0 : index
    %215 = vector.load %arg25[%c0_107, %c0_108] : memref<1x16xf32, #tpu.memory_space<vmem>>, vector<1x16xf32>
    %216 = vector.broadcast %215 : vector<1x16xf32> to vector<8x16xf32>
    %217 = arith.addf %214, %216 : vector<8x16xf32>
    %218 = arith.addf %205, %217 : vector<8x16xf32>
    %c2 = arith.constant 2 : index
    %c0_109 = arith.constant 0 : index
    %219 = vector.load %arg21[%c2, %c0_109] : memref<4x16xf32, #tpu.memory_space<vmem>>, vector<1x16xf32>
    %c3 = arith.constant 3 : index
    %c0_110 = arith.constant 0 : index
    %220 = vector.load %arg21[%c3, %c0_110] : memref<4x16xf32, #tpu.memory_space<vmem>>, vector<1x16xf32>
    %cst_111 = arith.constant dense<0.000000e+00> : vector<8xf32>
    %221 = vector.multi_reduction <add>, %218, %cst_111 [1] : vector<8x16xf32> to vector<8xf32>
    %222 = vector.shape_cast %221 : vector<8xf32> to vector<8x1xf32>
    %cst_112 = arith.constant 1.600000e+01 : f32
    %223 = vector.broadcast %cst_112 : f32 to vector<8x1xf32>
    %224 = arith.divf %222, %223 : vector<8x1xf32>
    %225 = vector.broadcast %224 : vector<8x1xf32> to vector<8x16xf32>
    %226 = arith.subf %218, %225 : vector<8x16xf32>
    %227 = arith.mulf %226, %226 : vector<8x16xf32>
    %cst_113 = arith.constant dense<0.000000e+00> : vector<8xf32>
    %228 = vector.multi_reduction <add>, %227, %cst_113 [1] : vector<8x16xf32> to vector<8xf32>
    %229 = vector.shape_cast %228 : vector<8xf32> to vector<8x1xf32>
    %cst_114 = arith.constant 1.600000e+01 : f32
    %230 = vector.broadcast %cst_114 : f32 to vector<8x1xf32>
    %231 = arith.divf %229, %230 : vector<8x1xf32>
    %232 = vector.broadcast %224 : vector<8x1xf32> to vector<8x16xf32>
    %233 = arith.subf %218, %232 : vector<8x16xf32>
    %cst_115 = arith.constant 9.99999974E-6 : f32
    %234 = vector.broadcast %cst_115 : f32 to vector<8x1xf32>
    %235 = arith.addf %231, %234 : vector<8x1xf32>
    %236 = math.rsqrt %235 : vector<8x1xf32>
    %237 = vector.broadcast %236 : vector<8x1xf32> to vector<8x16xf32>
    %238 = arith.mulf %233, %237 : vector<8x16xf32>
    %239 = vector.broadcast %219 : vector<1x16xf32> to vector<8x16xf32>
    %240 = arith.mulf %238, %239 : vector<8x16xf32>
    %241 = vector.broadcast %220 : vector<1x16xf32> to vector<8x16xf32>
    %242 = arith.addf %240, %241 : vector<8x16xf32>
    %c0_116 = arith.constant 0 : index
    %c0_117 = arith.constant 0 : index
    %c0_118 = arith.constant 0 : index
    %243 = vector.load %arg31[%c0_116, %c0_117, %c0_118] : memref<1x8x16xf32, #tpu.memory_space<vmem>>, vector<1x8x16xf32>
    %244 = vector.shape_cast %243 : vector<1x8x16xf32> to vector<8x16xf32>
    %245 = vector.shape_cast %242 : vector<8x16xf32> to vector<1x8x16xf32>
    tpu.vector_store %arg31[%c0_116, %c0_117, %c0_118], %245 {strides = array<i32>} : memref<1x8x16xf32, #tpu.memory_space<vmem>>, vector<1x8x16xf32>,
    %246 = vector.shape_cast %80 : vector<8x8xf32> to vector<8x8x1xf32>
    %247 = vector.shape_cast %107 : vector<8x8xf32> to vector<8x8x1xf32>
    %248 = vector.shape_cast %134 : vector<8x8xf32> to vector<8x8x1xf32>
    %249 = vector.shape_cast %161 : vector<8x8xf32> to vector<8x8x1xf32>
    %250 = tpu.concatenate %246, %247, %248, %249 in 2 : vector<8x8x1xf32>, vector<8x8x1xf32>, vector<8x8x1xf32>, vector<8x8x1xf32> -> vector<8x8x4xf32>
    %251 = vector.shape_cast %250 : vector<8x8x4xf32> to vector<64x4xf32>
    %252 = vector.shape_cast %9 : vector<8x1xf32> to vector<8x1x1xf32>
    %253 = vector.shape_cast %11 : vector<8x1xf32> to vector<1x8x1xf32>
    %254 = vector.broadcast %252 : vector<8x1x1xf32> to vector<8x8x1xf32>
    %255 = vector.broadcast %253 : vector<1x8x1xf32> to vector<8x8x1xf32>
    %256 = arith.mulf %254, %255 : vector<8x8x1xf32>
    %cst_119 = arith.constant dense<0.000000e+00> : vector<64x8xf32>
    %257 = tpu.matmul %251, %48, %cst_119 {dimension_numbers = #tpu.dot_dimension_numbers<[1], [0], [0], [1], [0, 0, 1, 1], [], []>} : vector<64x4xf32>, vector<4x8xf32>, vector<64x8xf32> -> vector<64x8xf32>
    %258 = vector.broadcast %52 : vector<1x8xf32> to vector<64x8xf32>
    %259 = arith.addf %257, %258 : vector<64x8xf32>
    %260 = vector.shape_cast %259 : vector<64x8xf32> to vector<8x8x8xf32>
    %261 = vector.broadcast %256 : vector<8x8x1xf32> to vector<8x8x8xf32>
    %262 = arith.mulf %260, %261 : vector<8x8x8xf32>
    %263 = arith.addf %5, %262 : vector<8x8x8xf32>
    %c0_120 = arith.constant 0 : index
    %c0_121 = arith.constant 0 : index
    %264 = vector.load %arg26[%c0_120, %c0_121] : memref<4x8xf32, #tpu.memory_space<vmem>>, vector<1x8xf32>
    %c1_122 = arith.constant 1 : index
    %c0_123 = arith.constant 0 : index
    %265 = vector.load %arg26[%c1_122, %c0_123] : memref<4x8xf32, #tpu.memory_space<vmem>>, vector<1x8xf32>
    %cst_124 = arith.constant dense<0.000000e+00> : vector<8x8xf32>
    %266 = vector.multi_reduction <add>, %263, %cst_124 [2] : vector<8x8x8xf32> to vector<8x8xf32>
    %267 = vector.shape_cast %266 : vector<8x8xf32> to vector<8x8x1xf32>
    %cst_125 = arith.constant 8.000000e+00 : f32
    %268 = vector.broadcast %cst_125 : f32 to vector<8x8x1xf32>
    %269 = arith.divf %267, %268 : vector<8x8x1xf32>
    %270 = vector.broadcast %269 : vector<8x8x1xf32> to vector<8x8x8xf32>
    %271 = arith.subf %263, %270 : vector<8x8x8xf32>
    %272 = arith.mulf %271, %271 : vector<8x8x8xf32>
    %cst_126 = arith.constant dense<0.000000e+00> : vector<8x8xf32>
    %273 = vector.multi_reduction <add>, %272, %cst_126 [2] : vector<8x8x8xf32> to vector<8x8xf32>
    %274 = vector.shape_cast %273 : vector<8x8xf32> to vector<8x8x1xf32>
    %cst_127 = arith.constant 8.000000e+00 : f32
    %275 = vector.broadcast %cst_127 : f32 to vector<8x8x1xf32>
    %276 = arith.divf %274, %275 : vector<8x8x1xf32>
    %277 = vector.broadcast %269 : vector<8x8x1xf32> to vector<8x8x8xf32>
    %278 = arith.subf %263, %277 : vector<8x8x8xf32>
    %cst_128 = arith.constant 9.99999974E-6 : f32
    %279 = vector.broadcast %cst_128 : f32 to vector<8x8x1xf32>
    %280 = arith.addf %276, %279 : vector<8x8x1xf32>
    %281 = math.rsqrt %280 : vector<8x8x1xf32>
    %282 = vector.broadcast %281 : vector<8x8x1xf32> to vector<8x8x8xf32>
    %283 = arith.mulf %278, %282 : vector<8x8x8xf32>
    %284 = vector.shape_cast %264 : vector<1x8xf32> to vector<1x1x8xf32>
    %285 = vector.broadcast %284 : vector<1x1x8xf32> to vector<8x8x8xf32>
    %286 = arith.mulf %283, %285 : vector<8x8x8xf32>
    %287 = vector.shape_cast %265 : vector<1x8xf32> to vector<1x1x8xf32>
    %288 = vector.broadcast %287 : vector<1x1x8xf32> to vector<8x8x8xf32>
    %289 = arith.addf %286, %288 : vector<8x8x8xf32>
    %290 = vector.shape_cast %289 : vector<8x8x8xf32> to vector<64x8xf32>
    %c0_129 = arith.constant 0 : index
    %c0_130 = arith.constant 0 : index
    %291 = vector.load %arg27[%c0_129, %c0_130] : memref<8x16xf32, #tpu.memory_space<vmem>>, vector<8x16xf32>
    %cst_131 = arith.constant dense<0.000000e+00> : vector<64x16xf32>
    %292 = tpu.matmul %290, %291, %cst_131 {dimension_numbers = #tpu.dot_dimension_numbers<[1], [0], [0], [1], [0, 0, 1, 1], [], []>} : vector<64x8xf32>, vector<8x16xf32>, vector<64x16xf32> -> vector<64x16xf32>
    %c0_132 = arith.constant 0 : index
    %c0_133 = arith.constant 0 : index
    %293 = vector.load %arg28[%c0_132, %c0_133] : memref<1x16xf32, #tpu.memory_space<vmem>>, vector<1x16xf32>
    %294 = vector.broadcast %293 : vector<1x16xf32> to vector<64x16xf32>
    %295 = arith.addf %292, %294 : vector<64x16xf32>
    %cst_134 = arith.constant 0.000000e+00 : f32
    %296 = vector.broadcast %cst_134 : f32 to vector<64x16xf32>
    %297 = arith.maximumf %295, %296 : vector<64x16xf32>
    %c0_135 = arith.constant 0 : index
    %c0_136 = arith.constant 0 : index
    %298 = vector.load %arg29[%c0_135, %c0_136] : memref<16x8xf32, #tpu.memory_space<vmem>>, vector<16x8xf32>
    %cst_137 = arith.constant dense<0.000000e+00> : vector<64x8xf32>
    %299 = tpu.matmul %297, %298, %cst_137 {dimension_numbers = #tpu.dot_dimension_numbers<[1], [0], [0], [1], [0, 0, 1, 1], [], []>} : vector<64x16xf32>, vector<16x8xf32>, vector<64x8xf32> -> vector<64x8xf32>
    %c0_138 = arith.constant 0 : index
    %c0_139 = arith.constant 0 : index
    %300 = vector.load %arg30[%c0_138, %c0_139] : memref<1x8xf32, #tpu.memory_space<vmem>>, vector<1x8xf32>
    %301 = vector.broadcast %300 : vector<1x8xf32> to vector<64x8xf32>
    %302 = arith.addf %299, %301 : vector<64x8xf32>
    %303 = vector.shape_cast %302 : vector<64x8xf32> to vector<8x8x8xf32>
    %304 = arith.addf %289, %303 : vector<8x8x8xf32>
    %c2_140 = arith.constant 2 : index
    %c0_141 = arith.constant 0 : index
    %305 = vector.load %arg26[%c2_140, %c0_141] : memref<4x8xf32, #tpu.memory_space<vmem>>, vector<1x8xf32>
    %c3_142 = arith.constant 3 : index
    %c0_143 = arith.constant 0 : index
    %306 = vector.load %arg26[%c3_142, %c0_143] : memref<4x8xf32, #tpu.memory_space<vmem>>, vector<1x8xf32>
    %cst_144 = arith.constant dense<0.000000e+00> : vector<8x8xf32>
    %307 = vector.multi_reduction <add>, %304, %cst_144 [2] : vector<8x8x8xf32> to vector<8x8xf32>
    %308 = vector.shape_cast %307 : vector<8x8xf32> to vector<8x8x1xf32>
    %cst_145 = arith.constant 8.000000e+00 : f32
    %309 = vector.broadcast %cst_145 : f32 to vector<8x8x1xf32>
    %310 = arith.divf %308, %309 : vector<8x8x1xf32>
    %311 = vector.broadcast %310 : vector<8x8x1xf32> to vector<8x8x8xf32>
    %312 = arith.subf %304, %311 : vector<8x8x8xf32>
    %313 = arith.mulf %312, %312 : vector<8x8x8xf32>
    %cst_146 = arith.constant dense<0.000000e+00> : vector<8x8xf32>
    %314 = vector.multi_reduction <add>, %313, %cst_146 [2] : vector<8x8x8xf32> to vector<8x8xf32>
    %315 = vector.shape_cast %314 : vector<8x8xf32> to vector<8x8x1xf32>
    %cst_147 = arith.constant 8.000000e+00 : f32
    %316 = vector.broadcast %cst_147 : f32 to vector<8x8x1xf32>
    %317 = arith.divf %315, %316 : vector<8x8x1xf32>
    %318 = vector.broadcast %310 : vector<8x8x1xf32> to vector<8x8x8xf32>
    %319 = arith.subf %304, %318 : vector<8x8x8xf32>
    %cst_148 = arith.constant 9.99999974E-6 : f32
    %320 = vector.broadcast %cst_148 : f32 to vector<8x8x1xf32>
    %321 = arith.addf %317, %320 : vector<8x8x1xf32>
    %322 = math.rsqrt %321 : vector<8x8x1xf32>
    %323 = vector.broadcast %322 : vector<8x8x1xf32> to vector<8x8x8xf32>
    %324 = arith.mulf %319, %323 : vector<8x8x8xf32>
    %325 = vector.shape_cast %305 : vector<1x8xf32> to vector<1x1x8xf32>
    %326 = vector.broadcast %325 : vector<1x1x8xf32> to vector<8x8x8xf32>
    %327 = arith.mulf %324, %326 : vector<8x8x8xf32>
    %328 = vector.shape_cast %306 : vector<1x8xf32> to vector<1x1x8xf32>
    %329 = vector.broadcast %328 : vector<1x1x8xf32> to vector<8x8x8xf32>
    %330 = arith.addf %327, %329 : vector<8x8x8xf32>
    %c0_149 = arith.constant 0 : index
    %c0_150 = arith.constant 0 : index
    %c0_151 = arith.constant 0 : index
    %c0_152 = arith.constant 0 : index
    %331 = vector.load %arg32[%c0_149, %c0_150, %c0_151, %c0_152] : memref<1x8x8x8xf32, #tpu.memory_space<vmem>>, vector<1x8x8x8xf32>
    %332 = vector.shape_cast %331 : vector<1x8x8x8xf32> to vector<8x8x8xf32>
    %333 = vector.shape_cast %330 : vector<8x8x8xf32> to vector<1x8x8x8xf32>
    tpu.vector_store %arg32[%c0_149, %c0_150, %c0_151, %c0_152], %333 {strides = array<i32>} : memref<1x8x8x8xf32, #tpu.memory_space<vmem>>, vector<1x8x8x8xf32>,
    %cst_153 = arith.constant dense<0.000000e+00> : vector<16xf32>
    %334 = vector.multi_reduction <add>, %1, %cst_153 [0] : vector<8x16xf32> to vector<16xf32>
    %335 = vector.shape_cast %334 : vector<16xf32> to vector<1x16xf32>
    %cst_154 = arith.constant dense<0x7F800000> : vector<16xf32>
    %336 = vector.multi_reduction <minimumf>, %1, %cst_154 [0] : vector<8x16xf32> to vector<16xf32>
    %337 = vector.shape_cast %336 : vector<16xf32> to vector<1x16xf32>
    %cst_155 = arith.constant dense<0xFF800000> : vector<16xf32>
    %338 = vector.multi_reduction <maximumf>, %1, %cst_155 [0] : vector<8x16xf32> to vector<16xf32>
    %339 = vector.shape_cast %338 : vector<16xf32> to vector<1x16xf32>
    %340 = arith.mulf %1, %1 : vector<8x16xf32>
    %cst_156 = arith.constant dense<0.000000e+00> : vector<16xf32>
    %341 = vector.multi_reduction <add>, %340, %cst_156 [0] : vector<8x16xf32> to vector<16xf32>
    %342 = vector.shape_cast %341 : vector<16xf32> to vector<1x16xf32>
    %343 = tpu.concatenate %335, %337, %339, %342 in 1 : vector<1x16xf32>, vector<1x16xf32>, vector<1x16xf32>, vector<1x16xf32> -> vector<1x64xf32>
    %c0_157 = arith.constant 0 : index
    %c0_158 = arith.constant 0 : index
    %c0_159 = arith.constant 0 : index
    %344 = vector.load %arg33[%c0_157, %c0_158, %c0_159] : memref<1x1x64xf32, #tpu.memory_space<vmem>>, vector<1x1x64xf32>
    %345 = vector.shape_cast %344 : vector<1x1x64xf32> to vector<1x64xf32>
    %346 = vector.shape_cast %343 : vector<1x64xf32> to vector<1x1x64xf32>
    tpu.vector_store %arg33[%c0_157, %c0_158, %c0_159], %346 {strides = array<i32>} : memref<1x1x64xf32, #tpu.memory_space<vmem>>, vector<1x1x64xf32>,
    %cst_160 = arith.constant dense<0.000000e+00> : vector<8xf32>
    %347 = vector.multi_reduction <add>, %28, %cst_160 [0] : vector<64x8xf32> to vector<8xf32>
    %348 = vector.shape_cast %347 : vector<8xf32> to vector<1x8xf32>
    %cst_161 = arith.constant dense<0x7F800000> : vector<8xf32>
    %349 = vector.multi_reduction <minimumf>, %28, %cst_161 [0] : vector<64x8xf32> to vector<8xf32>
    %350 = vector.shape_cast %349 : vector<8xf32> to vector<1x8xf32>
    %cst_162 = arith.constant dense<0xFF800000> : vector<8xf32>
    %351 = vector.multi_reduction <maximumf>, %28, %cst_162 [0] : vector<64x8xf32> to vector<8xf32>
    %352 = vector.shape_cast %351 : vector<8xf32> to vector<1x8xf32>
    %353 = arith.mulf %28, %28 : vector<64x8xf32>
    %cst_163 = arith.constant dense<0.000000e+00> : vector<8xf32>
    %354 = vector.multi_reduction <add>, %353, %cst_163 [0] : vector<64x8xf32> to vector<8xf32>
    %355 = vector.shape_cast %354 : vector<8xf32> to vector<1x8xf32>
    %356 = tpu.concatenate %348, %350, %352, %355 in 1 : vector<1x8xf32>, vector<1x8xf32>, vector<1x8xf32>, vector<1x8xf32> -> vector<1x32xf32>
    %c0_164 = arith.constant 0 : index
    %c0_165 = arith.constant 0 : index
    %c0_166 = arith.constant 0 : index
    %357 = vector.load %arg34[%c0_164, %c0_165, %c0_166] : memref<1x1x32xf32, #tpu.memory_space<vmem>>, vector<1x1x32xf32>
    %358 = vector.shape_cast %357 : vector<1x1x32xf32> to vector<1x32xf32>
    %359 = vector.shape_cast %356 : vector<1x32xf32> to vector<1x1x32xf32>
    tpu.vector_store %arg34[%c0_164, %c0_165, %c0_166], %359 {strides = array<i32>} : memref<1x1x32xf32, #tpu.memory_space<vmem>>, vector<1x1x32xf32>,
    return
  }
  func.func @transform_0(%arg0: i32, %arg1: i32) -> (i32, i32, i32) {
    %c0_i32 = arith.constant 0 : i32
    %c0_i32_0 = arith.constant 0 : i32
    return %arg0, %arg1, %c0_i32 : i32, i32, i32
  }
  func.func @transform_1(%arg0: i32, %arg1: i32) -> (i32, i32, i32) {
    %c0_i32 = arith.constant 0 : i32
    %c0_i32_0 = arith.constant 0 : i32
    %c0_i32_1 = arith.constant 0 : i32
    return %arg0, %c0_i32, %c0_i32_0 : i32, i32, i32
  }
  func.func @transform_2(%arg0: i32, %arg1: i32) -> (i32, i32, i32, i32) {
    %c0_i32 = arith.constant 0 : i32
    %c0_i32_0 = arith.constant 0 : i32
    %c0_i32_1 = arith.constant 0 : i32
    return %arg0, %arg1, %c0_i32, %c0_i32_0 : i32, i32, i32, i32
  }
  func.func @transform_3(%arg0: i32, %arg1: i32) -> (i32, i32, i32) {
    %c0_i32 = arith.constant 0 : i32
    %c0_i32_0 = arith.constant 0 : i32
    %c0_i32_1 = arith.constant 0 : i32
    return %arg0, %c0_i32, %c0_i32_0 : i32, i32, i32
  }
  func.func @transform_4(%arg0: i32, %arg1: i32) -> (i32, i32, i32) {
    %c0_i32 = arith.constant 0 : i32
    %c0_i32_0 = arith.constant 0 : i32
    return %arg0, %arg1, %c0_i32 : i32, i32, i32
  }
  func.func @transform_5(%arg0: i32, %arg1: i32) -> (i32, i32, i32) {
    %c0_i32 = arith.constant 0 : i32
    %c0_i32_0 = arith.constant 0 : i32
    %c0_i32_1 = arith.constant 0 : i32
    return %arg0, %c0_i32, %c0_i32_0 : i32, i32, i32
  }
  func.func @transform_6(%arg0: i32, %arg1: i32) -> (i32, i32, i32) {
    %c0_i32 = arith.constant 0 : i32
    %c0_i32_0 = arith.constant 0 : i32
    %c0_i32_1 = arith.constant 0 : i32
    return %arg0, %c0_i32, %c0_i32_0 : i32, i32, i32
  }
  func.func @transform_7(%arg0: i32, %arg1: i32) -> (i32, i32) {
    %c0_i32 = arith.constant 0 : i32
    %c0_i32_0 = arith.constant 0 : i32
    %c0_i32_1 = arith.constant 0 : i32
    return %c0_i32, %c0_i32_0 : i32, i32
  }
  func.func @transform_8(%arg0: i32, %arg1: i32) -> (i32, i32) {
    %c0_i32 = arith.constant 0 : i32
    %c0_i32_0 = arith.constant 0 : i32
    %c0_i32_1 = arith.constant 0 : i32
    return %c0_i32, %c0_i32_0 : i32, i32
  }
  func.func @transform_9(%arg0: i32, %arg1: i32) -> (i32, i32) {
    %c0_i32 = arith.constant 0 : i32
    %c0_i32_0 = arith.constant 0 : i32
    %c0_i32_1 = arith.constant 0 : i32
    return %c0_i32, %c0_i32_0 : i32, i32
  }
  func.func @transform_10(%arg0: i32, %arg1: i32) -> (i32, i32) {
    %c0_i32 = arith.constant 0 : i32
    %c0_i32_0 = arith.constant 0 : i32
    %c0_i32_1 = arith.constant 0 : i32
    return %c0_i32, %c0_i32_0 : i32, i32
  }
  func.func @transform_11(%arg0: i32, %arg1: i32) -> (i32, i32) {
    %c0_i32 = arith.constant 0 : i32
    %c0_i32_0 = arith.constant 0 : i32
    %c0_i32_1 = arith.constant 0 : i32
    return %c0_i32, %c0_i32_0 : i32, i32
  }
  func.func @transform_12(%arg0: i32, %arg1: i32) -> (i32, i32) {
    %c0_i32 = arith.constant 0 : i32
    %c0_i32_0 = arith.constant 0 : i32
    %c0_i32_1 = arith.constant 0 : i32
    return %c0_i32, %c0_i32_0 : i32, i32
  }
  func.func @transform_13(%arg0: i32, %arg1: i32) -> (i32, i32) {
    %c0_i32 = arith.constant 0 : i32
    %c0_i32_0 = arith.constant 0 : i32
    %c0_i32_1 = arith.constant 0 : i32
    return %c0_i32, %c0_i32_0 : i32, i32
  }
  func.func @transform_14(%arg0: i32, %arg1: i32) -> (i32, i32) {
    %c0_i32 = arith.constant 0 : i32
    %c0_i32_0 = arith.constant 0 : i32
    %c0_i32_1 = arith.constant 0 : i32
    return %c0_i32, %c0_i32_0 : i32, i32
  }
  func.func @transform_15(%arg0: i32, %arg1: i32) -> (i32, i32) {
    %c0_i32 = arith.constant 0 : i32
    %c0_i32_0 = arith.constant 0 : i32
    %c0_i32_1 = arith.constant 0 : i32
    return %c0_i32, %c0_i32_0 : i32, i32
  }
  func.func @transform_16(%arg0: i32, %arg1: i32) -> (i32, i32) {
    %c0_i32 = arith.constant 0 : i32
    %c0_i32_0 = arith.constant 0 : i32
    %c0_i32_1 = arith.constant 0 : i32
    return %c0_i32, %c0_i32_0 : i32, i32
  }
  func.func @transform_17(%arg0: i32, %arg1: i32) -> (i32, i32) {
    %c0_i32 = arith.constant 0 : i32
    %c0_i32_0 = arith.constant 0 : i32
    %c0_i32_1 = arith.constant 0 : i32
    return %c0_i32, %c0_i32_0 : i32, i32
  }
  func.func @transform_18(%arg0: i32, %arg1: i32) -> (i32, i32) {
    %c0_i32 = arith.constant 0 : i32
    %c0_i32_0 = arith.constant 0 : i32
    %c0_i32_1 = arith.constant 0 : i32
    return %c0_i32, %c0_i32_0 : i32, i32
  }
  func.func @transform_19(%arg0: i32, %arg1: i32) -> (i32, i32) {
    %c0_i32 = arith.constant 0 : i32
    %c0_i32_0 = arith.constant 0 : i32
    %c0_i32_1 = arith.constant 0 : i32
    return %c0_i32, %c0_i32_0 : i32, i32
  }
  func.func @transform_20(%arg0: i32, %arg1: i32) -> (i32, i32) {
    %c0_i32 = arith.constant 0 : i32
    %c0_i32_0 = arith.constant 0 : i32
    %c0_i32_1 = arith.constant 0 : i32
    return %c0_i32, %c0_i32_0 : i32, i32
  }
  func.func @transform_21(%arg0: i32, %arg1: i32) -> (i32, i32) {
    %c0_i32 = arith.constant 0 : i32
    %c0_i32_0 = arith.constant 0 : i32
    %c0_i32_1 = arith.constant 0 : i32
    return %c0_i32, %c0_i32_0 : i32, i32
  }
  func.func @transform_22(%arg0: i32, %arg1: i32) -> (i32, i32) {
    %c0_i32 = arith.constant 0 : i32
    %c0_i32_0 = arith.constant 0 : i32
    %c0_i32_1 = arith.constant 0 : i32
    return %c0_i32, %c0_i32_0 : i32, i32
  }
  func.func @transform_23(%arg0: i32, %arg1: i32) -> (i32, i32) {
    %c0_i32 = arith.constant 0 : i32
    %c0_i32_0 = arith.constant 0 : i32
    %c0_i32_1 = arith.constant 0 : i32
    return %c0_i32, %c0_i32_0 : i32, i32
  }
  func.func @transform_24(%arg0: i32, %arg1: i32) -> (i32, i32) {
    %c0_i32 = arith.constant 0 : i32
    %c0_i32_0 = arith.constant 0 : i32
    %c0_i32_1 = arith.constant 0 : i32
    return %c0_i32, %c0_i32_0 : i32, i32
  }
  func.func @transform_25(%arg0: i32, %arg1: i32) -> (i32, i32) {
    %c0_i32 = arith.constant 0 : i32
    %c0_i32_0 = arith.constant 0 : i32
    %c0_i32_1 = arith.constant 0 : i32
    return %c0_i32, %c0_i32_0 : i32, i32
  }
  func.func @transform_26(%arg0: i32, %arg1: i32) -> (i32, i32) {
    %c0_i32 = arith.constant 0 : i32
    %c0_i32_0 = arith.constant 0 : i32
    %c0_i32_1 = arith.constant 0 : i32
    return %c0_i32, %c0_i32_0 : i32, i32
  }
  func.func @transform_27(%arg0: i32, %arg1: i32) -> (i32, i32) {
    %c0_i32 = arith.constant 0 : i32
    %c0_i32_0 = arith.constant 0 : i32
    %c0_i32_1 = arith.constant 0 : i32
    return %c0_i32, %c0_i32_0 : i32, i32
  }
  func.func @transform_28(%arg0: i32, %arg1: i32) -> (i32, i32) {
    %c0_i32 = arith.constant 0 : i32
    %c0_i32_0 = arith.constant 0 : i32
    %c0_i32_1 = arith.constant 0 : i32
    return %c0_i32, %c0_i32_0 : i32, i32
  }
  func.func @transform_29(%arg0: i32, %arg1: i32) -> (i32, i32, i32) {
    %c0_i32 = arith.constant 0 : i32
    %c0_i32_0 = arith.constant 0 : i32
    return %arg0, %arg1, %c0_i32 : i32, i32, i32
  }
  func.func @transform_30(%arg0: i32, %arg1: i32) -> (i32, i32, i32, i32) {
    %c0_i32 = arith.constant 0 : i32
    %c0_i32_0 = arith.constant 0 : i32
    %c0_i32_1 = arith.constant 0 : i32
    return %arg0, %arg1, %c0_i32, %c0_i32_0 : i32, i32, i32, i32
  }
  func.func @transform_31(%arg0: i32, %arg1: i32) -> (i32, i32, i32) {
    %c1_i32 = arith.constant 1 : i32
    %0 = arith.muli %arg0, %c1_i32 : i32
    %1 = arith.addi %0, %arg1 : i32
    %c0_i32 = arith.constant 0 : i32
    %c0_i32_0 = arith.constant 0 : i32
    %c0_i32_1 = arith.constant 0 : i32
    return %1, %c0_i32, %c0_i32_0 : i32, i32, i32
  }
  func.func @transform_32(%arg0: i32, %arg1: i32) -> (i32, i32, i32) {
    %c1_i32 = arith.constant 1 : i32
    %0 = arith.muli %arg0, %c1_i32 : i32
    %1 = arith.addi %0, %arg1 : i32
    %c0_i32 = arith.constant 0 : i32
    %c0_i32_0 = arith.constant 0 : i32
    %c0_i32_1 = arith.constant 0 : i32
    return %1, %c0_i32, %c0_i32_0 : i32, i32, i32
  }
}

</mosaic_0001>

<bundles_post_ra>
// kernel: tpu_custom_call.1
= control target key start
LH: loop header
LB: loop body
LE: loop exit
PB: predicated region body
PF: predicated region fallthrough
CT: control target
= control target key end

     0   :  { %s6117_s6 = smov 1   ;;  %s6118_s10 = smov 2   ;;  %s7965_s0 = inlined_call_operand.smem [shape: u32[33], index: -1, kind: input, shape index: {}] }
   0x1   :  { %s6197_s5 = sld [smem:[%s7965_s0]]   ;;  %s6119_s14 = smov 3  }
   0x2   :  { %s6202_s9 = sld [smem:[%s7965_s0 + %s6117_s6]]   ;;  %s6120_s18 = smov 4  }
   0x3   :  { %s6207_s13 = sld [smem:[%s7965_s0 + %s6118_s10]]   ;;  %s6121_s22 = smov 5  }
   0x4   :  { %s6212_s17 = sld [smem:[%s7965_s0 + %s6119_s14]]   ;;  %s6122_s26 = smov 6  }
   0x5   :  { %s6217_s21 = sld [smem:[%s7965_s0 + %s6120_s18]]   ;;  %s6123_s30 = smov 7  }
   0x6   :  { %s6222_s25 = sld [smem:[%s7965_s0 + %s6121_s22]]   ;;  %s6124_s4 = smov 8  }
   0x7   :  { %8021 = sst [smem:[#allocation28_spill]] %s6197_s5  ;;  %s6125_s10 = smov 9  }
   0x8   :  { %8022 = sst [smem:[#allocation29_spill]] %s6202_s9  ;;  %s6126_s15 = smov 10  }
   0x9   :  { %8023 = sst [smem:[#allocation30_spill]] %s6207_s13  ;;  %s6127_s20 = smov 11  }
   0xa   :  { %8024 = sst [smem:[#allocation31_spill]] %s6212_s17  ;;  %s6129_s1 = smov 13  }
   0xb   :  { %s6227_s29 = sld [smem:[%s7965_s0 + %s6122_s26]]   ;;  %s6128_s26 = smov 12  }
   0xc   :  { %s6232_s3 = sld [smem:[%s7965_s0 + %s6123_s30]]   ;;  %s6130_s7 = smov 14  }
   0xd   :  { %s6237_s8 = sld [smem:[%s7965_s0 + %s6124_s4]]   ;;  %s6132_s22 = smov 16  }
   0xe   :  { %s6242_s14 = sld [smem:[%s7965_s0 + %s6125_s10]]   ;;  %s6133_s28 = smov 17  }
   0xf   :  { %s6247_s19 = sld [smem:[%s7965_s0 + %s6126_s15]]   ;;  %s6131_s15 = smov 15  }
  0x10   :  { %s6252_s24 = sld [smem:[%s7965_s0 + %s6127_s20]]  }
  0x11   :  { %s6257_s30 = sld [smem:[%s7965_s0 + %s6128_s26]]  }
  0x12   :  { %8025 = sst [smem:[#allocation32_spill]] %s6232_s3 }
  0x13   :  { %8026 = sst [smem:[#allocation33_spill]] %s6237_s8 }
  0x14   :  { %8027 = sst [smem:[#allocation34_spill]] %s6242_s14 }
  0x15   :  { %s6262_s6 = sld [smem:[%s7965_s0 + %s6129_s1]]  }
  0x16   :  { %s6267_s12 = sld [smem:[%s7965_s0 + %s6130_s7]]   ;;  %s6134_s7 = smov 18  }
  0x17   :  { %8028 = sst [smem:[#allocation35_spill]] %s6257_s30 }
  0x18   :  { %s6272_s20 = sld [smem:[%s7965_s0 + %s6131_s15]]   ;;  %s6135_s15 = smov 19  }
  0x19   :  { %s6277_s27 = sld [smem:[%s7965_s0 + %s6132_s22]]   ;;  %s6136_s22 = smov 20  }
  0x1a   :  { %s6282_s4 = sld [smem:[%s7965_s0 + %s6133_s28]]   ;;  %s6137_s28 = smov 21  }
  0x1b   :  { %8029 = sst [smem:[#allocation36_spill]] %s6262_s6 }
  0x1c   :  { %8030 = sst [smem:[#allocation37_spill]] %s6267_s12 }
  0x1d   :  { %s6287_s6 = sld [smem:[%s7965_s0 + %s6134_s7]]   ;;  %s6138_s7 = smov 22  }
  0x1e   :  { %8031 = sst [smem:[#allocation38_spill]] %s6272_s20 }
  0x1f   :  { %8032 = sst [smem:[#allocation39_spill]] %s6277_s27 }
  0x20   :  { %8033 = sst [smem:[#allocation40_spill]] %s6282_s4 }
  0x21   :  { %s6292_s20 = sld [smem:[%s7965_s0 + %s6135_s15]]   ;;  %s6139_s15 = smov 23  }
  0x22   :  { %s6297_s27 = sld [smem:[%s7965_s0 + %s6136_s22]]   ;;  %s6140_s22 = smov 24  }
  0x23   :  { %8034 = sst [smem:[#allocation41_spill]] %s6287_s6 }
  0x24   :  { %s6302_s4 = sld [smem:[%s7965_s0 + %s6137_s28]]   ;;  %s6141_s28 = smov 25  }
  0x25   :  { %s6307_s6 = sld [smem:[%s7965_s0 + %s6138_s7]]   ;;  %s6142_s7 = smov 26  }
  0x27   :  { %8035 = sst [smem:[#allocation42_spill]] %s6292_s20 }
  0x28   :  { %8036 = sst [smem:[#allocation43_spill]] %s6297_s27 }
  0x29   :  { %s6312_s20 = sld [smem:[%s7965_s0 + %s6139_s15]]   ;;  %s6143_s15 = smov 27  }
  0x2a   :  { %8037 = sst [smem:[#allocation44_spill]] %s6302_s4 }
  0x2b   :  { %8038 = sst [smem:[#allocation45_spill]] %s6307_s6 }
  0x2c   :  { %s6317_s27 = sld [smem:[%s7965_s0 + %s6140_s22]]   ;;  %s6144_s22 = smov 28  }
  0x2d   :  { %s6322_s4 = sld [smem:[%s7965_s0 + %s6141_s28]]   ;;  %s6145_s28 = smov 29  }
  0x2e   :  { %s6327_s6 = sld [smem:[%s7965_s0 + %s6142_s7]]   ;;  %s6146_s7 = smov 30  }
  0x2f   :  { %8039 = sst [smem:[#allocation46_spill]] %s6312_s20 }
  0x30   :  { %s6332_s20 = sld [smem:[%s7965_s0 + %s6143_s15]]   ;;  %s6147_s15 = smov 31  }
  0x32   :  { %8040 = sst [smem:[#allocation47_spill]] %s6317_s27 }
  0x33   :  { %8041 = sst [smem:[#allocation48_spill]] %s6322_s4 }
  0x34   :  { %8042 = sst [smem:[#allocation49_spill]] %s6327_s6 }
  0x35   :  { %s6337_s27 = sld [smem:[%s7965_s0 + %s6144_s22]]   ;;  %s6148_s22 = smov 32  }
  0x36   :  { %8043 = sst [smem:[#allocation50_spill]] %s6332_s20 }
  0x37   :  { %s6342_s4 = sld [smem:[%s7965_s0 + %s6145_s28]]  }
  0x38   :  { %s6347_s6 = sld [smem:[%s7965_s0 + %s6146_s7]]  }
  0x39   :  { %s6352_s20 = sld [smem:[%s7965_s0 + %s6147_s15]]  }
  0x3b   :  { %8044 = sst [smem:[#allocation51_spill]] %s6337_s27 }
  0x3c   :  { %s6357_s27 = sld [smem:[%s7965_s0 + %s6148_s22]]  }
  0x3d   :  { %8045 = sst [smem:[#allocation52_spill]] %s6342_s4 }
  0x3e   :  { %8046 = sst [smem:[#allocation53_spill]] %s6347_s6 }
  0x3f   :  { %8047 = sst [smem:[#allocation54_spill]] %s6352_s20 }
  0x42   :  { %8048 = sst [smem:[#allocation55_spill]] %s6357_s27 }
  0x43   :  { %71 = vsyncpa [#allocation4], 0 }
  0x44   :  { %73 = vsyncpa [#allocation4 + $0x1], 0 }
  0x45   :  { %74 = vsyncpa [#allocation7], 0 }
  0x46   :  { %76 = vsyncpa [#allocation7 + $0x1], 0 }
  0x47   :  { %77 = vsyncpa [#allocation10], 0 }
  0x48   :  { %78 = vsyncpa [#allocation13], 0 }
  0x49   :  { %79 = vsyncpa [#allocation5], 0 }
  0x4a   :  { %81 = vsyncpa [#allocation5 + $0x1], 0 }
  0x4b   :  { %82 = vsyncpa [#allocation17], 0 }
  0x4c   :  { %84 = vsyncpa [#allocation17 + $0x1], 0 }
  0x4d   :  { %85 = vsyncpa [#allocation20], 0 }
  0x4e   :  { %87 = vsyncpa [#allocation20 + $0x1], 0  ;;  %s6359_s28 = smov 0   ;;  %s6361_s1 = smov 0  }
  0x4f   :  { %s6363_s2 = smov 0   ;;  %s6365_s0 = smov 0  }
  0x50   :  { %s6367_s7 = smov 0   ;;  %s6369_s10 = smov 0  }
  0x51 LB: > { %s8049_s14 = sld [smem:[#allocation34_spill]]  ;;  %s8050_s13 = sld [smem:[#allocation30_spill]]  ;;  %s6095_s28 = sphi %s6359_s28, %s8137_s28   ;;  %s6115_s10 = sphi %s6369_s10, %s93_s10   ;;  %s6111_s7 = sphi %s6367_s7, %s8140_s7   ;;  %s6107_s0 = sphi %s6365_s0, %s8139_s0   ;;  %s6103_s2 = sphi %s6363_s2, %s8135_s2   ;;  %s6099_s1 = sphi %s6361_s1, %s8138_s1  }
  0x52   : > { %s8051_s12 = sld [smem:[#allocation37_spill]]  ;;  %s8052_s3 = sld [smem:[#allocation32_spill]] }
  0x53   : > { %s8053_s17 = sld [smem:[#allocation31_spill]]  ;;  %s8054_s30 = sld [smem:[#allocation35_spill]] }
  0x54   : > { %s8055_s8 = sld [smem:[#allocation33_spill]]  ;;  %8056 = sst [smem:[#allocation56_spill]] %s6095_s28 }
  0x55   : > { %8057 = sst [smem:[#allocation57_spill]] %s6103_s2  ;;  %s6390_s11 = sadd.s32 4294967295, %s6115_s10  }
  0x56   : > { %8058 = sst [smem:[#allocation58_spill]] %s6115_s10  ;;  %p5061_p0 = scmp.ge.s32.totalorder %s6115_s10, 1 }
  0x57   : > { %p7976_p1 = scmp.eq.s32.totalorder %s6390_s11, 0  ;;  %p872_p2 = scmp.lt.s32.totalorder %s6115_s10, 3 }
  0x58   : > { %s6149_s16 = smov [#allocation9]   ;;  %s6150_s22 = smov [#allocation12]  }
  0x59   : > { %p6395_p3 = pnand %p5061_p0, %p872_p2  ;;  %s888_s18 = sshll.u32 %s6149_s16, 4  ;;  %s889_s18 = int_to_ptr.vmem [resolvable:$true] %s888_s18 }
  0x5a   : > { %s916_s23 = sshll.u32 %s6150_s22, 4  ;;  %s5727_s20 = scalar_lea.hbm %s8055_s8, 16  ;;  %s6408_s23 = int_to_ptr.vmem [resolvable:$true] %s916_s23 }
  0x5b   : > { %s8059_s15 = scalar_select %p6395_p3, 1, 0 }
  0x5c   : > { %p5457_p5 = pneg %p6395_p3  ;;  %p5728_p7 = scmp.ne.s32.totalorder %s8055_s8, %s5727_s20 }
  0x5d   : > { %p5734_p11 = scmp.lt.u32.totalorder %s5727_s20, %s8055_s8 }
  0x5e   : > { %p6404_p6 = pnand %p5457_p5, %p7976_p1 }
  0x60   : > { %s8060_s26 = scalar_select %p6404_p6, 1, 0 }
  0x61   : > { %p6414_p8 = pneg %p6404_p6 }
  0x63   : > { %s8061_s6 = scalar_select %p6414_p8, 1, 0 }
  0x64   : > { %p5730_p9 = pnand %p6414_p8, %p5728_p7 }
  0x66   : > { %p5731_p10 = pneg %p5730_p9 }
  0x68   : > { %p5736_p12 = pnand %p5734_p11, %p5731_p10 }
  0x6a   : > { %5739 = shalt.err (!%p5736_p12)
}
  0x6b   : > { %s5740_s16 = scalar_lea.vmem %s889_s18, 16  ;;  %s5747_s22 = scalar_lea.vmem %s889_s18, 32 }
  0x6c   : > { %p5741_p13 = scmp.ne.s32.totalorder %s889_s18, %s5740_s16  ;;  %p5748_p5 = scmp.lt.s32.totalorder %s889_s18, %s889_s18 }
  0x6d   : > { %p5749_p4 = scmp.lt.s32.totalorder %s5747_s22, %s5740_s16 }
  0x6e   : > { %p5743_p0 = pnand %p5741_p13, %p6414_p8 }
  0x6f   : > { %p5750_p1 = por %p5749_p4, %p5748_p5 }
  0x70   : > { %p5744_p2 = pneg %p5743_p0 }
  0x72   : > { %p5751_p3 = pnand %p5750_p1, %p5744_p2 }
  0x74   : > { %5754 = shalt.err (!%p5751_p3)
}
  0x75   : > { %5460 = dma.hbm_to_vmem [thread:$0]  (!%p6404_p6), %s8055_s8, 16, %s889_s18, [#allocation10]  }
  0x76   : > { %s5755_s20 = scalar_lea.hbm %s8054_s30, 16 }
  0x77   : > { %p5756_p7 = scmp.ne.s32.totalorder %s8054_s30, %s5755_s20  ;;  %p5762_p11 = scmp.lt.u32.totalorder %s5755_s20, %s8054_s30 }
  0x79   : > { %p5758_p9 = pnand %p5756_p7, %p6414_p8 }
  0x7b   : > { %p5759_p10 = pneg %p5758_p9 }
  0x7d   : > { %p5764_p12 = pnand %p5762_p11, %p5759_p10 }
  0x7f   : > { %5767 = shalt.err (!%p5764_p12)
}
  0x80   : > { %s5768_s16 = scalar_lea.vmem %s6408_s23, 16  ;;  %s5775_s22 = scalar_lea.vmem %s6408_s23, 32 }
  0x81   : > { %p5769_p1 = scmp.ne.s32.totalorder %s6408_s23, %s5768_s16  ;;  %p5776_p13 = scmp.lt.s32.totalorder %s6408_s23, %s6408_s23 }
  0x82   : > { %p5777_p0 = scmp.lt.s32.totalorder %s5775_s22, %s5768_s16 }
  0x83   : > { %p5771_p3 = pnand %p5769_p1, %p6414_p8 }
  0x84   : > { %p5778_p2 = por %p5777_p0, %p5776_p13 }
  0x85   : > { %p5772_p4 = pneg %p5771_p3 }
  0x87   : > { %p5779_p5 = pnand %p5778_p2, %p5772_p4 }
  0x89   : > { %5782 = shalt.err (!%p5779_p5)
}
  0x8a   : > { %5466 = dma.hbm_to_vmem [thread:$0]  (!%p6404_p6), %s8054_s30, 16, %s6408_s23, [#allocation13]  }
  0x8b   : > { %s105_s20 = sadd.s32 1, %s6111_s7  ;;  %s168_s16 = sadd.s32 1, %s6103_s2 }
  0x8c   : > { %p107_p7 = scmp.ge.s32.totalorder %s105_s20, 2  ;;  %p175_p9 = scmp.ne.s32.totalorder %s6103_s2, %s6099_s1 }
  0x8d   : > { %p176_p10 = scmp.eq.s32.totalorder %s6115_s10, 0  ;;  %p181_p12 = scmp.ne.s32.totalorder %s6099_s1, %s6095_s28 }
  0x8e   : > { %s8142_s20 = smov (%p107_p7, %s105_s20), 0  ;;  %p775_p1 = scmp.eq.s32.totalorder %s6390_s11, 1 }
  0x8f   : > { %8062 = sst [smem:[#allocation59_spill]] %s8142_s20  ;;  %p6450_p11 = por %p176_p10, %p175_p9 }
  0x90   : > { %s163_s23 = ssub.s32 %s6111_s7, %s8142_s20  ;;  %p8064_p4 = scmp.eq.s32.totalorder %s6390_s11, 0 }
  0x91   : > { %p166_p3 = scmp.eq.s32.totalorder %s163_s23, 0  ;;  %p6465_p0 = por %p775_p1, %p175_p9 }
  0x92   : > { %p6461_p13 = por %p8064_p4, %p181_p12  ;;  %s8068_s30 = sadd.s32 4294967294, %s6115_s10  }
  0x93   : > { %s8066_s8 = scalar_select %p6465_p0, 1, 0 }
  0x94   : > { %s8065_s18 = scalar_select %p6461_p13, 1, 0 }
  0x95   : > { %8067 = sst [smem:[#allocation60_spill]] %s8066_s8  ;;  %p781_p2 = scmp.eq.s32.totalorder %s8068_s30, 1 }
  0x96   : > { %s6472_s27 = scalar_select %p166_p3, %s6103_s2, %s168_s16  }
  0x97   : > { %p6474_p5 = por %p781_p2, %p181_p12  ;;  %p5497_p7 = scmp.lt.s32.totalorder %s6115_s10, 2 }
  0x98   : > { %8069 = sst [smem:[#allocation61_spill]] %s6472_s27  ;;  %s6480_s23 = sand.u32 1, %s6103_s2  }
  0x99   : > { %s8070_s4 = scalar_select %p6474_p5, 1, 0 }
  0x9a   : > { %s1023_s20 = sand.u32 1, %s6115_s10   ;;  %p6485_p9 = pnand %p5497_p7, %p6450_p11 }
  0x9b   : > { %8071 = sst [smem:[#allocation62_spill]] %s8070_s4  ;;  %s7988_s30 = sshll.u32 %s6111_s7, 4 }
  0x9c   : > { %s8072_s28 = scalar_select %p6485_p9, 1, 0 }
  0x9d   : > { %s6493_s16 = scalar_lea.hbm %s8053_s17, %s7988_s30  ;;  %s1026_s27 = scalar_lea.vmem [#allocation6], %s6480_s23 }
  0x9e   : > { %s1033_s4 = sshll.u32 %s1026_s27, 4  ;;  %s6498_s2 = scalar_lea.sflag [#allocation7], %s1023_s20  ;;  %s6496_s4 = int_to_ptr.vmem [resolvable:$true] %s1033_s4 }
  0x9f   : > { %s5783_s22 = scalar_lea.hbm %s6493_s16, 16  ;;  %p6504_p11 = pneg %p6485_p9 }
  0xa0   : > { %p5784_p10 = scmp.ne.s32.totalorder %s6493_s16, %s5783_s22  ;;  %s5788_s30 = scalar_lea.hbm %s8053_s17, 32 }
  0xa1   : > { %s8073_s10 = scalar_select %p6504_p11, 1, 0 }
  0xa2   : > { %p5786_p12 = pnand %p6504_p11, %p5784_p10  ;;  %p5789_p3 = scmp.lt.u32.totalorder %s6493_s16, %s8053_s17 }
  0xa3   : > { %p5790_p4 = scmp.lt.u32.totalorder %s5788_s30, %s5783_s22  ;;  %p5792_p7 = scmp.lt.u32.totalorder %s5783_s22, %s6493_s16 }
  0xa4   : > { %p5787_p1 = pneg %p5786_p12 }
  0xa5   : > { %p5791_p2 = por %p5790_p4, %p5789_p3 }
  0xa7   : > { %p5793_p5 = por %p5792_p7, %p5791_p2 }
  0xa9   : > { %p5794_p0 = pnand %p5793_p5, %p5787_p1 }
  0xab   : > { %5797 = shalt.err (!%p5794_p0)
}
  0xac   : > { %s5798_s27 = scalar_lea.vmem %s6496_s4, 16  ;;  %s6151_s20 = smov [#allocation6]  }
  0xad   : > { %p5799_p13 = scmp.ne.s32.totalorder %s6496_s4, %s5798_s27  ;;  %s5803_s8 = sshll.u32 %s6151_s20, 4  ;;  %s5804_s8 = int_to_ptr.vmem [resolvable:$false] %s5803_s8 }
  0xae   : > { %s5805_s9 = scalar_lea.vmem %s5804_s8, 32  ;;  %p5806_p10 = scmp.lt.s32.totalorder %s6496_s4, %s5804_s8 }
  0xaf   : > { %p5801_p6 = pnand %p5799_p13, %p6504_p11  ;;  %p5807_p12 = scmp.lt.s32.totalorder %s5805_s9, %s5798_s27 }
  0xb1   : > { %p5802_p8 = pneg %p5801_p6  ;;  %p5808_p3 = por %p5807_p12, %p5806_p10 }
  0xb3   : > { %p5809_p4 = pnand %p5808_p3, %p5802_p8 }
  0xb5   : > { %5812 = shalt.err (!%p5809_p4)
}
  0xb6   : > { %5476 = dma.hbm_to_vmem [thread:$0]  (!%p6485_p9), %s6493_s16, 16, %s6496_s4, %s6498_s2  }
  0xb7   : > { %s6152_s30 = smov [#allocation11]   ;;  %s6153_s20 = smov [#allocation14]  }
  0xb8   : > { %s902_s22 = sshll.u32 %s6152_s30, 4  ;;  %s930_s17 = sshll.u32 %s6153_s20, 4  ;;  %s903_s22 = int_to_ptr.vmem [resolvable:$true] %s902_s22  ;;  %s931_s17 = int_to_ptr.vmem [resolvable:$true] %s930_s17 }
  0xb9   : > { %s5813_s8 = scalar_lea.hbm %s6247_s19, 16  ;;  %p8074_p13 = scmp.ne.s32.totalorder %s8061_s6, 0 }
  0xba   : > { %p5814_p6 = scmp.ne.s32.totalorder %s6247_s19, %s5813_s8  ;;  %p5820_p5 = scmp.lt.u32.totalorder %s5813_s8, %s6247_s19 }
  0xbc   : > { %p5816_p8 = pnand %p5814_p6, %p8074_p13 }
  0xbe   : > { %p5817_p0 = pneg %p5816_p8 }
  0xc0   : > { %p5822_p1 = pnand %p5820_p5, %p5817_p0 }
  0xc2   : > { %5825 = shalt.err (!%p5822_p1)
}
  0xc3   : > { %s5826_s9 = scalar_lea.vmem %s903_s22, 16  ;;  %s5833_s4 = scalar_lea.vmem %s903_s22, 32 }
  0xc4   : > { %p5827_p2 = scmp.ne.s32.totalorder %s903_s22, %s5826_s9  ;;  %p5834_p12 = scmp.lt.s32.totalorder %s903_s22, %s903_s22 }
  0xc5   : > { %p5835_p3 = scmp.lt.s32.totalorder %s5833_s4, %s5826_s9 }
  0xc6   : > { %p5829_p7 = pnand %p5827_p2, %p8074_p13 }
  0xc7   : > { %p5836_p4 = por %p5835_p3, %p5834_p12 }
  0xc8   : > { %p5830_p10 = pneg %p5829_p7 }
  0xca   : > { %p5837_p9 = pnand %p5836_p4, %p5830_p10 }
  0xcc   : > { %5840 = shalt.err (!%p5837_p9)
}
  0xcd   : > { %p8075_p11 = scmp.ne.s32.totalorder %s8060_s26, 0  ;;  %s5841_s16 = scalar_lea.hbm %s8051_s12, 16 }
  0xce   : > { %p5842_p6 = scmp.ne.s32.totalorder %s8051_s12, %s5841_s16  ;;  %p5848_p5 = scmp.lt.u32.totalorder %s5841_s16, %s8051_s12 }
  0xcf   : > { %5463 = dma.hbm_to_vmem [thread:$0]  (!%p8075_p11), %s6247_s19, 16, %s903_s22, [#allocation10]  }
  0xd0   : > { %p5844_p8 = pnand %p5842_p6, %p8074_p13 }
  0xd2   : > { %p5845_p0 = pneg %p5844_p8 }
  0xd4   : > { %p5850_p1 = pnand %p5848_p5, %p5845_p0 }
  0xd6   : > { %5853 = shalt.err (!%p5850_p1)
}
  0xd7   : > { %s5854_s27 = scalar_lea.vmem %s931_s17, 16  ;;  %s5861_s30 = scalar_lea.vmem %s931_s17, 32 }
  0xd8   : > { %p5855_p9 = scmp.ne.s32.totalorder %s931_s17, %s5854_s27  ;;  %p5862_p10 = scmp.lt.s32.totalorder %s931_s17, %s931_s17 }
  0xd9   : > { %p5863_p12 = scmp.lt.s32.totalorder %s5861_s30, %s5854_s27 }
  0xda   : > { %p5857_p2 = pnand %p5855_p9, %p8074_p13 }
  0xdb   : > { %p5864_p3 = por %p5863_p12, %p5862_p10 }
  0xdc   : > { %p5858_p7 = pneg %p5857_p2 }
  0xde   : > { %p5865_p4 = pnand %p5864_p3, %p5858_p7 }
  0xe0   : > { %5868 = shalt.err (!%p5865_p4)
}
  0xe1   : > { %5469 = dma.hbm_to_vmem [thread:$0]  (!%p8075_p11), %s8051_s12, 16, %s931_s17, [#allocation13]  }
  0xe2   : > { %s5067_s6 = sshll.u32 %s6480_s23, 6  ;;  %s5163_s22 = sshll.u32 %s6111_s7, 10 }
  0xe3   : > { %s6547_s20 = scalar_lea.hbm %s8050_s13, %s5163_s22  ;;  %s1004_s8 = scalar_lea.vmem [#allocation3], %s5067_s6 }
  0xe4   : > { %s1013_s9 = sshll.u32 %s1004_s8, 4  ;;  %s1001_s26 = scalar_lea.sflag [#allocation4], %s6480_s23  ;;  %s6549_s9 = int_to_ptr.vmem [resolvable:$true] %s1013_s9 }
  0xe5   : > { %s5869_s4 = scalar_lea.hbm %s6547_s20, 1024  ;;  %p8076_p6 = scmp.ne.s32.totalorder %s8073_s10, 0 }
  0xe6   : > { %p5870_p13 = scmp.ne.s32.totalorder %s6547_s20, %s5869_s4  ;;  %s5874_s16 = scalar_lea.hbm %s8050_s13, 2048 }
  0xe7   : > { %p5875_p11 = scmp.lt.u32.totalorder %s6547_s20, %s8050_s13  ;;  %p5876_p5 = scmp.lt.u32.totalorder %s5874_s16, %s5869_s4 }
  0xe8   : > { %p5872_p8 = pnand %p5870_p13, %p8076_p6  ;;  %p5878_p9 = scmp.lt.u32.totalorder %s5869_s4, %s6547_s20 }
  0xe9   : > { %p5877_p1 = por %p5876_p5, %p5875_p11 }
  0xea   : > { %p5873_p0 = pneg %p5872_p8 }
  0xeb   : > { %p5879_p2 = por %p5878_p9, %p5877_p1 }
  0xed   : > { %p5880_p7 = pnand %p5879_p2, %p5873_p0 }
  0xef   : > { %5883 = shalt.err (!%p5880_p7)
}
  0xf0   : > { %s5884_s17 = scalar_lea.vmem %s6549_s9, 1024  ;;  %s6154_s27 = smov [#allocation3]  }
  0xf1   : > { %p5885_p10 = scmp.ne.s32.totalorder %s6549_s9, %s5884_s17  ;;  %s5889_s30 = sshll.u32 %s6154_s27, 4  ;;  %s5890_s30 = int_to_ptr.vmem [resolvable:$false] %s5889_s30 }
  0xf2   : > { %s5891_s6 = scalar_lea.vmem %s5890_s30, 2048  ;;  %p5892_p4 = scmp.lt.s32.totalorder %s6549_s9, %s5890_s30 }
  0xf3   : > { %p5887_p12 = pnand %p5885_p10, %p8076_p6  ;;  %p5893_p13 = scmp.lt.s32.totalorder %s5891_s6, %s5884_s17 }
  0xf5   : > { %p5888_p3 = pneg %p5887_p12  ;;  %p5894_p8 = por %p5893_p13, %p5892_p4 }
  0xf7   : > { %p5895_p11 = pnand %p5894_p8, %p5888_p3 }
  0xf9   : > { %5898 = shalt.err (!%p5895_p11)
}
  0xfa   : > { %s6155_s22 = smov 128   ;;  %s6156_s8 = smov 8  }
  0xfb   : > { %p8077_p0 = scmp.ne.s32.totalorder %s8072_s28, 0  ;;  %s8078_s4 = sshll.u32 %s6111_s7, 4 }
  0xfc   : > { %s6574_s16 = scalar_lea.hbm %s6227_s29, %s8078_s4  ;;  %s1060_s17 = scalar_lea.vmem [#allocation8], %s6480_s23 }
  0xfd   : > { %5473 = dma.hbm_to_vmem [thread:$0]  (!%p8077_p0), %s6547_s20, 1024, %s6549_s9, %s1001_s26, %s6155_s22, %s6155_s22, %s6156_s8  }
  0xfe   : > { %s1067_s27 = sshll.u32 %s1060_s17, 4  ;;  %s5899_s30 = scalar_lea.hbm %s6574_s16, 16  ;;  %s1068_s27 = int_to_ptr.vmem [resolvable:$true] %s1067_s27 }
  0xff   : > { %p5900_p5 = scmp.ne.s32.totalorder %s6574_s16, %s5899_s30  ;;  %s5904_s6 = scalar_lea.hbm %s6227_s29, 32 }
 0x100   : > { %p5905_p2 = scmp.lt.u32.totalorder %s6574_s16, %s6227_s29  ;;  %p5906_p7 = scmp.lt.u32.totalorder %s5904_s6, %s5899_s30 }
 0x101   : > { %p5902_p1 = pnand %p5900_p5, %p8076_p6  ;;  %p5908_p12 = scmp.lt.u32.totalorder %s5899_s30, %s6574_s16 }
 0x102   : > { %p5907_p10 = por %p5906_p7, %p5905_p2 }
 0x103   : > { %p5903_p9 = pneg %p5902_p1 }
 0x104   : > { %p5909_p3 = por %p5908_p12, %p5907_p10 }
 0x106   : > { %p5910_p4 = pnand %p5909_p3, %p5903_p9 }
 0x108   : > { %5913 = shalt.err (!%p5910_p4)
}
 0x109   : > { %s5914_s20 = scalar_lea.vmem %s1068_s27, 16  ;;  %s6157_s23 = smov [#allocation8]  }
 0x10a   : > { %p5915_p13 = scmp.ne.s32.totalorder %s1068_s27, %s5914_s20  ;;  %s5919_s9 = sshll.u32 %s6157_s23, 4  ;;  %s5920_s9 = int_to_ptr.vmem [resolvable:$false] %s5919_s9 }
 0x10b   : > { %s5921_s26 = scalar_lea.vmem %s5920_s9, 32  ;;  %p5922_p5 = scmp.lt.s32.totalorder %s1068_s27, %s5920_s9 }
 0x10c   : > { %p5917_p8 = pnand %p5915_p13, %p8076_p6  ;;  %p5923_p1 = scmp.lt.s32.totalorder %s5921_s26, %s5914_s20 }
 0x10e   : > { %p5918_p11 = pneg %p5917_p8  ;;  %p5924_p0 = por %p5923_p1, %p5922_p5 }
 0x110   : > { %p5925_p2 = pnand %p5924_p0, %p5918_p11 }
 0x112   : > { %5928 = shalt.err (!%p5925_p2)
}
 0x113   : > { %p8079_p7 = scmp.ne.s32.totalorder %s8072_s28, 0  ;;  %p8080_p9 = scmp.ne.s32.totalorder %s8059_s15, 0 }
 0x115   : > { %5479 = dma.hbm_to_vmem [thread:$0]  (!%p8079_p7), %s6574_s16, 16, %s1068_s27, %s6498_s2  }
 0x116   : > { %1076 = sbr.rel (%p8080_p9) target bundleno = 3482 (0xd9a), region = 136 }
 0x11d   : > { %s6594_s10 = sand.u32 1, %s6099_s1   ;;  %p8081_p6 = scmp.ne.s32.totalorder %s8065_s18, 0 }
 0x11e   : > { %s5073_s22 = sshll.u32 %s6594_s10, 6  ;;  %s1079_s8 = scalar_lea.sflag [#allocation4], %s6594_s10 }
 0x11f   : > { %s6600_s4 = scalar_lea.vmem [#allocation3], %s5073_s22 }
 0x120   : > { %6066 = dma.done.wait (%p8081_p6), %s1079_s8, 1024  }
 0x121   : > { %6068 = vsyncadd (%p8081_p6), %s1079_s8, 4294966272  ;;  %s8011_s28 = sand.u32 1, %s6390_s11   ;;  %s1090_s15 = scalar_lea.vmem [#allocation6], %s6594_s10 }
 0x122   : > { %s1088_s2 = scalar_lea.sflag [#allocation7], %s8011_s28 }
 0x123   : > { %6070 = dma.done.wait (%p8081_p6), %s1088_s2, 32  }
 0x124   : > { %6072 = vsyncadd (%p8081_p6), %s1088_s2, 4294967264  ;;  %s1098_s16 = scalar_lea.vmem [#allocation8], %s6594_s10  ;;  %p8082_p0 = scmp.eq.s32.totalorder %s6390_s11, 0 }
 0x126   : > { %6074 = dma.done.wait (%p8082_p0), [#allocation10], 32   ;;  %p8083_p10 = pmov %p8082_p0 }
 0x127   : > { %p8084_p12 = pmov %p8082_p0 }
 0x128   : > { %6076 = vsyncadd (%p8083_p10), [#allocation10], 4294967264 }
 0x129   : > { %6078 = dma.done.wait (%p8084_p12), [#allocation13], 32   ;;  %p8085_p3 = pmov %p8082_p0 }
 0x12a   : > { %s8086_s5 = sld [smem:[#allocation28_spill]]  ;;  %p1238_p4 = scmp.lt.s32.totalorder %s6107_s0, 1  ;;  %v8002_v0 = vmov 0.0|0.0   ;;  %vm6159_vm0 = vmmov 0   ;;  %v8004_v1 = vmov 0.0   ;;  %v6161_v2 = vmov 0  }
 0x12b   : > { %6080 = vsyncadd (%p8085_p3), [#allocation13], 4294967264  ;;  %5399 = vmatprep.subr.bf16.mxu1 %v8002_v0  ;;  %5247 = vmatprep.mubr.msk.f32.mxu1 %vm6159_vm0, %v8004_v1  ;;  %v1278_v3 = vld [vmem:[%s8052_s3] sm:$0xff]  ;;  %v1279_v4 = vld [vmem:[%s8052_s3 + $0x8] sm:$0xff]  ;;  %s8087_s30 = sld [smem:[#allocation29_spill]]  ;;  %s8088_s20 = sld [smem:[#allocation36_spill]] }
 0x12c   : > { %s1239_s18 = scalar_select %p1238_p4, %s6107_s0, 1  ;;  %5616 = vset.pattern.permute.xlu0 %v6161_v2  ;;  %5617 = vset.pattern.permute.xlu1 %v6161_v2  ;;  %v5400_v5 = vpack.c.bf16 %v1279_v4, %v1278_v3  ;;  %v1367_v7 = vld [vmem:[%s8049_s14] sm:$0xff]  ;;  %v1368_v8 = vld [vmem:[%s8049_s14 + $0x8] sm:$0xff]  ;;  %vm1463_vm1 = vcmask 64512   ;;  %vm1287_vm2 = vcmask 130048   ;;  %v1267_v15 = vld [vmem:[%s6600_s4 + $0x8] sm:$0xff] }
 0x12d   : > { %v5403_v10 = vpack.c.bf16 %v1368_v8, %v1367_v7  ;;  %v1455_v11 = vld [vmem:[%s6252_s24] sm:$0xff]  ;;  %v1266_v12 = vld [vmem:[%s6600_s4] sm:$0xff]  ;;  %v1268_v16 = vld [vmem:[%s6600_s4 + $0x10] sm:$0xff]  ;;  %s8089_s26 = sld [smem:[#allocation38_spill]]  ;;  %vm1685_vm3 = vcmask 1043456   ;;  %s8090_s8 = sld [smem:[#allocation40_spill]] }
 0x12e   : > { %s6630_s17 = sshll.u32 %s1239_s18, 3  ;;  %5401 = vmatpush3.bf16.msra.mxu1 %v5400_v5  ;;  %5257 = vmatprep.subr.mxu0 %v1455_v11  ;;  %v1269_v20 = vld [vmem:[%s6600_s4 + $0x18] sm:$0xff]  ;;  %v1270_v21 = vld [vmem:[%s6600_s4 + $0x20] sm:$0xff]  ;;  %v1271_v23 = vld [vmem:[%s6600_s4 + $0x28] sm:$0xff]  ;;  %s6162_s2 = smov 124   ;;  %vm1681_vm4 = vcmask 31744  }
 0x12f   : > { %s6634_s27 = scalar_lea.vmem %s6222_s25, %s6630_s17  ;;  %s6650_s23 = scalar_lea.vmem %s6217_s21, %s6630_s17  ;;  %5402 = vmatprep.subr.bf16.mxu1 %v8002_v0  ;;  %5258 = vmatpush3.msra.mxu0 %v1455_v11  ;;  %v1274_v22 = vld [vmem:[%s1090_s15] sm:$0x1]  ;;  %v1272_v24 = vld [vmem:[%s6600_s4 + $0x30] sm:$0xff]  ;;  %v5084_v28 = vld [vmem:[#allocation9] ss:$0 sm:$0xff]  ;;  %v6166_v7 = vmov 1  }
 0x130   : > { %s6640_s6 = scalar_lea.vmem %s8086_s5, %s6630_s17  ;;  %v1276_v6 = vld [vmem:[%s6634_s27] sm:$0xff]  ;;  %5259 = vmatprep.mubr.msk.f32.mxu0 %vm1463_vm1, %v1266_v12  ;;  %5295 = vmatprep.subr.mxu0 %v8004_v1  ;;  %v5086_v38 = vld [vmem:[#allocation11] ss:$0 sm:$0xff]  ;;  %v1595_v43 = vld [vmem:[#allocation14] sm:$0x1]  ;;  %s6163_s15 = smov 120  }
 0x131   : > { %1451 = vperm.xlu0 %5616, %v1276_v6   ;;  %v1264_v9 = vld [vmem:[%s6640_s6] sm:$0xff]  ;;  %s1248_s9 = scalar_lea.vmem %s8087_s30, %s6630_s17  ;;  %v1594_v14 = vld [vmem:[%s8088_s20 + $0x8] sm:$0xff]  ;;  %5260 = vmatmul.mubr.msk.f32.vlgmr.msra.gmra.mrb[0].mxu0 %vm1463_vm1, %v1267_v15  ;;  %v5088_v44 = vld [vmem:[#allocation12] ss:$0 sm:$0xff]  ;;  %s6164_s18 = smov 116   ;;  %v6165_v6 = vmov 4  }
 0x132   : > { %v1593_v13 = vld [vmem:[%s8088_s20] sm:$0xff]  ;;  %5248 = vmatmul.mubr.msk.f32.vlgmr.msra.gmra.mrb[0].mxu1 %vm1287_vm2, %v1264_v9  ;;  %5262 = vmatprep.mubr.msk.f32.mxu0 %vm1463_vm1, %v1268_v16  ;;  %v6167_v9 = vmov 5   ;;  %v6169_v11 = vmov 6   ;;  %v6170_v12 = vmov 3   ;;  %vm2001_vm5 = vcmask 1041409   ;;  %s6173_s17 = smov 104  }
 0x133   : > { %v1275_v17 = vld [vmem:[%s6650_s23] sm:$0xff]  ;;  %5404 = vmatpush3.bf16.msra.mxu1 %v5403_v10  ;;  %5254 = vmatprep.mubr.msk.f32.mxu1 %vm6159_vm0, %v8004_v1  ;;  %v5406_v19 = vpack.c.bf16 %v1594_v14, %v1593_v13  ;;  %v1760_v42 = vld [vmem:[%s8090_s8 + $0x8] sm:$0xff]  ;;  %v6168_v10 = vmov 2   ;;  %v6171_v13 = vmov 7   ;;  %vm2003_vm6 = vcmask 1042434   ;;  %s6174_s30 = smov 100  }
 0x134   : > { %v1265_v18 = vld [vmem:[%s1248_s9] sm:$0xff]  ;;  %5405 = vmatprep.subr.bf16.mxu1 %v8002_v0  ;;  %vm2005_vm7 = vcmask 1043459   ;;  %vm2007_vm8 = vcmask 1044484   ;;  %vm2009_vm9 = vcmask 1045509   ;;  %vm2011_vm10 = vcmask 1046534   ;;  %s6175_s9 = smov 108  }
 0x135   : > { %1363 = vperm.xlu0 %5616, %v1275_v17   ;;  %5263 = vmatmul.mubr.msk.f32.gmra.mrb[2].mxu0 %vm1463_vm1, %v1269_v20  ;;  %v1273_v25 = vld [vmem:[%s6600_s4 + $0x38] sm:$0xff]  ;;  %vm2013_vm11 = vcmask 1047559   ;;  %vm2486_vm12 = vcmask 64544   ;;  %vm2789_vm13 = vcmask 97344   ;;  %vm3092_vm14 = vcmask 130144   ;;  %s6184_s5 = smov [#allocation15]  }
 0x136   : > { %5255 = vmatmul.mubr.msk.f32.vlgmr.msra.gmra.mrb[2].mxu1 %vm1287_vm2, %v1265_v18  ;;  %5265 = vmatprep.mubr.msk.f32.mxu0 %vm1463_vm1, %v1270_v21  ;;  %v1669_v26 = vld [vmem:[%s8089_s26] sm:$0xf]  ;;  %vm3619_vm15 = vcmask 7168  }
 0x137   : > { %5407 = vmatpush3.bf16.msra.mxu1 %v5406_v19  ;;  %5275 = vmatprep.mubr.msk.f32.mxu1 %vm6159_vm0, %v8004_v1  ;;  %v1759_v41 = vld [vmem:[%s8090_s8] sm:$0xff] }
 0x138   : > { %5278 = vmatprep.subr.mxu1 %v8004_v1  ;;  %v5409_v47 = vpack.c.bf16 %v1760_v42, %v1759_v41 }
 0x139   : > { %5266 = vmatmul.mubr.msk.f32.gmra.mrb[4].mxu0 %vm1463_vm1, %v1271_v23 }
 0x13a   : > { %5276 = vmatmul.mubr.msk.f32.vlgmr.msra.gmra.mrb[4].mxu1 %vm1287_vm2, %v1274_v22  ;;  %5268 = vmatprep.mubr.msk.f32.mxu0 %vm1463_vm1, %v1272_v24 }
 0x13b   : > { %5280 = vmatprep.mubr.msk.f32.mxu1 %vm6159_vm0, %v8004_v1  ;;  %5279 = vmatpush3.msk.msra.mxu1 %vm1685_vm3, %v1669_v26 }
 0x13c   : > { %5408 = vmatprep.subr.bf16.mxu1 %v8002_v0 }
 0x13d   : > { %5269 = vmatmul.mubr.msk.f32.gmra.mrb[6].mxu0 %vm1463_vm1, %v1273_v25 }
 0x13e   : > { %5297 = vmatprep.mubr.msk.f32.mxu0 %vm6159_vm0, %v8004_v1 }
 0x1b0   : > { %v1452_v27 = vpop.permute.xlu0 %1451 }
 0x1b4   : > { %v6692_v29 = vpop.permute.xlu0 %1363 }
 0x1b5   : > { %8091 = vst [vmem:[#allocation63_spill] sm:$0xff] %v6692_v29 }
 0x204   : > { %v5261_v31 = vpop.f32.mrb[0].mxu0 }
 0x205   : > { %v1357_v30 = vpop.f32.mrb[0].mxu1  ;;  %v1554_v34 = vpop.f32.mrb[1].mxu0  ;;  %v6704_v51 = vadd.f32 %v5261_v31, %v5088_v44 }
 0x206   : > { %v1358_v32 = vadd.f32 %v5084_v28, %v1357_v30  ;;  %v5249_v33 = vpop.f32.mrb[1].mxu1  ;;  %v6732_v62 = vadd.f32 %v5088_v44, %v1554_v34 }
 0x207   : > { %v6717_v56 = vadd.f32 1.0, %v6704_v51 }
 0x208   : > { %v6695_v35 = vmul.f32 %v6692_v29, %v1358_v32  ;;  %v5264_v37 = vpop.f32.mrb[2].mxu0  ;;  %v1927_v4 = vadd.f32 1.0, %v6732_v62 }
 0x209   : > { %v1445_v36 = vpop.f32.mrb[2].mxu1  ;;  %v1564_v40 = vpop.f32.mrb[3].mxu0  ;;  %v6714_v55 = vadd.f32 %v5264_v37, %v5088_v44 }
 0x20a   : > { %2185 = vrot.lane.b32.xlu0 %v6695_v35, %s6162_s2  ;;  %v5256_v39 = vpop.f32.mrb[3].mxu1  ;;  %v1446_v48 = vadd.f32 %v5086_v38, %v1445_v36  ;;  %v6737_v3 = vadd.f32 %v5088_v44, %v1564_v40 }
 0x20b   : > { %v6730_v61 = vadd.f32 1.0, %v6714_v55 }
 0x20c   : > { %v5267_v46 = vpop.f32.mrb[4].mxu0  ;;  %v6711_v54 = vmul.f32 %v1452_v27, %v1446_v48  ;;  %v1929_v5 = vadd.f32 1.0, %v6737_v3 }
 0x20d   : > { %v1665_v45 = vpop.f32.mrb[4].mxu1  ;;  %v1574_v52 = vpop.f32.mrb[5].mxu0  ;;  %v6727_v60 = vadd.f32 %v5267_v46, %v5088_v44 }
 0x20e   : > { %v6701_v49 = vadd.f32 %v1665_v45, %v1595_v43  ;;  %2488 = vrot.lane.b32.xlu0 %v6695_v35, %s6163_s15  ;;  %v5277_v50 = vpop.f32.mrb[5].mxu1  ;;  %8093 = vst [vmem:[#allocation65_spill] sm:$0xff] %v6711_v54  ;;  %v1575_v8 = vadd.f32 %v5088_v44, %v1574_v52 }
 0x20f   : > { %v1932_v63 = vadd.f32 1.0, %v6727_v60 }
 0x210   : > { %8092 = vst [vmem:[#allocation64_spill] sm:$0xff] %v6701_v49  ;;  %1774 = vrot.lane.b32.xlu1 %v6701_v49, %s6163_s15  ;;  %5281 = vmatmul.mubr.msk.f32.vlgmr.msra.gmra.mrb[6].mxu1 %vm1681_vm4, %v6701_v49  ;;  %v5270_v53 = vpop.f32.mrb[6].mxu0  ;;  %v1931_v14 = vadd.f32 1.0, %v1575_v8 }
 0x211   : > { %5410 = vmatpush3.bf16.msra.mxu1 %v5409_v47  ;;  %5287 = vmatprep.mubr.msk.f32.mxu1 %vm6159_vm0, %v8004_v1  ;;  %v6719_v57 = vadd.f32 %v5270_v53, %v5088_v44  ;;  %v1584_v58 = vpop.f32.mrb[7].mxu0 }
 0x212   : > { %2791 = vrot.lane.b32.xlu0 %v6695_v35, %s6164_s18  ;;  %5290 = vmatprep.subr.mxu1 %v8004_v1  ;;  %v6722_v59 = vadd.f32 %v5088_v44, %v1584_v58 }
 0x213   : > { %v1934_v27 = vadd.f32 1.0, %v6719_v57 }
 0x214   : > { %2187 = vrot.lane.b32.xlu1 %v6711_v54, %s6162_s2  ;;  %v1933_v33 = vadd.f32 1.0, %v6722_v59  ;;  %s8101_s2 = sld [smem:[#allocation43_spill]] }
 0x216   : > { %1947 = vperm.xlu0 %5616, %v6717_v56  }
 0x218   : > { %2490 = vrot.lane.b32.xlu1 %v6711_v54, %s6163_s15 }
 0x21a   : > { %1953 = vperm.xlu0 %5616, %v6730_v61   ;;  %s8102_s15 = smov %s8101_s2 }
 0x21c   : > { %2793 = vrot.lane.b32.xlu1 %v6711_v54, %s6164_s18  ;;  %s6176_s18 = smov 4  }
 0x21e   : > { %1959 = vperm.xlu0 %5616, %v1932_v63  }
 0x220   : > { %1944 = vperm.xlu1 %5617, %v1927_v4  }
 0x222   : > { %5619 = vset.pattern.permute.xlu0 %v6165_v6 }
 0x223   : > { %2029 = vperm.xlu0 %5619, %v6704_v51  }
 0x224   : > { %1950 = vperm.xlu1 %5617, %v1929_v5  }
 0x227   : > { %2041 = vperm.xlu0 %5619, %v6727_v60  }
 0x228   : > { %5618 = vset.pattern.permute.xlu1 %v6165_v6 }
 0x229   : > { %2026 = vperm.xlu1 %5618, %v6732_v62  }
 0x22b   : > { %5622 = vset.pattern.permute.xlu0 %v6166_v7 }
 0x22c   : > { %2268 = vperm.xlu0 %5622, %v6717_v56  }
 0x22d   : > { %2032 = vperm.xlu1 %5618, %v6737_v3  }
 0x230   : > { %2271 = vperm.xlu0 %5622, %v1929_v5  }
 0x231   : > { %2035 = vperm.xlu1 %5618, %v6714_v55  }
 0x234   : > { %2280 = vperm.xlu0 %5622, %v1932_v63  }
 0x235   : > { %5620 = vset.pattern.permute.xlu1 %v6166_v7 }
 0x236   : > { %2265 = vperm.xlu1 %5620, %v1927_v4  }
 0x238   : > { %5625 = vset.pattern.permute.xlu0 %v6167_v9 }
 0x239   : > { %2333 = vperm.xlu0 %5625, %v6704_v51  }
 0x23a   : > { %5621 = vset.pattern.permute.xlu1 %v6165_v6 }
 0x23b   : > { %2038 = vperm.xlu1 %5621, %v1575_v8  }
 0x23d   : > { %2336 = vperm.xlu0 %5625, %v6737_v3  }
 0x23f   : > { %5623 = vset.pattern.permute.xlu1 %v6166_v7 }
 0x240   : > { %2274 = vperm.xlu1 %5623, %v6730_v61  }
 0x241   : > { %2345 = vperm.xlu0 %5625, %v6727_v60  }
 0x244   : > { %5624 = vset.pattern.permute.xlu1 %v6167_v9 }
 0x245   : > { %5628 = vset.pattern.permute.xlu0 %v6168_v10  ;;  %2330 = vperm.xlu1 %5624, %v6732_v62  }
 0x246   : > { %2571 = vperm.xlu0 %5628, %v6717_v56  }
 0x249   : > { %2339 = vperm.xlu1 %5624, %v6714_v55  }
 0x24a   : > { %2574 = vperm.xlu0 %5628, %v1929_v5  }
 0x24d   : > { %5626 = vset.pattern.permute.xlu1 %v6168_v10 }
 0x24e   : > { %2583 = vperm.xlu0 %5628, %v1932_v63   ;;  %2568 = vperm.xlu1 %5626, %v1927_v4  }
 0x252   : > { %5631 = vset.pattern.permute.xlu0 %v6169_v11  ;;  %5627 = vset.pattern.permute.xlu1 %v6167_v9 }
 0x253   : > { %2636 = vperm.xlu0 %5631, %v6704_v51   ;;  %2342 = vperm.xlu1 %5627, %v1575_v8  }
 0x257   : > { %2639 = vperm.xlu0 %5631, %v6737_v3   ;;  %5629 = vset.pattern.permute.xlu1 %v6168_v10 }
 0x258   : > { %2577 = vperm.xlu1 %5629, %v6730_v61  }
 0x25b   : > { %2648 = vperm.xlu0 %5631, %v6727_v60  }
 0x25c   : > { %5630 = vset.pattern.permute.xlu1 %v6169_v11 }
 0x25d   : > { %2633 = vperm.xlu1 %5630, %v6732_v62  }
 0x25f   : > { %5634 = vset.pattern.permute.xlu0 %v6170_v12 }
 0x260   : > { %2874 = vperm.xlu0 %5634, %v6717_v56  }
 0x261   : > { %2642 = vperm.xlu1 %5630, %v6714_v55  }
 0x264   : > { %2877 = vperm.xlu0 %5634, %v1929_v5  }
 0x265   : > { %5632 = vset.pattern.permute.xlu1 %v6170_v12 }
 0x266   : > { %2871 = vperm.xlu1 %5632, %v1927_v4  }
 0x268   : > { %2886 = vperm.xlu0 %5634, %v1932_v63  }
 0x26a   : > { %5633 = vset.pattern.permute.xlu1 %v6169_v11 }
 0x26b   : > { %2645 = vperm.xlu1 %5633, %v1575_v8  }
 0x26c   : > { %5637 = vset.pattern.permute.xlu0 %v6171_v13 }
 0x26d   : > { %2939 = vperm.xlu0 %5637, %v6704_v51  }
 0x26f   : > { %5635 = vset.pattern.permute.xlu1 %v6170_v12 }
 0x270   : > { %2880 = vperm.xlu1 %5635, %v6730_v61  }
 0x271   : > { %2942 = vperm.xlu0 %5637, %v6737_v3  }
 0x274   : > { %5636 = vset.pattern.permute.xlu1 %v6171_v13 }
 0x275   : > { %2948 = vperm.xlu0 %5637, %v1575_v8   ;;  %2936 = vperm.xlu1 %5636, %v6732_v62  }
 0x279   : > { %2945 = vperm.xlu1 %5636, %v6714_v55   ;;  %2954 = vperm.xlu0 %5637, %v6722_v59  }
 0x27c   : > { %v2186_v16 = vpop.permute.xlu0 %2185 }
 0x27d   : > { %2951 = vperm.xlu1 %5636, %v6727_v60   ;;  %5657 = vset.pattern.permute.xlu0 %v6161_v2 }
 0x280   : > { %v2489_v19 = vpop.permute.xlu0 %2488 }
 0x281   : > { %5638 = vset.pattern.permute.xlu1 %v6161_v2 }
 0x282   : > { %1956 = vperm.xlu1 %5638, %v1931_v14   ;;  %v1775_v15 = vpop.permute.xlu1 %1774 }
 0x283   : > { %5288 = vmatmul.mubr.msk.f32.vlgmr.msra.gmra.mrb[8].mxu1 %vm1287_vm2, %v1775_v15 }
 0x284   : > { %5291 = vmatpush3.xpose.msk.msra.mxu1 %vm1681_vm4, %v6711_v54  ;;  %5292 = vmatprep.mubr.msk.f32.mxu1 %vm6159_vm0, %v8004_v1  ;;  %v2792_v21 = vpop.permute.xlu0 %2791 }
 0x285   : > { %5300 = vmatprep.subr.mxu1 %v8004_v1 }
 0x286   : > { %5639 = vset.pattern.permute.xlu1 %v6166_v7  ;;  %v2188_v17 = vpop.permute.xlu1 %2187 }
 0x287   : > { %2277 = vperm.xlu1 %5639, %v1931_v14   ;;  %5293 = vmatmul.mubr.msk.f32.vlgmr.msra.gmra.mrb[10].mxu1 %vm1681_vm4, %v6695_v35 }
 0x288   : > { %5301 = vmatpush3.xpose.msk.msra.mxu1 %vm1681_vm4, %v2188_v17  ;;  %5302 = vmatprep.mubr.msk.f32.mxu1 %vm6159_vm0, %v8004_v1  ;;  %v1670_v17 = vlaneseq }
 0x289   : > { %5310 = vmatprep.subr.mxu1 %v8004_v1 }
 0x28a   : > { %v2491_v18 = vpop.permute.xlu1 %2490 }
 0x28b   : > { %5640 = vset.pattern.permute.xlu1 %v6168_v10  ;;  %5303 = vmatmul.mubr.msk.f32.vlgmr.msra.gmra.mrb[12].mxu1 %vm1681_vm4, %v2186_v16 }
 0x28c   : > { %5311 = vmatpush3.xpose.msk.msra.mxu1 %vm1681_vm4, %v2491_v18  ;;  %2580 = vperm.xlu1 %5640, %v1931_v14  }
 0x28d   : > { %5312 = vmatprep.mubr.msk.f32.mxu1 %vm6159_vm0, %v8004_v1  ;;  %5320 = vmatprep.subr.mxu1 %v8004_v1 }
 0x28e   : > { %v2794_v20 = vpop.permute.xlu1 %2793 }
 0x28f   : > { %5313 = vmatmul.mubr.msk.f32.vlgmr.msra.gmra.mrb[14].mxu1 %vm1681_vm4, %v2489_v19  ;;  %v1968_v19 = vand.u32 127, %v1670_v17 }
 0x290   : > { %5321 = vmatpush3.xpose.msk.msra.mxu1 %vm1681_vm4, %v2794_v20  ;;  %5641 = vset.pattern.permute.xlu1 %v6170_v12 }
 0x291   : > { %2883 = vperm.xlu1 %5641, %v1931_v14   ;;  %5322 = vmatprep.mubr.msk.f32.mxu1 %vm6159_vm0, %v8004_v1 }
 0x292   : > { %5411 = vmatprep.subr.bf16.mxu1 %v8002_v0 }
 0x293   : > { %5323 = vmatmul.mubr.msk.f32.vlgmr.msra.gmra.mrb[16].mxu1 %vm1681_vm4, %v2792_v21  ;;  %v6948_v21 = vshrl.u32 %v1670_v17, 7 }
 0x294   : > { %5334 = vmatprep.mubr.msk.f32.mxu1 %vm6159_vm0, %v8004_v1 }
 0x295   : > { %5642 = vset.pattern.permute.xlu1 %v6165_v6  ;;  %v6861_v36 = vpop.permute.xlu0 %1947  ;;  %v6968_v29 = vsub.s32 0, %v6948_v21 }
 0x296   : > { %2047 = vperm.xlu1 %5642, %v6719_v57  }
 0x299   : > { %v6867_v38 = vpop.permute.xlu0 %1953 }
 0x29a   : > { %5643 = vset.pattern.permute.xlu1 %v6167_v9 }
 0x29b   : > { %2351 = vperm.xlu1 %5643, %v6719_v57  }
 0x29d   : > { %v6875_v41 = vpop.permute.xlu0 %1959 }
 0x29f   : > { %5644 = vset.pattern.permute.xlu1 %v6169_v11  ;;  %v6824_v22 = vpop.permute.xlu1 %1944 }
 0x2a0   : > { %2654 = vperm.xlu1 %5644, %v6719_v57  }
 0x2a2   : > { %v6880_v43 = vpop.permute.xlu0 %2029 }
 0x2a3   : > { %v6827_v23 = vpop.permute.xlu1 %1950 }
 0x2a4   : > { %5645 = vset.pattern.permute.xlu1 %v6165_v6 }
 0x2a5   : > { %2044 = vperm.xlu1 %5645, %v6722_v59  }
 0x2a6   : > { %v6886_v47 = vpop.permute.xlu0 %2041 }
 0x2a8   : > { %v6831_v24 = vpop.permute.xlu1 %2026 }
 0x2a9   : > { %5646 = vset.pattern.permute.xlu1 %v6167_v9 }
 0x2aa   : > { %2348 = vperm.xlu1 %5646, %v6722_v59  }
 0x2ab   : > { %v6890_v50 = vpop.permute.xlu0 %2268 }
 0x2ac   : > { %v6835_v25 = vpop.permute.xlu1 %2032 }
 0x2ae   : > { %5647 = vset.pattern.permute.xlu1 %v6169_v11 }
 0x2af   : > { %2651 = vperm.xlu1 %5647, %v6722_v59   ;;  %v6894_v52 = vpop.permute.xlu0 %2271 }
 0x2b0   : > { %v6839_v26 = vpop.permute.xlu1 %2035 }
 0x2b3   : > { %5648 = vset.pattern.permute.xlu1 %v6161_v2  ;;  %v6900_v55 = vpop.permute.xlu0 %2280 }
 0x2b4   : > { %1965 = vperm.xlu1 %5648, %v1934_v27  }
 0x2b5   : > { %v6843_v28 = vpop.permute.xlu1 %2265 }
 0x2b8   : > { %5649 = vset.pattern.permute.xlu1 %v6166_v7 }
 0x2b9   : > { %2286 = vperm.xlu1 %5649, %v1934_v27  }
 0x2ba   : > { %v6846_v30 = vpop.permute.xlu1 %2038 }
 0x2bd   : > { %5650 = vset.pattern.permute.xlu1 %v6168_v10 }
 0x2be   : > { %2589 = vperm.xlu1 %5650, %v1934_v27  }
 0x2bf   : > { %v6849_v31 = vpop.permute.xlu1 %2274 }
 0x2c2   : > { %5651 = vset.pattern.permute.xlu1 %v6170_v12 }
 0x2c3   : > { %2892 = vperm.xlu1 %5651, %v1934_v27   ;;  %v6951_v27 = vsub.s32 %v1968_v19, %v6948_v21 }
 0x2c4   : > { %v6852_v32 = vpop.permute.xlu1 %2330 }
 0x2c5   : > { %v1980_v0 = vrot.slane %v6827_v23, %v6951_v27  ;;  %v2056_v17 = vrot.slane %v6880_v43, %v6951_v27  ;;  %v2052_v19 = vrot.slane %v6831_v24, %v6951_v27  ;;  %v1984_v23 = vrot.slane %v6867_v38, %v6951_v27 }
 0x2c6   : > { %v2060_v43 = vrot.slane %v6835_v25, %v6951_v27  ;;  %v2064_v54 = vrot.slane %v6839_v26, %v6951_v27  ;;  %v2295_v26 = vrot.slane %v6890_v50, %v6951_v27 }
 0x2c7   : > { %5652 = vset.pattern.permute.xlu1 %v6161_v2  ;;  %v2081_v25 = vsel %vm2001_vm5, %v2056_v17, %v2052_v19 }
 0x2c8   : > { %1962 = vperm.xlu1 %5652, %v1933_v33   ;;  %v6856_v34 = vpop.permute.xlu1 %2339 }
 0x2cc   : > { %5653 = vset.pattern.permute.xlu1 %v6166_v7 }
 0x2cd   : > { %2283 = vperm.xlu1 %5653, %v1933_v33   ;;  %v6859_v35 = vpop.permute.xlu1 %2568 }
 0x2d1   : > { %5654 = vset.pattern.permute.xlu1 %v6168_v10 }
 0x2d2   : > { %2586 = vperm.xlu1 %5654, %v1933_v33   ;;  %v6864_v37 = vpop.permute.xlu1 %2342 }
 0x2d6   : > { %5655 = vset.pattern.permute.xlu1 %v6170_v12 }
 0x2d7   : > { %2889 = vperm.xlu1 %5655, %v1933_v33   ;;  %v6869_v39 = vpop.permute.xlu1 %2577 }
 0x2db   : > { %5656 = vset.pattern.permute.xlu1 %v6171_v13 }
 0x2dc   : > { %2957 = vperm.xlu1 %5656, %v6719_v57   ;;  %v6873_v40 = vpop.permute.xlu1 %2633  ;;  %v2334_v57 = vpop.permute.xlu0 %2333 }
 0x2e0   : > { %v6877_v42 = vpop.permute.xlu1 %2642  ;;  %5658 = vset.pattern.permute.xlu1 %v6161_v2  ;;  %v6906_v59 = vpop.permute.xlu0 %2336 }
 0x2e1   : > { %v2364_v17 = vrot.slane %v6906_v59, %v6951_v27 }
 0x2e3   : > { %v6882_v44 = vpop.f32.mrb[6].mxu1 }
 0x2e4   : > { %8094 = vst [vmem:[#allocation66_spill] sm:$0xff] %v6882_v44  ;;  %v5282_v45 = vpop.f32.mrb[7].mxu1  ;;  %v6910_v61 = vpop.permute.xlu0 %2345  ;;  %v1976_v44 = vrot.slane %v6861_v36, %v6951_v27 }
 0x2e5   : > { %v6884_v46 = vpop.permute.xlu1 %2871  ;;  %v1972_v45 = vrot.slane %v6824_v22, %v6951_v27  ;;  %v2356_v22 = vrot.slane %v6852_v32, %v6951_v27  ;;  %v2360_v32 = vrot.slane %v2334_v57, %v6951_v27  ;;  %v2368_v57 = vrot.slane %v6856_v34, %v6951_v27 }
 0x2e7   : > { %v2002_v36 = vsel %vm2001_vm5, %v1976_v44, %v1972_v45  ;;  %v2072_v44 = vrot.slane %v6886_v47, %v6951_v27  ;;  %v2068_v45 = vrot.slane %v6846_v30, %v6951_v27  ;;  %v2082_v47 = vsel %vm2003_vm6, %v2060_v43, %v2081_v25 }
 0x2e8   : > { %v6914_v63 = vpop.permute.xlu0 %2571  ;;  %v2004_v24 = vsel %vm2003_vm6, %v1980_v0, %v2002_v36  ;;  %v1277_v0 = vld [vmem:[%s1098_s16] sm:$0x1]  ;;  %v2594_v36 = vrot.slane %v6859_v35, %v6951_v27  ;;  %v2372_v30 = vrot.slane %v6864_v37, %v6951_v27  ;;  %v2083_v50 = vsel %vm2005_vm7, %v2064_v54, %v2082_v47  ;;  %s6172_s16 = smov 112  }
 0x2e9   : > { %v2006_v19 = vsel %vm2005_vm7, %v1984_v23, %v2004_v24  ;;  %v2598_v34 = vrot.slane %v6914_v63, %v6951_v27  ;;  %v2084_v35 = vsel %vm2007_vm8, %v2068_v45, %v2083_v50  ;;  %v2303_v43 = vrot.slane %v6849_v31, %v6951_v27 }
 0x2ea   : > { %v6888_v48 = vpop.permute.xlu1 %2645  ;;  %v2659_v37 = vrot.slane %v6873_v40, %v6951_v27  ;;  %v2299_v54 = vrot.slane %v6894_v52, %v6951_v27  ;;  %v2606_v23 = vrot.slane %v6869_v39, %v6951_v27  ;;  %v2311_v31 = vrot.slane %v6900_v55, %v6951_v27 }
 0x2eb   : > { %v2623_v63 = vsel %vm2001_vm5, %v2598_v34, %v2594_v36  ;;  %v2897_v50 = vrot.slane %v6884_v46, %v6951_v27 }
 0x2ec   : > { %v6920_v5 = vpop.permute.xlu0 %2574 }
 0x2ed   : > { %v2602_v24 = vrot.slane %v6920_v5, %v6951_v27 }
 0x2ef   : > { %v6892_v51 = vpop.permute.xlu1 %2880  ;;  %v2624_v36 = vsel %vm2003_vm6, %v2602_v24, %v2623_v63 }
 0x2f0   : > { %v6924_v7 = vpop.permute.xlu0 %2583  ;;  %v2909_v63 = vrot.slane %v6892_v51, %v6951_v27 }
 0x2f1   : > { %v2614_v5 = vrot.slane %v6924_v7, %v6951_v27 }
 0x2f4   : > { %v6896_v53 = vpop.permute.xlu1 %2936  ;;  %v6928_v9 = vpop.permute.xlu0 %2636 }
 0x2f5   : > { %v2663_v40 = vrot.slane %v6928_v9, %v6951_v27 }
 0x2f7   : > { %v2688_v9 = vsel %vm2001_vm5, %v2663_v40, %v2659_v37  ;;  %v7083_v37 = vsub.s32 4, %v6948_v21 }
 0x2f8   : > { %v6898_v2 = vpop.permute.xlu1 %2945  ;;  %v6932_v11 = vpop.permute.xlu0 %2639 }
 0x2f9   : > { %v2667_v47 = vrot.slane %v6932_v11, %v6951_v27  ;;  %v2962_v11 = vrot.slane %v6896_v53, %v6951_v27  ;;  %v7074_v53 = vsub.s32 2, %v6948_v21 }
 0x2fc   : > { %v6902_v56 = vpop.permute.xlu1 %2951  ;;  %v6938_v14 = vpop.permute.xlu0 %2648 }
 0x300   : > { %v6942_v16 = vpop.permute.xlu0 %2874 }
 0x301   : > { %v6904_v58 = vpop.permute.xlu1 %1956 }
 0x304   : > { %v6946_v20 = vpop.permute.xlu0 %2877 }
 0x306   : > { %v6908_v60 = vpop.permute.xlu1 %2277 }
 0x307   : > { %v2307_v40 = vrot.slane %v6908_v60, %v6951_v27 }
 0x308   : > { %v6959_v1 = vpop.permute.xlu0 %2886 }
 0x309   : > { %v2917_v60 = vrot.slane %v6959_v1, %v6951_v27 }
 0x30b   : > { %v6912_v62 = vpop.permute.xlu1 %2580 }
 0x30c   : > { %v2940_v38 = vpop.permute.xlu0 %2939 }
 0x30d   : > { %v2966_v46 = vrot.slane %v2940_v38, %v6951_v27  ;;  %v7086_v38 = vsub.s32 5, %v6948_v21 }
 0x310   : > { %v6916_v3 = vpop.permute.xlu1 %2883 }
 0x315   : > { %v6918_v4 = vpop.permute.xlu1 %2047 }
 0x31a   : > { %v6922_v6 = vpop.permute.xlu1 %2351 }
 0x31f   : > { %v6926_v8 = vpop.permute.xlu1 %2654 }
 0x324   : > { %v6930_v10 = vpop.permute.xlu1 %2044 }
 0x329   : > { %v6934_v12 = vpop.permute.xlu1 %2348 }
 0x32e   : > { %v6936_v13 = vpop.permute.xlu1 %2651 }
 0x333   : > { %v6940_v15 = vpop.permute.xlu1 %1965 }
 0x338   : > { %v6944_v18 = vpop.permute.xlu1 %2286 }
 0x33d   : > { %v6953_v33 = vpop.permute.xlu1 %2589 }
 0x33e   : > { %8095 = vst [vmem:[#allocation67_spill] sm:$0xff] %v6953_v33  ;;  %v2291_v33 = vrot.slane %v6843_v28, %v6951_v27  ;;  %v2385_v28 = vsel %vm2001_vm5, %v2360_v32, %v2356_v22  ;;  %v5101_v32 = vadd.f32 -1.0, %v1277_v0  ;;  %v2376_v0 = vrot.slane %v6910_v61, %v6951_v27 }
 0x33f   : > { %v2386_v59 = vsel %vm2003_vm6, %v2364_v17, %v2385_v28  ;;  %v7036_v28 = vsel %vm2009_vm9, %v2072_v44, %v2084_v35  ;;  %v2625_v17 = vsel %vm2005_vm7, %v2606_v23, %v2624_v36  ;;  %v2671_v61 = vrot.slane %v6877_v42, %v6951_v27 }
 0x340   : > { %v2320_v22 = vsel %vm2001_vm5, %v2295_v26, %v2291_v33  ;;  %v2387_v33 = vsel %vm2005_vm7, %v2368_v57, %v2386_v59  ;;  %v2943_v26 = vpop.permute.xlu0 %2942  ;;  %v1849_v39 = vmul.f32 1e+09, %v5101_v32  ;;  %v2901_v42 = vrot.slane %v6942_v16, %v6951_v27 }
 0x341   : > { %v2388_v45 = vsel %vm2007_vm8, %v2372_v30, %v2387_v33  ;;  %v2321_v52 = vsel %vm2003_vm6, %v2299_v54, %v2320_v22  ;;  %v2679_v30 = vrot.slane %v6938_v14, %v6951_v27  ;;  %v2675_v22 = vrot.slane %v6888_v48, %v6951_v27 }
 0x342   : > { %v6977_v49 = vpop.permute.xlu1 %2892  ;;  %v2322_v57 = vsel %vm2005_vm7, %v2303_v43, %v2321_v52  ;;  %v7049_v44 = vsel %vm2009_vm9, %v2376_v0, %v2388_v45  ;;  %v2689_v32 = vsel %vm2003_vm6, %v2667_v47, %v2688_v9  ;;  %v1988_v14 = vrot.slane %v6904_v58, %v6951_v27 }
 0x343   : > { %v7067_v35 = vrot.slane %v1849_v39, %v6968_v29  ;;  %v7071_v48 = vsub.s32 1, %v6948_v21  ;;  %v7077_v43 = vsub.s32 3, %v6948_v21  ;;  %v2690_v16 = vsel %vm2005_vm7, %v2671_v61, %v2689_v32 }
 0x344   : > { %v2905_v59 = vrot.slane %v6946_v20, %v6951_v27  ;;  %v2949_v58 = vpop.permute.xlu0 %2948  ;;  %v2926_v54 = vsel %vm2001_vm5, %v2901_v42, %v2897_v50  ;;  %v2691_v33 = vsel %vm2007_vm8, %v2675_v22, %v2690_v16  ;;  %v2991_v23 = vsel %vm2001_vm5, %v2966_v46, %v2962_v11 }
 0x345   : > { %v2974_v20 = vrot.slane %v6898_v2, %v6951_v27  ;;  %v2008_v24 = vsel %vm2007_vm8, %v1988_v14, %v2006_v19  ;;  %v2970_v52 = vrot.slane %v2943_v26, %v6951_v27  ;;  %v2610_v0 = vrot.slane %v6912_v62, %v6951_v27 }
 0x346   : > { %v7106_v36 = vsub.s32 6, %v6948_v21  ;;  %v7109_v2 = vsub.s32 7, %v6948_v21  ;;  %v2927_v19 = vsel %vm2003_vm6, %v2905_v59, %v2926_v54  ;;  %v2076_v26 = vrot.slane %v6930_v10, %v6951_v27 }
 0x347   : > { %v7017_v25 = vpop.permute.xlu1 %1962  ;;  %v2692_v62 = vsel %vm2009_vm9, %v2679_v30, %v2691_v33  ;;  %v2928_v47 = vsel %vm2005_vm7, %v2909_v63, %v2927_v19  ;;  %v2978_v61 = vrot.slane %v2949_v58, %v6951_v27  ;;  %v2992_v50 = vsel %vm2003_vm6, %v2970_v52, %v2991_v23 }
 0x348   : > { %v1996_v45 = vrot.slane %v7017_v25, %v6951_v27  ;;  %v7114_v25 = vpop.permute.xlu0 %2954  ;;  %v8096_v22 = vrot.slane %v6875_v41, %v6951_v27  ;;  %v2993_v11 = vsel %vm2005_vm7, %v2974_v20, %v2992_v50  ;;  %v2323_v42 = vsel %vm2007_vm8, %v2307_v40, %v2322_v57 }
 0x349   : > { %v2986_v32 = vrot.slane %v7114_v25, %v6951_v27  ;;  %v2626_v14 = vsel %vm2007_vm8, %v2610_v0, %v2625_v17  ;;  %v2913_v46 = vrot.slane %v6916_v3, %v6951_v27  ;;  %v2000_v41 = vrot.slane %v6940_v15, %v6951_v27 }
 0x34a   : > { %v2010_v1 = vsel %vm2009_vm9, %v8096_v22, %v2008_v24  ;;  %v2086_v57 = vsel %vm2011_vm10, %v2076_v26, %v7036_v28  ;;  %v2683_v59 = vrot.slane %v6936_v13, %v6951_v27  ;;  %v2994_v17 = vsel %vm2007_vm8, %v2978_v61, %v2993_v11 }
 0x34b   : > { %v2012_v30 = vsel %vm2011_vm10, %v1996_v45, %v2010_v1  ;;  %v2080_v3 = vrot.slane %v6918_v4, %v6951_v27  ;;  %v2324_v28 = vsel %vm2009_vm9, %v2311_v31, %v2323_v42  ;;  %v2929_v20 = vsel %vm2007_vm8, %v2913_v46, %v2928_v47 }
 0x34c   : > { %v7059_v34 = vpop.permute.xlu1 %2283  ;;  %v2014_v15 = vsel %vm2013_vm11, %v2000_v41, %v2012_v30  ;;  %v2319_v4 = vrot.slane %v6944_v18, %v6951_v27  ;;  %v2627_v55 = vsel %vm2009_vm9, %v2614_v5, %v2626_v14  ;;  %v2693_v31 = vsel %vm2011_vm10, %v2683_v59, %v2692_v62 }
 0x34d   : > { %v2315_v10 = vrot.slane %v7059_v34, %v6951_v27  ;;  %v2380_v34 = vrot.slane %v6934_v12, %v6951_v27  ;;  %v2982_v12 = vrot.slane %v6902_v56, %v6951_v27  ;;  %v2087_v24 = vsel %vm2013_vm11, %v2080_v3, %v2086_v57 }
 0x34e   : > { %v2384_v18 = vrot.slane %v6922_v6, %v6951_v27  ;;  %v2930_v22 = vsel %vm2009_vm9, %v2917_v60, %v2929_v20  ;;  %v2925_v14 = vrot.slane %v6977_v49, %v6951_v27  ;;  %vm3637_vm5 = vcmask 23552  }
 0x34f   : > { %v2325_v23 = vsel %vm2011_vm10, %v2315_v10, %v2324_v28  ;;  %v2390_v56 = vsel %vm2011_vm10, %v2380_v34, %v7049_v44  ;;  %v2995_v5 = vsel %vm2009_vm9, %v2982_v12, %v2994_v17  ;;  %vm4540_vm6 = vcmask 516096  }
 0x350   : > { %v2326_v7 = vsel %vm2013_vm11, %v2319_v4, %v2325_v23  ;;  %v2391_v6 = vsel %vm2013_vm11, %v2384_v18, %v2390_v56 }
 0x351   : > { %v2587_v39 = vpop.permute.xlu1 %2586 }
 0x352   : > { %v2618_v13 = vrot.slane %v2587_v39, %v6951_v27  ;;  %v2687_v39 = vrot.slane %v6926_v8, %v6951_v27 }
 0x354   : > { %v2628_v44 = vsel %vm2011_vm10, %v2618_v13, %v2627_v55  ;;  %v2694_v8 = vsel %vm2013_vm11, %v2687_v39, %v2693_v31 }
 0x356   : > { %v7103_v51 = vpop.f32.mrb[8].mxu1  ;;  %v2890_v33 = vpop.permute.xlu1 %2889 }
 0x357   : > { %v5289_v9 = vpop.f32.mrb[9].mxu1  ;;  %v2921_v19 = vrot.slane %v2890_v33, %v6951_v27 }
 0x358   : > { %v8097_v9 = vld [vmem:[#allocation67_spill] sm:$0xff] }
 0x359   : > { %v2622_v47 = vrot.slane %v8097_v9, %v6951_v27  ;;  %v2931_v41 = vsel %vm2011_vm10, %v2921_v19, %v2930_v22  ;;  %v8099_v22 = vmov 0.0  }
 0x35a   : > { %v1922_v16 = vpop.f32.mrb[10].mxu1  ;;  %v2932_v13 = vsel %vm2013_vm11, %v2925_v14, %v2931_v41 }
 0x35b   : > { %v1926_v58 = vmul.f32 0.5, %v1922_v16  ;;  %v5294_v54 = vpop.f32.mrb[11].mxu1  ;;  %v2958_v61 = vpop.permute.xlu1 %2957  ;;  %v2629_v46 = vsel %vm2013_vm11, %v2622_v47, %v2628_v44 }
 0x35c   : > { %v2990_v16 = vrot.slane %v2958_v61, %v6951_v27 }
 0x35d   : > { %v2016_v63 = vmul.f32 %v2014_v15, %v1926_v58 }
 0x35e   : > { %v2259_v40 = vpop.f32.mrb[12].mxu1 }
 0x35f   : > { %v7167_v45 = vadd.f32 %v2087_v24, %v2016_v63  ;;  %v2263_v52 = vmul.f32 0.5, %v2259_v40  ;;  %v5304_v0 = vpop.f32.mrb[13].mxu1  ;;  %v2996_v63 = vsel %vm2011_vm10, %v2986_v32, %v2995_v5 }
 0x360   : > { %v2997_v4 = vsel %vm2013_vm11, %v2990_v16, %v2996_v63 }
 0x361   : > { %v2328_v26 = vmul.f32 %v2326_v7, %v2263_v52  ;;  %v2096_v62 = vadd.f32 %v7067_v35, %v7167_v45  ;;  %v3440_v30 = vrot.slane %v7167_v45, %v7106_v36  ;;  %v3447_v60 = vrot.slane %v7167_v45, %v7109_v2 }
 0x362   : > { %v2562_v50 = vpop.f32.mrb[14].mxu1 }
 0x363   : > { %v7184_v1 = vadd.f32 %v2391_v6, %v2328_v26  ;;  %v2566_v11 = vmul.f32 0.5, %v2562_v50  ;;  %v5314_v42 = vpop.f32.mrb[15].mxu1  ;;  %v2097_v10 = vsel %vm1463_vm1, %v2096_v62, -inf }
 0x364   : > { %2098 = vmax.xlane.f32.xlu0 %v2097_v10 }
 0x365   : > { %v2631_v57 = vmul.f32 %v2629_v46, %v2566_v11  ;;  %v2394_v34 = vadd.f32 %v7184_v1, %v7067_v35  ;;  %v3461_v59 = vrot.slane %v7184_v1, %v7071_v48  ;;  %v3468_v49 = vrot.slane %v7184_v1, %v7074_v53 }
 0x366   : > { %v2865_v58 = vpop.f32.mrb[16].mxu1  ;;  %v3475_v54 = vrot.slane %v7184_v1, %v7077_v43  ;;  %v3482_v17 = vrot.slane %v7184_v1, %v7083_v37  ;;  %v3489_v3 = vrot.slane %v7184_v1, %v7086_v38 }
 0x367   : > { %v7208_v33 = vadd.f32 %v2694_v8, %v2631_v57  ;;  %v2869_v15 = vmul.f32 0.5, %v2865_v58  ;;  %v5324_v28 = vpop.f32.mrb[17].mxu1  ;;  %v2395_v12 = vsel %vm1463_vm1, %v2394_v34, -inf }
 0x368   : > { %2396 = vmax.xlane.f32.xlu1 %v2395_v12  ;;  %v8100_v28 = vld [vmem:[#allocation64_spill] sm:$0xff] }
 0x369   : > { %v2934_v23 = vmul.f32 %v2932_v13, %v2869_v15  ;;  %v2697_v20 = vadd.f32 %v7208_v33, %v7067_v35  ;;  %v3517_v24 = vrot.slane %v7208_v33, %v7071_v48  ;;  %v3531_v40 = vrot.slane %v7208_v33, %v7077_v43 }
 0x36a   : > { %v3545_v55 = vrot.slane %v7208_v33, %v7086_v38  ;;  %v3538_v25 = vrot.slane %v7208_v33, %v7083_v37  ;;  %v3552_v32 = vrot.slane %v7208_v33, %v7106_v36  ;;  %v7255_v12 = vrot.slane %v8100_v28, %v6968_v29  ;;  %v3201_v28 = vld [vmem:[%s8102_s15 + $0x8] sm:$0xff] }
 0x36b   : > { %v7225_v56 = vadd.f32 %v2997_v4, %v2934_v23  ;;  %v2698_v27 = vsel %vm1463_vm1, %v2697_v20, -inf }
 0x36c   : > { %2699 = vmax.xlane.f32.xlu0 %v2698_v27 }
 0x36d   : > { %v3000_v31 = vadd.f32 %v7225_v56, %v7067_v35  ;;  %v3573_v52 = vrot.slane %v7225_v56, %v7071_v48  ;;  %v3587_v0 = vrot.slane %v7225_v56, %v7077_v43  ;;  %v3601_v18 = vrot.slane %v7225_v56, %v7086_v38  ;;  %v8098_v35 = vld [vmem:[#allocation65_spill] sm:$0xff] }
 0x36e   : > { %v3594_v39 = vrot.slane %v7225_v56, %v7083_v37  ;;  %v3608_v7 = vrot.slane %v7225_v56, %v7106_v36 }
 0x36f   : > { %v3001_v19 = vsel %vm1463_vm1, %v3000_v31, -inf }
 0x370   : > { %3002 = vmax.xlane.f32.xlu0 %v3001_v19 }
 0x379   : > { %2108 = vrot.lane.b32.xlu1 %v8098_v35, %s6172_s16  ;;  %s8010_s16 = smov 8  }
 0x3f1   : > { %v2099_v5 = vpop.xlane.xlu0 %2098 }
 0x3f2   : > { %v2100_v26 = vsub.f32 %v2096_v62, %v2099_v5 }
 0x3f4   : > { %v2101_v44 = vmul.f32 1.442695, %v2100_v26 }
 0x3f5   : > { %v2397_v9 = vpop.xlane.xlu1 %2396 }
 0x3f6   : > { %5660 = vpow2.f32 %v2101_v44  ;;  %v2398_v47 = vsub.f32 %v2394_v34, %v2397_v9 }
 0x3f8   : > { %v2399_v61 = vmul.f32 1.442695, %v2398_v47 }
 0x3f9   : > { %v2109_v6 = vpop.permute.xlu1 %2108  ;;  %v2700_v50 = vpop.xlane.xlu0 %2699 }
 0x3fa   : > { %5662 = vpow2.f32 %v2399_v61  ;;  %v2701_v8 = vsub.f32 %v2697_v20, %v2700_v50  ;;  %5296 = vmatpush3.msra.mxu0 %v2109_v6 }
 0x3fb   : > { %5305 = vmatprep.subr.mxu0 %v8099_v22 }
 0x3fc   : > { %v2702_v11 = vmul.f32 1.442695, %v2701_v8 }
 0x3fd   : > { %v3003_v42 = vpop.xlane.xlu0 %3002 }
 0x3fe   : > { %5664 = vpow2.f32 %v2702_v11  ;;  %v3004_v10 = vsub.f32 %v3000_v31, %v3003_v42  ;;  %v5712_v11 = vld [vmem:[%s8090_s8] sm:$0xff] }
 0x400   : > { %v5661_v14 = vpop.eup %5660  ;;  %v3005_v46 = vmul.f32 1.442695, %v3004_v10  ;;  %v5713_v10 = vld [vmem:[%s8090_s8 + $0x8] sm:$0xff]  ;;  %s5933_s8 = sshll.u32 %s6184_s5, 4  ;;  %s5934_s8 = int_to_ptr.vmem [resolvable:$false] %s5933_s8 }
 0x401   : > { %v2103_v62 = vsel %vm1463_vm1, %v5661_v14, 0.0 }
 0x402   : > { %5666 = vpow2.f32 %v3005_v46  ;;  %2104 = vadd.xlane.f32.xlu1 %v2103_v62  ;;  %v8103_v62 = vmov 0.0|0.0  }
 0x404   : > { %v5663_v41 = vpop.eup %5662 }
 0x405   : > { %v2401_v16 = vsel %vm1463_vm1, %v5663_v41, 0.0 }
 0x406   : > { %2402 = vadd.xlane.f32.xlu0 %v2401_v16 }
 0x408   : > { %v5665_v57 = vpop.eup %5664 }
 0x409   : > { %v2704_v34 = vsel %vm1463_vm1, %v5665_v57, 0.0 }
 0x40a   : > { %2705 = vadd.xlane.f32.xlu1 %v2704_v34 }
 0x40c   : > { %v5667_v58 = vpop.eup %5666 }
 0x40d   : > { %v3007_v15 = vsel %vm1463_vm1, %v5667_v58, 0.0 }
 0x40e   : > { %3008 = vadd.xlane.f32.xlu0 %v3007_v15 }
 0x41b   : > { %2709 = vrot.lane.b32.xlu1 %v8098_v35, %s6173_s17  ;;  %s6178_s17 = smov 12  }
 0x41f   : > { %3012 = vrot.lane.b32.xlu1 %v8098_v35, %s6174_s30  ;;  %s8104_s30 = sld [smem:[#allocation41_spill]] }
 0x423   : > { %1763 = vbcast.lane.b32.xlu1 %v7255_v12, 280 }
 0x424   : > { %2406 = vrot.lane.b32.xlu0 %v8098_v35, %s6175_s9  ;;  %s8106_s9 = sld [smem:[#allocation45_spill]] }
 0x428   : > { %1767 = vbcast.lane.b32.xlu0 %v7255_v12, 288 }
 0x48f   : > { %v2105_v13 = vpop.xlane.xlu1 %2104 }
 0x490   : > { %5668 = vrcp.f32 %v2105_v13 }
 0x493   : > { %v2403_v63 = vpop.xlane.xlu0 %2402 }
 0x494   : > { %5670 = vrcp.f32 %v2403_v63 }
 0x497   : > { %v2706_v23 = vpop.xlane.xlu1 %2705 }
 0x498   : > { %5672 = vrcp.f32 %v2706_v23 }
 0x49a   : > { %v5669_v20 = vpop.eup %5668 }
 0x49b   : > { %v2107_v4 = vmul.f32 %v5669_v20, %v5661_v14  ;;  %v2710_v27 = vpop.permute.xlu1 %2709  ;;  %v3009_v31 = vpop.xlane.xlu0 %3008 }
 0x49c   : > { %5674 = vrcp.f32 %v3009_v31  ;;  %v3510_v31 = vrot.slane %v7208_v33, %v6968_v29 }
 0x49d   : > { %5298 = vmatmul.mubr.msk.f32.vlgmr.msra.gmra.mrb[8].mxu0 %vm1463_vm1, %v2107_v4 }
 0x49e   : > { %v5671_v19 = vpop.eup %5670  ;;  %5307 = vmatprep.mubr.msk.f32.mxu0 %vm6159_vm0, %v8099_v22 }
 0x49f   : > { %v2405_v35 = vmul.f32 %v5671_v19, %v5663_v41  ;;  %v3013_v5 = vpop.permute.xlu1 %3012  ;;  %v2407_v26 = vpop.permute.xlu0 %2406  ;;  %v3566_v19 = vrot.slane %v7225_v56, %v6968_v29 }
 0x4a0   : > { %5306 = vmatpush3.msra.mxu0 %v2407_v26  ;;  %v3580_v26 = vrot.slane %v7225_v56, %v7074_v53 }
 0x4a1   : > { %5308 = vmatmul.mubr.msk.f32.vlgmr.msra.gmra.mrb[10].mxu0 %vm1463_vm1, %v2405_v35  ;;  %5315 = vmatprep.subr.mxu0 %v8099_v22  ;;  %v3412_v35 = vrot.slane %v7167_v45, %v7074_v53 }
 0x4a2   : > { %v5673_v44 = vpop.eup %5672  ;;  %5316 = vmatpush3.msra.mxu0 %v2710_v27  ;;  %5317 = vmatprep.mubr.msk.f32.mxu0 %vm6159_vm0, %v8099_v22  ;;  %v3405_v27 = vrot.slane %v7167_v45, %v7071_v48  ;;  %v3496_v48 = vrot.slane %v7184_v1, %v7106_v36  ;;  %v3283_v36 = vld [vmem:[%s8106_s9] sm:$0xff] }
 0x4a3   : > { %v2708_v9 = vmul.f32 %v5673_v44, %v5665_v57  ;;  %v1764_v47 = vpop.permute.xlu1 %1763  ;;  %v1768_v61 = vpop.permute.xlu0 %1767  ;;  %5325 = vmatprep.subr.mxu0 %v8099_v22  ;;  %v3426_v44 = vrot.slane %v7167_v45, %v7083_v37 }
 0x4a4   : > { %v1769_v6 = vadd.f32 1.0, %v1764_v47  ;;  %v1770_v50 = vadd.f32 1.0, %v1768_v61 }
 0x4a5   : > { %5318 = vmatmul.mubr.msk.f32.vlgmr.msra.gmra.mrb[12].mxu0 %vm1463_vm1, %v2708_v9  ;;  %v3433_v9 = vrot.slane %v7167_v45, %v7086_v38 }
 0x4a6   : > { %v5675_v8 = vpop.eup %5674  ;;  %v1771_v42 = vmul.f32 %v5712_v11, %v1769_v6  ;;  %v1772_v14 = vmul.f32 %v5713_v10, %v1770_v50  ;;  %5326 = vmatpush3.msra.mxu0 %v3013_v5  ;;  %5327 = vmatprep.mubr.msk.f32.mxu0 %vm6159_vm0, %v8099_v22  ;;  %v3419_v5 = vrot.slane %v7167_v45, %v7077_v43  ;;  %v5714_v11 = vld [vmem:[%s8089_s26] sm:$0xf] }
 0x4a7   : > { %v3011_v46 = vmul.f32 %v5675_v8, %v5667_v58  ;;  %5414 = vmatprep.subr.bf16.mxu0 %v8103_v62  ;;  %v3200_v58 = vld [vmem:[%s8101_s2] sm:$0xff]  ;;  %v3559_v43 = vrot.slane %v7208_v33, %v7109_v2  ;;  %s8109_s2 = sld [smem:[#allocation44_spill]] }
 0x4a8   : > { %v5412_v41 = vpack.c.bf16 %v1772_v14, %v1771_v42  ;;  %v5415_v13 = vpack.c.bf16 %v3201_v28, %v3200_v58  ;;  %v1773_v14 = vld [vmem:[%s8104_s30] sm:$0x1]  ;;  %s8114_s30 = sld [smem:[#allocation49_spill]] }
 0x4a9   : > { %5328 = vmatmul.mubr.msk.f32.vlgmr.msra.gmra.mrb[14].mxu0 %vm1463_vm1, %v3011_v46  ;;  %v1845_v46 = vadd.f32 %v7103_v51, %v1773_v14  ;;  %v7314_v28 = vld [vmem:[%s6640_s6] sm:$0xff]  ;;  %v3454_v51 = vrot.slane %v7184_v1, %v6968_v29 }
 0x4aa   : > { %5413 = vmatpush3.bf16.msra.mxu1 %v5412_v41  ;;  %5341 = vmatprep.mubr.msk.f32.mxu0 %vm6159_vm0, %v8099_v22 }
 0x4ab   : > { %5417 = vmatprep.subr.bf16.mxu1 %v8103_v62  ;;  %5416 = vmatpush3.bf16.msra.mxu0 %v5415_v13  ;;  %v3098_v41 = vrot.slane %v1845_v46, %v6968_v29 }
 0x570   : > { %v2180_v16 = vpop.f32.mrb[8].mxu0 }
 0x571   : > { %2184 = vst.msk [vmem:[#allocation2] sm:$0xff] %vm1681_vm4, %v2180_v16  ;;  %v5299_v57 = vpop.f32.mrb[9].mxu0 }
 0x574   : > { %v2478_v34 = vpop.f32.mrb[10].mxu0 }
 0x575   : > { %2483 = vrot.lane.b32.xlu0 %v2478_v34, %s6176_s18  ;;  %v5309_v15 = vpop.f32.mrb[11].mxu0  ;;  %s8112_s18 = sld [smem:[#allocation50_spill]] }
 0x576   : > { %v8105_v15 = vld [vmem:[#allocation63_spill] sm:$0xff] }
 0x578   : > { %v2781_v63 = vpop.f32.mrb[12].mxu0 }
 0x579   : > { %2786 = vrot.lane.b32.xlu1 %v2781_v63, %s8010_s16  ;;  %v5319_v23 = vpop.f32.mrb[13].mxu0 }
 0x57c   : > { %v3084_v20 = vpop.f32.mrb[14].mxu0 }
 0x57d   : > { %3089 = vrot.lane.b32.xlu0 %v3084_v20, %s6178_s17  ;;  %v5329_v4 = vpop.f32.mrb[15].mxu0  ;;  %s8113_s17 = sld [smem:[#allocation47_spill]] }
 0x581   : > { %1676 = vbcast.lane.b32.xlu0 %v7255_v12, 260  ;;  %v3524_v12 = vrot.slane %v7208_v33, %v7074_v53  ;;  %v3503_v53 = vrot.slane %v7184_v1, %v7109_v2  ;;  %v6179_v1 = vmov 1966171168  }
 0x585   : > { %3407 = vbcast.lane.b32.xlu0 %v3405_v27, 256 }
 0x589   : > { %3512 = vbcast.lane.b32.xlu0 %v3510_v31, 256 }
 0x58d   : > { %3568 = vbcast.lane.b32.xlu0 %v3566_v19, 256 }
 0x591   : > { %3414 = vbcast.lane.b32.xlu0 %v3412_v35, 256 }
 0x595   : > { %3421 = vbcast.lane.b32.xlu0 %v3419_v5, 256 }
 0x599   : > { %3526 = vbcast.lane.b32.xlu0 %v3524_v12, 256 }
 0x59d   : > { %3582 = vbcast.lane.b32.xlu0 %v3580_v26, 256 }
 0x5a1   : > { %3428 = vbcast.lane.b32.xlu0 %v3426_v44, 256 }
 0x5a5   : > { %3435 = vbcast.lane.b32.xlu0 %v3433_v9, 256 }
 0x5e7   : > { %v2484_v47 = vpop.permute.xlu0 %2483 }
 0x5e8   : > { %2487 = vst.msk [vmem:[#allocation2] sm:$0xff] %vm2486_vm12, %v2484_v47 }
 0x5eb   : > { %v2787_v61 = vpop.permute.xlu1 %2786 }
 0x5ec   : > { %2790 = vst.msk [vmem:[#allocation2] sm:$0xff] %vm2789_vm13, %v2787_v61 }
 0x5ef   : > { %v3090_v6 = vpop.permute.xlu0 %3089 }
 0x5f0   : > { %3093 = vst.msk [vmem:[#allocation2] sm:$0xff] %vm3092_vm14, %v3090_v6 }
 0x5f3   : > { %v1677_v50 = vpop.permute.xlu0 %1676 }
 0x5f4   : > { %v1678_v8 = vadd.f32 1.0, %v1677_v50 }
 0x5f6   : > { %v7302_v42 = vmul.f32 %v5714_v11, %v1678_v8 }
 0x5f7   : > { %v3094_v10 = vld [vmem:[#allocation2] sm:$0xff]  ;;  %v3408_v46 = vpop.permute.xlu0 %3407 }
 0x5f8   : > { %5335 = vmatmul.mubr.msk.f32.vlgmr.msra.gmra.mrb[18].mxu1 %vm1287_vm2, %v3094_v10  ;;  %5355 = vmatprep.subr.msk.mxu0 %vm1685_vm3, %v7302_v42 }
 0x5f9   : > { %5352 = vmatprep.mubr.msk.f32.mxu1 %vm6159_vm0, %v8099_v22  ;;  %v3398_v22 = vrot.slane %v7167_v45, %v6968_v29  ;;  %vm3628_vm0 = vcmask 15360  }
 0x6cb   : > { %v3168_v16 = vpop.f32.mrb[18].mxu1 }
 0x6cc   : > { %v3169_v57 = vadd.f32 %v3168_v16, %v3098_v41  ;;  %v5336_v34 = vpop.f32.mrb[19].mxu1  ;;  %v3513_v16 = vpop.permute.xlu0 %3512 }
 0x6ce   : > { %v3172_v58 = vmul.f32 %v3169_v57, %v8105_v15 }
 0x6d0   : > { %v3173_v13 = vadd.f32 %v7314_v28, %v3172_v58  ;;  %v3569_v57 = vpop.permute.xlu0 %3568 }
 0x6d2   : > { %v3176_v63 = vsel %vm1287_vm2, %v3173_v13, 0.0 }
 0x6d3   : > { %3177 = vadd.xlane.f32.xlu1 %v3176_v63 }
 0x6d4   : > { %v3415_v15 = vpop.permute.xlu0 %3414 }
 0x6e4   : > { %3400 = vbcast.lane.b32.xlu1 %v3398_v22, 256 }
 0x6e8   : > { %3456 = vbcast.lane.b32.xlu1 %v3454_v51, 256 }
 0x6ec   : > { %3463 = vbcast.lane.b32.xlu1 %v3461_v59, 256  ;;  %v3615_v59 = vrot.slane %v7225_v56, %v7109_v2  ;;  %v3284_v56 = vld [vmem:[%s8106_s9 + $0x8] sm:$0xff] }
 0x6ed   : > { %v5418_v12 = vpack.c.bf16 %v3284_v56, %v3283_v36 }
 0x6ef   : > { %5419 = vmatpush3.bf16.msra.mxu1 %v5418_v12 }
 0x6f0   : > { %3519 = vbcast.lane.b32.xlu1 %v3517_v24, 256  ;;  %v3648_v24 = vunpack.c.l.s4 %v6179_v1  ;;  %5420 = vmatprep.subr.bf16.mxu1 %v8103_v62 }
 0x6f4   : > { %3575 = vbcast.lane.b32.xlu1 %v3573_v52, 256  ;;  %v5716_v52 = vld [vmem:[%s6650_s23] sm:$0xff]  ;;  %s8108_s23 = sld [smem:[#allocation39_spill]] }
 0x6f8   : > { %3470 = vbcast.lane.b32.xlu1 %v3468_v49, 256 }
 0x6fc   : > { %3477 = vbcast.lane.b32.xlu1 %v3475_v54, 256 }
 0x700   : > { %3533 = vbcast.lane.b32.xlu1 %v3531_v40, 256  ;;  %v3649_v40 = vunpack.c.0.s8 %v3648_v24 }
 0x704   : > { %3589 = vbcast.lane.b32.xlu1 %v3587_v0, 256 }
 0x708   : > { %3484 = vbcast.lane.b32.xlu1 %v3482_v17, 256 }
 0x70c   : > { %3491 = vbcast.lane.b32.xlu1 %v3489_v3, 256 }
 0x710   : > { %3547 = vbcast.lane.b32.xlu1 %v3545_v55, 256  ;;  %v3652_v55 = vsub.s32 %v3649_v40, %v6948_v21 }
 0x712   : > { %v3653_v0 = vrot.slane %v5716_v52, %v3652_v55 }
 0x714   : > { %3603 = vbcast.lane.b32.xlu1 %v3601_v18, 256  ;;  %v3661_v18 = vcombine.high %v3653_v0, %v3653_v0  ;;  %v3669_v21 = vrot.slane %v3653_v0, %v3652_v55 }
 0x716   : > { %v3683_v2 = vrot.slane %v3661_v18, %v3652_v55  ;;  %v3691_v45 = vcombine.high %v3669_v21, %v3669_v21 }
 0x718   : > { %3498 = vbcast.lane.b32.xlu1 %v3496_v48, 256  ;;  %v3702_v33 = vrot.slane %v3683_v2, %v6968_v29  ;;  %v3706_v27 = vrot.slane %v3691_v45, %v6968_v29 }
 0x71c   : > { %3505 = vbcast.lane.b32.xlu1 %v3503_v53, 256 }
 0x720   : > { %3561 = vbcast.lane.b32.xlu1 %v3559_v43, 256 }
 0x724   : > { %3617 = vbcast.lane.b32.xlu1 %v3615_v59, 256 }
 0x760   : > { %v3178_v49 = vpop.xlane.xlu1 %3177 }
 0x761   : > { %v3180_v38 = vmul.f32 0.0625, %v3178_v49 }
 0x763   : > { %v7363_v54 = vsub.f32 %v3173_v13, %v3180_v38  ;;  %v3422_v13 = vpop.permute.xlu0 %3421 }
 0x764   : > { %v3401_v10 = vpop.permute.xlu1 %3400 }
 0x765   : > { %v3182_v17 = vmul.f32 %v7363_v54, %v7363_v54 }
 0x767   : > { %v3183_v3 = vsel %vm1287_vm2, %v3182_v17, 0.0  ;;  %v3527_v22 = vpop.permute.xlu0 %3526 }
 0x768   : > { %3184 = vadd.xlane.f32.xlu0 %v3183_v3  ;;  %v3457_v14 = vpop.permute.xlu1 %3456 }
 0x769   : > { %v3620_v18 = vsel %vm3619_vm15, %v3401_v10, %v3457_v14 }
 0x76b   : > { %v3583_v48 = vpop.permute.xlu0 %3582 }
 0x76c   : > { %v3464_v41 = vpop.permute.xlu1 %3463 }
 0x76f   : > { %v3429_v43 = vpop.permute.xlu0 %3428 }
 0x770   : > { %v3520_v62 = vpop.permute.xlu1 %3519 }
 0x773   : > { %v3436_v49 = vpop.permute.xlu0 %3435 }
 0x774   : > { %v3576_v34 = vpop.permute.xlu1 %3575 }
 0x778   : > { %v3471_v58 = vpop.permute.xlu1 %3470 }
 0x77c   : > { %v3478_v63 = vpop.permute.xlu1 %3477 }
 0x77e   : > { %3540 = vbcast.lane.b32.xlu0 %v3538_v25, 256  ;;  %v3646_v25 = vcombine.high %v5716_v52, %v5716_v52 }
 0x780   : > { %v3660_v37 = vrot.slane %v3646_v25, %v3652_v55  ;;  %v3534_v51 = vpop.permute.xlu1 %3533 }
 0x782   : > { %3596 = vbcast.lane.b32.xlu0 %v3594_v39, 256  ;;  %v3698_v39 = vrot.slane %v3669_v21, %v6968_v29  ;;  %v3676_v20 = vrot.slane %v3660_v37, %v3652_v55 }
 0x784   : > { %v3692_v26 = vcombine.high %v3676_v20, %v3676_v20  ;;  %v3714_v9 = vrot.slane %v3676_v20, %v6968_v29  ;;  %v3590_v53 = vpop.permute.xlu1 %3589 }
 0x786   : > { %3442 = vbcast.lane.b32.xlu0 %v3440_v30, 256  ;;  %v3662_v30 = vcombine.high %v3660_v37, %v3660_v37  ;;  %v3722_v50 = vrot.slane %v3692_v26, %v6968_v29 }
 0x788   : > { %v3690_v23 = vrot.slane %v3662_v30, %v3652_v55  ;;  %v3485_v59 = vpop.permute.xlu1 %3484 }
 0x78a   : > { %3449 = vbcast.lane.b32.xlu0 %v3447_v60, 256  ;;  %v3693_v60 = vcombine.high %v3683_v2, %v3683_v2  ;;  %v3694_v5 = vcombine.high %v3690_v23, %v3690_v23 }
 0x78c   : > { %v3710_v31 = vrot.slane %v3693_v60, %v6968_v29  ;;  %v3726_v61 = vrot.slane %v3694_v5, %v6968_v29  ;;  %v3492_v38 = vpop.permute.xlu1 %3491  ;;  %v3629_v60 = vsel %vm3628_vm0, %v3620_v18, %v3513_v16  ;;  %v3286_v16 = vld [vmem:[%s8106_s9 + $0x18] sm:$0xff]  ;;  %v7453_v18 = vld [vmem:[%s6600_s4] sm:$0xff] }
 0x78e   : > { %3554 = vbcast.lane.b32.xlu0 %v3552_v32, 256  ;;  %v5717_v32 = vld [vmem:[%s6634_s27] sm:$0xff]  ;;  %s8107_s27 = sld [smem:[#allocation42_spill]] }
 0x78f   : > { %v3735_v4 = vmul.f32 %v5717_v32, %v3698_v39  ;;  %v3736_v19 = vmul.f32 %v5717_v32, %v3702_v33  ;;  %v3738_v35 = vmul.f32 %v5717_v32, %v3710_v31  ;;  %v3737_v44 = vmul.f32 %v5717_v32, %v3706_v27 }
 0x790   : > { %v3739_v6 = vmul.f32 %v5717_v32, %v3714_v9  ;;  %v3742_v8 = vmul.f32 %v5717_v32, %v3726_v61  ;;  %v3741_v11 = vmul.f32 %v5717_v32, %v3722_v50  ;;  %v3548_v40 = vpop.permute.xlu1 %3547  ;;  %v3638_v33 = vsel %vm3637_vm5, %v3629_v60, %v3569_v57  ;;  %v1680_v57 = vld [vmem:[%s8108_s23] sm:$0x1]  ;;  %s8115_s23 = sld [smem:[#allocation51_spill]] }
 0x791   : > { %3886 = vperm.xlu1 %5658, %v3736_v19  }
 0x792   : > { %3610 = vbcast.lane.b32.xlu0 %v3608_v7, 256  ;;  %v3718_v7 = vrot.slane %v3690_v23, %v6968_v29  ;;  %v3622_v23 = vsel %vm3619_vm15, %v3415_v15, %v3471_v58  ;;  %v8110_v15 = vld [vmem:[#allocation66_spill] sm:$0xff] }
 0x793   : > { %v1756_v58 = vadd.f32 %v8110_v15, %v1680_v57 }
 0x794   : > { %v3740_v47 = vmul.f32 %v5717_v32, %v3718_v7  ;;  %v3604_v52 = vpop.permute.xlu1 %3603  ;;  %v5115_v37 = vld [vmem:[%s8107_s27] ss:$0 sm:$0xff]  ;;  %v5116_v30 = vld [vmem:[%s8107_s27 + $0x1] ss:$0 sm:$0xff]  ;;  %v3621_v32 = vsel %vm3619_vm15, %v3408_v46, %v3464_v41  ;;  %v3623_v7 = vsel %vm3619_vm15, %v3422_v13, %v3478_v63  ;;  %v3285_v41 = vld [vmem:[%s8106_s9 + $0x10] sm:$0xff]  ;;  %s5935_s9 = scalar_lea.vmem %s5934_s8, 256 }
 0x795   : > { %3891 = vperm.xlu1 %5658, %v3737_v44   ;;  %v3632_v19 = vsel %vm3628_vm0, %v3623_v7, %v3534_v51  ;;  %v3625_v44 = vsel %vm3619_vm15, %v3436_v49, %v3492_v38 }
 0x796   : > { %3881 = vperm.xlu0 %5657, %v3735_v4   ;;  %v3630_v4 = vsel %vm3628_vm0, %v3621_v32, %v3520_v62  ;;  %v3634_v61 = vsel %vm3628_vm0, %v3625_v44, %v3548_v40  ;;  %v5421_v62 = vpack.c.bf16 %v3286_v16, %v3285_v41  ;;  %v7469_v44 = vld [vmem:[%s6600_s4 + $0x28] sm:$0xff]  ;;  %v7479_v41 = vld [vmem:[%s6600_s4 + $0x38] sm:$0xff] }
 0x797   : > { %v3639_v31 = vsel %vm3637_vm5, %v3630_v4, %v3576_v34  ;;  %v3643_v50 = vsel %vm3637_vm5, %v3634_v61, %v3604_v52  ;;  %v5117_v34 = vld [vmem:[%s8109_s2] ss:$0 sm:$0xff]  ;;  %s8116_s2 = sld [smem:[#allocation46_spill]] }
 0x798   : > { %v3499_v2 = vpop.permute.xlu1 %3498  ;;  %5422 = vmatpush3.bf16.msra.mxu1 %v5421_v62  ;;  %v7459_v4 = vld [vmem:[%s6600_s4 + $0x18] sm:$0xff]  ;;  %v7483_v62 = vld [vmem:[%s6600_s4 + $0x30] sm:$0xff] }
 0x799   : > { %3901 = vperm.xlu1 %5658, %v3739_v6  }
 0x79a   : > { %3896 = vperm.xlu0 %5657, %v3738_v35   ;;  %v3641_v35 = vsel %vm3637_vm5, %v3632_v19, %v3590_v53  ;;  %v3746_v53 = vrot.slane %v1756_v58, %v6968_v29 }
 0x79c   : > { %v3506_v27 = vpop.permute.xlu1 %3505 }
 0x79d   : > { %3911 = vperm.xlu1 %5658, %v3741_v11  }
 0x79e   : > { %3906 = vperm.xlu0 %5657, %v3740_v47  }
 0x7a0   : > { %v3562_v12 = vpop.permute.xlu1 %3561 }
 0x7a2   : > { %3916 = vperm.xlu0 %5657, %v3742_v8  }
 0x7a4   : > { %v3618_v14 = vpop.permute.xlu1 %3617 }
 0x7f5   : > { %v3185_v17 = vpop.xlane.xlu0 %3184 }
 0x7f6   : > { %v3186_v3 = vmul.f32 0.0625, %v3185_v17 }
 0x7f8   : > { %v3187_v1 = vadd.f32 1e-05, %v3186_v3 }
 0x7f9   : > { %v3541_v24 = vpop.permute.xlu0 %3540 }
 0x7fa   : > { %5676 = vrsqrt.f32 %v3187_v1 }
 0x7fd   : > { %v3597_v55 = vpop.permute.xlu0 %3596 }
 0x801   : > { %v3443_v25 = vpop.permute.xlu0 %3442 }
 0x802   : > { %v3626_v6 = vsel %vm3619_vm15, %v3443_v25, %v3499_v2 }
 0x804   : > { %v5677_v0 = vpop.eup %5676 }
 0x805   : > { %v3189_v21 = vmul.f32 %v5677_v0, %v7363_v54  ;;  %v3450_v39 = vpop.permute.xlu0 %3449  ;;  %v3631_v54 = vsel %vm3628_vm0, %v3622_v23, %v3527_v22  ;;  %v7449_v0 = vld [vmem:[%s6600_s4 + $0x8] sm:$0xff] }
 0x806   : > { %v3640_v56 = vsel %vm3637_vm5, %v3631_v54, %v3583_v48  ;;  %v3627_v9 = vsel %vm3619_vm15, %v3450_v39, %v3506_v27 }
 0x807   : > { %v3194_v45 = vmul.f32 %v5115_v37, %v3189_v21  ;;  %v3636_v11 = vsel %vm3628_vm0, %v3627_v9, %v3562_v12 }
 0x808   : > { %v3645_v46 = vsel %vm3637_vm5, %v3636_v11, %v3618_v14 }
 0x809   : > { %v7406_v20 = vadd.f32 %v5116_v30, %v3194_v45  ;;  %v3555_v36 = vpop.permute.xlu0 %3554 }
 0x80a   : > { %v3635_v8 = vsel %vm3628_vm0, %v3626_v6, %v3555_v36  ;;  %v7463_v36 = vld [vmem:[%s6600_s4 + $0x10] sm:$0xff]  ;;  %v7473_v6 = vld [vmem:[%s6600_s4 + $0x20] sm:$0xff]  ;;  %s8111_s4 = sld [smem:[#allocation48_spill]] }
 0x80b   : > { %5342 = vmatmul.mubr.msk.f32.vlgmr.msra.gmra.mrb[16].mxu0 %vm1287_vm2, %v7406_v20 }
 0x80c   : > { %5356 = vmatpush3.msk.msra.mxu0 %vm1685_vm3, %v7302_v42  ;;  %5357 = vmatprep.mubr.msk.f32.mxu0 %vm1681_vm4, %v3638_v33  ;;  %v3624_v42 = vsel %vm3619_vm15, %v3429_v43, %v3485_v59  ;;  %vm3294_vm3 = vcmask 261120  }
 0x80d   : > { %v3633_v5 = vsel %vm3628_vm0, %v3624_v42, %v3541_v24  ;;  %v3611_v47 = vpop.permute.xlu0 %3610 }
 0x80e   : > { %v3642_v26 = vsel %vm3637_vm5, %v3633_v5, %v3597_v55  ;;  %v3644_v10 = vsel %vm3637_vm5, %v3635_v8, %v3611_v47 }
 0x80f   : > { %5358 = vmatmul.mubr.msk.f32.vlgmr.msra.gmra.mrb[18].mxu0 %vm1681_vm4, %v3639_v31 }
 0x810   : > { %5360 = vmatprep.mubr.msk.f32.mxu0 %vm1681_vm4, %v3640_v56  ;;  %v3887_v22 = vpop.permute.xlu1 %3886 }
 0x813   : > { %5361 = vmatmul.mubr.msk.f32.gmra.mrb[20].mxu0 %vm1681_vm4, %v3641_v35 }
 0x814   : > { %5363 = vmatprep.mubr.msk.f32.mxu0 %vm1681_vm4, %v3642_v26  ;;  %v3892_v1 = vpop.permute.xlu1 %3891 }
 0x815   : > { %v3882_v13 = vpop.permute.xlu0 %3881 }
 0x817   : > { %5364 = vmatmul.mubr.msk.f32.gmra.mrb[22].mxu0 %vm1681_vm4, %v3643_v50 }
 0x818   : > { %5366 = vmatprep.mubr.msk.f32.mxu0 %vm1681_vm4, %v3644_v10  ;;  %v3902_v33 = vpop.permute.xlu1 %3901 }
 0x819   : > { %v3897_v17 = vpop.permute.xlu0 %3896 }
 0x81b   : > { %5367 = vmatmul.mubr.msk.f32.gmra.mrb[24].mxu0 %vm1681_vm4, %v3645_v46  ;;  %vm4538_vm4 = vcmask 392192  }
 0x81c   : > { %v3912_v8 = vpop.permute.xlu1 %3911 }
 0x81d   : > { %v3907_v45 = vpop.permute.xlu0 %3906 }
 0x821   : > { %v3917_v47 = vpop.permute.xlu0 %3916 }
 0x8de   : > { %v3278_v63 = vpop.f32.mrb[16].mxu0 }
 0x8df   : > { %v3279_v51 = vadd.f32 %v5117_v34, %v3278_v63  ;;  %v5343_v48 = vpop.f32.mrb[17].mxu0 }
 0x8e1   : > { %v3282_v43 = vmax.f32 %v3279_v51, 0.0 }
 0x8e2   : > { %v5359_v59 = vpop.f32.mrb[18].mxu0 }
 0x8e3   : > { %v3846_v49 = vadd.f32 %v5359_v59, %v3746_v53  ;;  %5353 = vmatmul.mubr.msk.f32.vlgmr.msra.gmra.mrb[20].mxu1 %vm3294_vm3, %v3282_v43  ;;  %v3840_v38 = vpop.f32.mrb[19].mxu0 }
 0x8e4   : > { %v3841_v3 = vadd.f32 %v3840_v38, %v3746_v53 }
 0x8e5   : > { %v3920_v24 = vmul.f32 %v3887_v22, %v3846_v49 }
 0x8e6   : > { %v3919_v40 = vmul.f32 %v3882_v13, %v3841_v3  ;;  %v5362_v55 = vpop.f32.mrb[20].mxu0 }
 0x8e7   : > { %v3856_v52 = vadd.f32 %v5362_v55, %v3746_v53  ;;  %v3850_v25 = vpop.f32.mrb[21].mxu0  ;;  %v3928_v29 = vadd.f32 %v7449_v0, %v3920_v24 }
 0x8e8   : > { %v3851_v37 = vadd.f32 %v3850_v25, %v3746_v53  ;;  %v3927_v21 = vadd.f32 %v7453_v18, %v3919_v40 }
 0x8e9   : > { %v3922_v30 = vmul.f32 %v3897_v17, %v3856_v52  ;;  %v3940_v2 = vsel %vm1463_vm1, %v3928_v29, 0.0 }
 0x8ea   : > { %v3921_v60 = vmul.f32 %v3892_v1, %v3851_v37  ;;  %v5365_v39 = vpop.f32.mrb[22].mxu0  ;;  %3941 = vadd.xlane.f32.xlu0 %v3940_v2  ;;  %v3937_v23 = vsel %vm1463_vm1, %v3927_v21, 0.0 }
 0x8eb   : > { %v3866_v32 = vadd.f32 %v5365_v39, %v3746_v53  ;;  %3938 = vadd.xlane.f32.xlu1 %v3937_v23  ;;  %v3860_v54 = vpop.f32.mrb[23].mxu0  ;;  %v3930_v27 = vadd.f32 %v7459_v4, %v3922_v30 }
 0x8ec   : > { %v3861_v31 = vadd.f32 %v3860_v54, %v3746_v53  ;;  %v3929_v56 = vadd.f32 %v7463_v36, %v3921_v60 }
 0x8ed   : > { %v3924_v7 = vmul.f32 %v3907_v45, %v3866_v32  ;;  %v3946_v19 = vsel %vm1463_vm1, %v3930_v27, 0.0 }
 0x8ee   : > { %v3923_v42 = vmul.f32 %v3902_v33, %v3861_v31  ;;  %v5368_v35 = vpop.f32.mrb[24].mxu0  ;;  %v3943_v5 = vsel %vm1463_vm1, %v3929_v56, 0.0 }
 0x8ef   : > { %v3876_v12 = vadd.f32 %v5368_v35, %v3746_v53  ;;  %3947 = vadd.xlane.f32.xlu1 %v3946_v19  ;;  %v3870_v26 = vpop.f32.mrb[25].mxu0  ;;  %3944 = vadd.xlane.f32.xlu0 %v3943_v5  ;;  %v3932_v9 = vadd.f32 %v7469_v44, %v3924_v7 }
 0x8f0   : > { %v3871_v61 = vadd.f32 %v3870_v26, %v3746_v53  ;;  %v3931_v50 = vadd.f32 %v7473_v6, %v3923_v42  ;;  %v4066_v26 = vld [vmem:[%s8111_s4] sm:$0xff]  ;;  %s6180_s4 = smov 16  }
 0x8f1   : > { %v3926_v11 = vmul.f32 %v3917_v47, %v3876_v12  ;;  %v3952_v10 = vsel %vm1463_vm1, %v3932_v9, 0.0  ;;  %5369 = vmatprep.subr.mxu1 %v4066_v26  ;;  %v4212_v47 = vld [vmem:[%s8112_s18 + $0x8] sm:$0xff] }
 0x8f2   : > { %v3925_v14 = vmul.f32 %v3912_v8, %v3871_v61  ;;  %v3949_v46 = vsel %vm1463_vm1, %v3931_v50, 0.0  ;;  %5370 = vmatpush3.msra.mxu1 %v4066_v26 }
 0x8f3   : > { %3953 = vadd.xlane.f32.xlu1 %v3952_v10  ;;  %3950 = vadd.xlane.f32.xlu0 %v3949_v46  ;;  %v3934_v16 = vadd.f32 %v7479_v41, %v3926_v11 }
 0x8f4   : > { %v3933_v57 = vadd.f32 %v7483_v62, %v3925_v14 }
 0x8f5   : > { %v3958_v34 = vsel %vm1463_vm1, %v3934_v16, 0.0 }
 0x8f6   : > { %v3955_v15 = vsel %vm1463_vm1, %v3933_v57, 0.0 }
 0x8f7   : > { %3959 = vadd.xlane.f32.xlu1 %v3958_v34  ;;  %3956 = vadd.xlane.f32.xlu0 %v3955_v15 }
 0x977   : > { %v3942_v58 = vpop.xlane.xlu0 %3941 }
 0x978   : > { %v3963_v13 = vmul.f32 0.125, %v3942_v58  ;;  %v3939_v63 = vpop.xlane.xlu1 %3938 }
 0x979   : > { %v3962_v22 = vmul.f32 0.125, %v3939_v63 }
 0x97a   : > { %v7488_v51 = vsub.f32 %v3928_v29, %v3963_v13 }
 0x97b   : > { %v7490_v48 = vsub.f32 %v3927_v21, %v3962_v22 }
 0x97c   : > { %v3945_v53 = vpop.xlane.xlu0 %3944  ;;  %v3948_v43 = vpop.xlane.xlu1 %3947  ;;  %v3979_v59 = vmul.f32 %v7488_v51, %v7488_v51 }
 0x97d   : > { %v3964_v49 = vmul.f32 0.125, %v3945_v53  ;;  %v3965_v38 = vmul.f32 0.125, %v3948_v43  ;;  %v3978_v17 = vmul.f32 %v7490_v48, %v7490_v48 }
 0x97e   : > { %v3989_v3 = vsel %vm1463_vm1, %v3979_v59, 0.0 }
 0x97f   : > { %v7497_v1 = vsub.f32 %v3929_v56, %v3964_v49  ;;  %v7499_v24 = vsub.f32 %v3930_v27, %v3965_v38  ;;  %3990 = vadd.xlane.f32.xlu1 %v3989_v3  ;;  %v3986_v40 = vsel %vm1463_vm1, %v3978_v17, 0.0 }
 0x980   : > { %v3951_v55 = vpop.xlane.xlu0 %3950  ;;  %3987 = vadd.xlane.f32.xlu0 %v3986_v40  ;;  %v3954_v52 = vpop.xlane.xlu1 %3953 }
 0x981   : > { %v3966_v25 = vmul.f32 0.125, %v3951_v55  ;;  %v3967_v29 = vmul.f32 0.125, %v3954_v52  ;;  %v3980_v37 = vmul.f32 %v7497_v1, %v7497_v1  ;;  %v3981_v21 = vmul.f32 %v7499_v24, %v7499_v24 }
 0x983   : > { %v7506_v30 = vsub.f32 %v3931_v50, %v3966_v25  ;;  %v7508_v2 = vsub.f32 %v3932_v9, %v3967_v29  ;;  %v3992_v45 = vsel %vm1463_vm1, %v3980_v37, 0.0  ;;  %v3995_v60 = vsel %vm1463_vm1, %v3981_v21, 0.0  ;;  %v4211_v9 = vld [vmem:[%s8112_s18] sm:$0xff] }
 0x984   : > { %v3957_v39 = vpop.xlane.xlu0 %3956  ;;  %3993 = vadd.xlane.f32.xlu0 %v3992_v45  ;;  %3996 = vadd.xlane.f32.xlu1 %v3995_v60  ;;  %v3960_v23 = vpop.xlane.xlu1 %3959  ;;  %v5423_v61 = vpack.c.bf16 %v4212_v47, %v4211_v9  ;;  %v5132_v29 = vld [vmem:[%s8113_s17] ss:$0 sm:$0xff] }
 0x985   : > { %v3968_v33 = vmul.f32 0.125, %v3957_v39  ;;  %v3969_v32 = vmul.f32 0.125, %v3960_v23  ;;  %v3982_v54 = vmul.f32 %v7506_v30, %v7506_v30  ;;  %v3983_v27 = vmul.f32 %v7508_v2, %v7508_v2  ;;  %v5133_v23 = vld [vmem:[%s8113_s17 + $0x1] ss:$0 sm:$0xff] }
 0x986   : > { %5424 = vmatprep.subr.bf16.mxu0 %v5423_v61 }
 0x987   : > { %v7516_v31 = vsub.f32 %v3933_v57, %v3968_v33  ;;  %v7518_v56 = vsub.f32 %v3934_v16, %v3969_v32  ;;  %v3998_v7 = vsel %vm1463_vm1, %v3982_v54, 0.0  ;;  %v4001_v19 = vsel %vm1463_vm1, %v3983_v27, 0.0  ;;  %5426 = vmatpush3.bf16.msra.mxu0 %v5423_v61 }
 0x988   : > { %3999 = vadd.xlane.f32.xlu0 %v3998_v7  ;;  %4002 = vadd.xlane.f32.xlu1 %v4001_v19 }
 0x989   : > { %v3984_v42 = vmul.f32 %v7516_v31, %v7516_v31  ;;  %v3985_v35 = vmul.f32 %v7518_v56, %v7518_v56 }
 0x98b   : > { %v4004_v5 = vsel %vm1463_vm1, %v3984_v42, 0.0  ;;  %v4007_v12 = vsel %vm1463_vm1, %v3985_v35, 0.0 }
 0x98c   : > { %4005 = vadd.xlane.f32.xlu0 %v4004_v5  ;;  %4008 = vadd.xlane.f32.xlu1 %v4007_v12 }
 0x9b6   : > { %v7531_v50 = vpop.f32.mrb[20].mxu1 }
 0x9b7   : > { %v5354_v8 = vpop.f32.mrb[21].mxu1 }
 0xa0c   : > { %v3991_v11 = vpop.xlane.xlu1 %3990 }
 0xa0d   : > { %v4011_v10 = vmul.f32 0.125, %v3991_v11  ;;  %v3988_v14 = vpop.xlane.xlu0 %3987 }
 0xa0e   : > { %v4010_v46 = vmul.f32 0.125, %v3988_v14 }
 0xa0f   : > { %v4019_v16 = vadd.f32 1e-05, %v4011_v10 }
 0xa10   : > { %v4018_v57 = vadd.f32 1e-05, %v4010_v46 }
 0xa11   : > { %5678 = vrsqrt.f32 %v4019_v16  ;;  %v3994_v34 = vpop.xlane.xlu0 %3993  ;;  %v3997_v15 = vpop.xlane.xlu1 %3996 }
 0xa12   : > { %5680 = vrsqrt.f32 %v4018_v57  ;;  %v4012_v58 = vmul.f32 0.125, %v3994_v34  ;;  %v4013_v13 = vmul.f32 0.125, %v3997_v15 }
 0xa14   : > { %v4020_v63 = vadd.f32 1e-05, %v4012_v58  ;;  %v4021_v22 = vadd.f32 1e-05, %v4013_v13 }
 0xa15   : > { %v4000_v53 = vpop.xlane.xlu0 %3999  ;;  %v4003_v43 = vpop.xlane.xlu1 %4002 }
 0xa16   : > { %5682 = vrsqrt.f32 %v4020_v63  ;;  %v4014_v59 = vmul.f32 0.125, %v4000_v53  ;;  %v4015_v49 = vmul.f32 0.125, %v4003_v43 }
 0xa17   : > { %5684 = vrsqrt.f32 %v4021_v22 }
 0xa18   : > { %v4022_v38 = vadd.f32 1e-05, %v4014_v59  ;;  %v4023_v17 = vadd.f32 1e-05, %v4015_v49 }
 0xa19   : > { %v4006_v3 = vpop.xlane.xlu0 %4005  ;;  %v4009_v40 = vpop.xlane.xlu1 %4008 }
 0xa1a   : > { %5686 = vrsqrt.f32 %v4022_v38  ;;  %v4016_v55 = vmul.f32 0.125, %v4006_v3  ;;  %v4017_v52 = vmul.f32 0.125, %v4009_v40 }
 0xa1b   : > { %v5679_v25 = vpop.eup %5678  ;;  %5688 = vrsqrt.f32 %v4023_v17 }
 0xa1c   : > { %v5681_v37 = vpop.eup %5680  ;;  %v4035_v21 = vmul.f32 %v5679_v25, %v7488_v51  ;;  %v4024_v45 = vadd.f32 1e-05, %v4016_v55  ;;  %v4025_v60 = vadd.f32 1e-05, %v4017_v52 }
 0xa1d   : > { %v4034_v39 = vmul.f32 %v5681_v37, %v7490_v48 }
 0xa1e   : > { %5690 = vrsqrt.f32 %v4024_v45  ;;  %v4047_v33 = vmul.f32 %v5132_v29, %v4035_v21 }
 0xa1f   : > { %5692 = vrsqrt.f32 %v4025_v60  ;;  %v4046_v32 = vmul.f32 %v5132_v29, %v4034_v39 }
 0xa20   : > { %v5683_v54 = vpop.eup %5682  ;;  %v7540_v42 = vadd.f32 %v5133_v23, %v4047_v33  ;;  %v5143_v33 = vld [vmem:[%s8115_s23] ss:$0 sm:$0xff]  ;;  %s6182_s23 = smov 48  }
 0xa21   : > { %v5685_v27 = vpop.eup %5684  ;;  %v7537_v7 = vadd.f32 %v5133_v23, %v4046_v32  ;;  %v4036_v19 = vmul.f32 %v5683_v54, %v7497_v1 }
 0xa22   : > { %v4037_v35 = vmul.f32 %v5685_v27, %v7499_v24 }
 0xa23   : > { %5371 = vmatprep.mubr.msk.f32.mxu1 %vm1463_vm1, %v7537_v7  ;;  %v4048_v51 = vmul.f32 %v5132_v29, %v4036_v19 }
 0xa24   : > { %v5687_v48 = vpop.eup %5686  ;;  %5372 = vmatmul.mubr.msk.f32.vlgmr.msra.gmra.mrb[22].mxu1 %vm1463_vm1, %v7540_v42  ;;  %v4049_v5 = vmul.f32 %v5132_v29, %v4037_v35 }
 0xa25   : > { %v5689_v12 = vpop.eup %5688  ;;  %v7547_v26 = vadd.f32 %v5133_v23, %v4048_v51  ;;  %v4038_v9 = vmul.f32 %v5687_v48, %v7506_v30 }
 0xa26   : > { %v7550_v47 = vadd.f32 %v5133_v23, %v4049_v5  ;;  %v4039_v1 = vmul.f32 %v5689_v12, %v7508_v2 }
 0xa27   : > { %5374 = vmatprep.mubr.msk.f32.mxu1 %vm1463_vm1, %v7547_v26  ;;  %v4050_v24 = vmul.f32 %v5132_v29, %v4038_v9 }
 0xa28   : > { %v5691_v61 = vpop.eup %5690  ;;  %5375 = vmatmul.mubr.msk.f32.gmra.mrb[24].mxu1 %vm1463_vm1, %v7550_v47  ;;  %v4051_v8 = vmul.f32 %v5132_v29, %v4039_v1 }
 0xa29   : > { %v5693_v11 = vpop.eup %5692  ;;  %v7557_v10 = vadd.f32 %v5133_v23, %v4050_v24  ;;  %v4040_v14 = vmul.f32 %v5691_v61, %v7516_v31  ;;  %v5134_v31 = vld [vmem:[%s8114_s30] ss:$0 sm:$0xff]  ;;  %s6181_s30 = smov 32  }
 0xa2a   : > { %v7560_v30 = vadd.f32 %v5133_v23, %v4051_v8  ;;  %v4041_v46 = vmul.f32 %v5693_v11, %v7518_v56 }
 0xa2b   : > { %5377 = vmatprep.mubr.msk.f32.mxu1 %vm1463_vm1, %v7557_v10  ;;  %v4052_v2 = vmul.f32 %v5132_v29, %v4040_v14 }
 0xa2c   : > { %5378 = vmatmul.mubr.msk.f32.gmra.mrb[26].mxu1 %vm1463_vm1, %v7560_v30  ;;  %v4053_v16 = vmul.f32 %v5132_v29, %v4041_v46 }
 0xa2d   : > { %v7567_v57 = vadd.f32 %v5133_v23, %v4052_v2 }
 0xa2e   : > { %v7569_v34 = vadd.f32 %v5133_v23, %v4053_v16  ;;  %v5119_v16 = vld [vmem:[%s8116_s2] ss:$0 sm:$0xff]  ;;  %s6183_s2 = smov 24  }
 0xa2f   : > { %5380 = vmatprep.mubr.msk.f32.mxu1 %vm1463_vm1, %v7567_v57 }
 0xa30   : > { %5381 = vmatmul.mubr.msk.f32.gmra.mrb[28].mxu1 %vm1463_vm1, %v7569_v34 }
 0xaf7   : > { %v5373_v56 = vpop.f32.mrb[22].mxu1 }
 0xaf8   : > { %v4170_v15 = vadd.f32 %v5373_v56, %v5134_v31  ;;  %v4164_v58 = vpop.f32.mrb[23].mxu1 }
 0xaf9   : > { %v4165_v13 = vadd.f32 %v5134_v31, %v4164_v58 }
 0xafa   : > { %v4204_v53 = vmax.f32 %v4170_v15, 0.0 }
 0xafb   : > { %v4203_v63 = vmax.f32 %v4165_v13, 0.0  ;;  %v5376_v22 = vpop.f32.mrb[24].mxu1  ;;  %v3365_v13 = vadd.f32 %v5119_v16, %v7531_v50 }
 0xafc   : > { %v4180_v43 = vadd.f32 %v5376_v22, %v5134_v31  ;;  %v4174_v59 = vpop.f32.mrb[25].mxu1 }
 0xafd   : > { %v4175_v49 = vadd.f32 %v5134_v31, %v4174_v59  ;;  %5387 = vmatprep.mubr.msk.f32.mxu0 %vm1287_vm2, %v4203_v63  ;;  %v4502_v59 = vsel %vm1287_vm2, %v7314_v28, inf }
 0xafe   : > { %5388 = vmatmul.mubr.msk.f32.vlgmr.msra.gmra.mrb[26].mxu0 %vm1287_vm2, %v4204_v53  ;;  %v4206_v3 = vmax.f32 %v4180_v43, 0.0  ;;  %v7626_v43 = vadd.f32 %v3365_v13, %v7406_v20  ;;  %v4605_v20 = vmul.f32 %v7453_v18, %v7453_v18  ;;  %v4611_v13 = vmul.f32 %v7483_v62, %v7483_v62 }
 0xaff   : > { %v4205_v38 = vmax.f32 %v4175_v49, 0.0  ;;  %v5379_v17 = vpop.f32.mrb[26].mxu1 }
 0xb00   : > { %v4190_v40 = vadd.f32 %v5379_v17, %v5134_v31  ;;  %v4184_v55 = vpop.f32.mrb[27].mxu1  ;;  %v3371_v49 = vsel %vm1287_vm2, %v7626_v43, 0.0 }
 0xb01   : > { %v4185_v52 = vadd.f32 %v5134_v31, %v4184_v55  ;;  %5390 = vmatprep.mubr.msk.f32.mxu0 %vm1287_vm2, %v4205_v38  ;;  %v4606_v55 = vmul.f32 %v7449_v0, %v7449_v0 }
 0xb02   : > { %5391 = vmatmul.mubr.msk.f32.gmra.mrb[28].mxu0 %vm1287_vm2, %v4206_v3  ;;  %v4208_v37 = vmax.f32 %v4190_v40, 0.0 }
 0xb03   : > { %v4207_v25 = vmax.f32 %v4185_v52, 0.0  ;;  %v5382_v29 = vpop.f32.mrb[28].mxu1  ;;  %v4613_v52 = vsel %vm1463_vm1, %v4605_v20, 0.0 }
 0xb04   : > { %v4200_v21 = vadd.f32 %v5382_v29, %v5134_v31  ;;  %v4194_v45 = vpop.f32.mrb[29].mxu1  ;;  %v4607_v29 = vmul.f32 %v7463_v36, %v7463_v36 }
 0xb05   : > { %v4195_v60 = vadd.f32 %v5134_v31, %v4194_v45  ;;  %5393 = vmatprep.mubr.msk.f32.mxu0 %vm1287_vm2, %v4207_v25  ;;  %v4614_v25 = vsel %vm1463_vm1, %v4606_v55, 0.0  ;;  %v4608_v45 = vmul.f32 %v7459_v4, %v7459_v4 }
 0xb06   : > { %5394 = vmatmul.mubr.msk.f32.gmra.mrb[30].mxu0 %vm1287_vm2, %v4208_v37  ;;  %v4210_v23 = vmax.f32 %v4200_v21, 0.0  ;;  %v4615_v37 = vadd.f32 %v4614_v25, %v4613_v52  ;;  %v4616_v21 = vsel %vm1463_vm1, %v4607_v29, 0.0  ;;  %v4509_v52 = vsel %vm1287_vm2, %v7314_v28, -inf }
 0xb07   : > { %v4209_v39 = vmax.f32 %v4195_v60, 0.0 }
 0xb08   : > { %v4617_v60 = vadd.f32 %v4616_v21, %v4615_v37 }
 0xb09   : > { %5396 = vmatprep.mubr.msk.f32.mxu0 %vm1287_vm2, %v4209_v39  ;;  %v4618_v39 = vsel %vm1463_vm1, %v4608_v45, 0.0 }
 0xb0a   : > { %5397 = vmatmul.mubr.msk.f32.gmra.mrb[32].mxu0 %vm1287_vm2, %v4210_v23  ;;  %v4609_v23 = vmul.f32 %v7473_v6, %v7473_v6 }
 0xbd1   : > { %v5389_v32 = vpop.f32.mrb[26].mxu0 }
 0xbd2   : > { %v4316_v54 = vadd.f32 %v5389_v32, %v5143_v33  ;;  %v4310_v27 = vpop.f32.mrb[27].mxu0 }
 0xbd3   : > { %v4311_v19 = vadd.f32 %v5143_v33, %v4310_v27  ;;  %v4565_v27 = vsel %vm1463_vm1, %v7463_v36, inf }
 0xbd4   : > { %v7586_v35 = vadd.f32 %v4316_v54, %v7540_v42  ;;  %v4564_v54 = vsel %vm1463_vm1, %v7449_v0, inf }
 0xbd5   : > { %v7589_v51 = vadd.f32 %v4311_v19, %v7537_v7  ;;  %v5392_v48 = vpop.f32.mrb[28].mxu0  ;;  %v4566_v19 = vsel %vm1463_vm1, %v7459_v4, inf }
 0xbd6   : > { %v4326_v5 = vadd.f32 %v5392_v48, %v5143_v33  ;;  %v4320_v12 = vpop.f32.mrb[29].mxu0  ;;  %v4362_v9 = vsel %vm1463_vm1, %v7586_v35, 0.0 }
 0xbd7   : > { %v4321_v1 = vadd.f32 %v5143_v33, %v4320_v12  ;;  %4363 = vadd.xlane.f32.xlu1 %v4362_v9  ;;  %v4359_v24 = vsel %vm1463_vm1, %v7589_v51, 0.0  ;;  %v4567_v12 = vsel %vm1463_vm1, %v7473_v6, inf  ;;  %v4569_v9 = vsel %vm1463_vm1, %v7469_v44, inf }
 0xbd8   : > { %v7596_v61 = vadd.f32 %v4326_v5, %v7550_v47  ;;  %4360 = vadd.xlane.f32.xlu0 %v4359_v24  ;;  %v4619_v5 = vadd.f32 %v4618_v39, %v4617_v60  ;;  %v4620_v24 = vsel %vm1463_vm1, %v4609_v23, 0.0 }
 0xbd9   : > { %v7599_v42 = vadd.f32 %v4321_v1, %v7547_v26  ;;  %v5395_v7 = vpop.f32.mrb[30].mxu0  ;;  %v4610_v1 = vmul.f32 %v7469_v44, %v7469_v44 }
 0xbda   : > { %v4336_v8 = vadd.f32 %v5395_v7, %v5143_v33  ;;  %v4330_v11 = vpop.f32.mrb[31].mxu0  ;;  %v4368_v14 = vsel %vm1463_vm1, %v7596_v61, 0.0  ;;  %v4571_v7 = vsel %vm1463_vm1, %v7483_v62, inf }
 0xbdb   : > { %v4331_v46 = vadd.f32 %v5143_v33, %v4330_v11  ;;  %4369 = vadd.xlane.f32.xlu1 %v4368_v14  ;;  %v4365_v2 = vsel %vm1463_vm1, %v7599_v42, 0.0 }
 0xbdc   : > { %v7607_v31 = vadd.f32 %v4336_v8, %v7560_v30  ;;  %4366 = vadd.xlane.f32.xlu0 %v4365_v2  ;;  %v4573_v8 = vsel %vm1463_vm1, %v7479_v41, inf }
 0xbdd   : > { %v7610_v47 = vadd.f32 %v4331_v46, %v7557_v10  ;;  %v5398_v26 = vpop.f32.mrb[32].mxu0 }
 0xbde   : > { %v4346_v56 = vadd.f32 %v5398_v26, %v5143_v33  ;;  %v4340_v15 = vpop.f32.mrb[33].mxu0  ;;  %v4374_v58 = vsel %vm1463_vm1, %v7607_v31, 0.0  ;;  %v4570_v26 = vmin.f32 %v4564_v54, %v4569_v9 }
 0xbdf   : > { %v4341_v63 = vadd.f32 %v5143_v33, %v4340_v15  ;;  %4375 = vadd.xlane.f32.xlu1 %v4374_v58  ;;  %v4371_v22 = vsel %vm1463_vm1, %v7610_v47, 0.0  ;;  %v4563_v33 = vsel %vm1463_vm1, %v7453_v18, inf  ;;  %v4574_v15 = vmin.f32 %v4566_v19, %v4573_v8 }
 0xbe0   : > { %v7618_v30 = vadd.f32 %v4346_v56, %v7569_v34  ;;  %4372 = vadd.xlane.f32.xlu0 %v4371_v22  ;;  %v4503_v34 = vrot.slane %v4502_v59, 4  ;;  %v4568_v16 = vmin.f32 %v4563_v33, %v4567_v12  ;;  %v4572_v56 = vmin.f32 %v4565_v27, %v4571_v7 }
 0xbe1   : > { %v7621_v10 = vadd.f32 %v4341_v63, %v7567_v57  ;;  %v4621_v58 = vadd.f32 %v4620_v24, %v4619_v5  ;;  %v4510_v33 = vrot.slane %v4509_v52, 4 }
 0xbe2   : > { %v4380_v53 = vsel %vm1463_vm1, %v7618_v30, 0.0  ;;  %v4504_v57 = vmin.f32 %v4502_v59, %v4503_v34  ;;  %v4575_v34 = vmin.f32 %v4568_v16, %v4570_v26 }
 0xbe3   : > { %4381 = vadd.xlane.f32.xlu1 %v4380_v53  ;;  %v4377_v50 = vsel %vm1463_vm1, %v7621_v10, 0.0 }
 0xbe4   : > { %4378 = vadd.xlane.f32.xlu0 %v4377_v50  ;;  %v4505_v38 = vrot.slane %v4504_v57, 2 }
 0xbe6   : > { %v4506_v17 = vmin.f32 %v4504_v57, %v4505_v38 }
 0xbe8   : > { %3372 = vadd.xlane.f32.xlu0 %v3371_v49  ;;  %v4507_v3 = vrot.slane %v4506_v17, 1  ;;  %v4576_v49 = vmin.f32 %v4572_v56, %v4574_v15 }
 0xbea   : > { %v4508_v40 = vmin.f32 %v4506_v17, %v4507_v3  ;;  %v4624_v3 = vsel %vm1463_vm1, %v4611_v13, 0.0  ;;  %v4577_v25 = vmin.f32 %v4575_v34, %v4576_v49 }
 0xbec   : > { %v4578_v54 = vrot.slane %v4577_v25, 4 }
 0xbee   : > { %v4579_v12 = vmin.f32 %v4577_v25, %v4578_v54 }
 0xbf0   : > { %v4580_v8 = vrot.slane %v4579_v12, 2 }
 0xbfe   : > { %4525 = vrot.lane.b32.xlu0 %v4508_v40, %s6180_s4 }
 0xc64   : > { %v4364_v34 = vpop.xlane.xlu1 %4363 }
 0xc65   : > { %v4361_v32 = vpop.xlane.xlu0 %4360 }
 0xc66   : > { %v4383_v48 = vmul.f32 0.125, %v4361_v32 }
 0xc68   : > { %v7669_v11 = vsub.f32 %v7589_v51, %v4383_v48  ;;  %v4622_v51 = vsel %vm1463_vm1, %v4610_v1, 0.0  ;;  %v4511_v48 = vmax.f32 %v4509_v52, %v4510_v33  ;;  %v4370_v49 = vpop.xlane.xlu1 %4369  ;;  %v4592_v52 = vsel %vm1463_vm1, %v7483_v62, -inf }
 0xc69   : > { %v4367_v14 = vpop.xlane.xlu0 %4366  ;;  %v4623_v57 = vadd.f32 %v4622_v51, %v4621_v58 }
 0xc6a   : > { %v4385_v46 = vmul.f32 0.125, %v4367_v14  ;;  %v4399_v2 = vmul.f32 %v7669_v11, %v7669_v11  ;;  %v4512_v24 = vrot.slane %v4511_v48, 2 }
 0xc6b   : > { %v4625_v29 = vadd.f32 %v4624_v3, %v4623_v57  ;;  %v4384_v57 = vmul.f32 0.125, %v4364_v34  ;;  %v4586_v3 = vsel %vm1463_vm1, %v7463_v36, -inf }
 0xc6c   : > { %v7676_v63 = vsub.f32 %v7599_v42, %v4385_v46  ;;  %v4407_v22 = vsel %vm1463_vm1, %v4399_v2, 0.0  ;;  %v4612_v42 = vmul.f32 %v7479_v41, %v7479_v41  ;;  %v4513_v46 = vmax.f32 %v4511_v48, %v4512_v24  ;;  %v4376_v25 = vpop.xlane.xlu1 %4375 }
 0xc6d   : > { %4408 = vadd.xlane.f32.xlu0 %v4407_v22  ;;  %v4373_v53 = vpop.xlane.xlu0 %4372  ;;  %v4581_v2 = vmin.f32 %v4579_v12, %v4580_v8 }
 0xc6e   : > { %v4387_v50 = vmul.f32 0.125, %v4373_v53  ;;  %v4401_v59 = vmul.f32 %v7676_v63, %v7676_v63  ;;  %v4626_v45 = vsel %vm1463_vm1, %v4612_v42, 0.0  ;;  %v4514_v26 = vrot.slane %v4513_v46, 1 }
 0xc6f   : > { %v4582_v15 = vrot.slane %v4581_v2, 1  ;;  %v4585_v42 = vsel %vm1463_vm1, %v7449_v0, -inf }
 0xc70   : > { %v7683_v38 = vsub.f32 %v7610_v47, %v4387_v50  ;;  %v4413_v17 = vsel %vm1463_vm1, %v4401_v59, 0.0  ;;  %v4516_v47 = vmul.f32 %v7314_v28, %v7314_v28  ;;  %v4627_v28 = vadd.f32 %v4626_v45, %v4625_v29 }
 0xc71   : > { %4414 = vadd.xlane.f32.xlu0 %v4413_v17  ;;  %v4379_v40 = vpop.xlane.xlu0 %4378  ;;  %v4515_v13 = vmax.f32 %v4513_v46, %v4514_v26  ;;  %v4583_v51 = vmin.f32 %v4581_v2, %v4582_v15  ;;  %v4584_v17 = vsel %vm1463_vm1, %v7453_v18, -inf  ;;  %v7728_v29 = vsub.f32 %v7586_v35, %v4384_v57 }
 0xc72   : > { %v4389_v20 = vmul.f32 0.125, %v4379_v40  ;;  %v4403_v55 = vmul.f32 %v7683_v38, %v7683_v38  ;;  %v4517_v32 = vsel %vm1287_vm2, %v4516_v47, 0.0  ;;  %v4628_v9 = vrot.slane %v4627_v28, 4 }
 0xc73   : > { %v4518_v5 = vrot.slane %v4517_v32, 4  ;;  %v4587_v40 = vsel %vm1463_vm1, %v7459_v4, -inf  ;;  %v4594_v47 = vsel %vm1463_vm1, %v7479_v41, -inf  ;;  %v4400_v54 = vmul.f32 %v7728_v29, %v7728_v29 }
 0xc74   : > { %v7696_v37 = vsub.f32 %v7621_v10, %v4389_v20  ;;  %v4419_v21 = vsel %vm1463_vm1, %v4403_v55, 0.0  ;;  %v4629_v14 = vadd.f32 %v4628_v9, %v4627_v28  ;;  %v4588_v20 = vsel %vm1463_vm1, %v7473_v6, -inf  ;;  %v4382_v28 = vpop.xlane.xlu1 %4381 }
 0xc75   : > { %4420 = vadd.xlane.f32.xlu0 %v4419_v21  ;;  %v3373_v60 = vpop.xlane.xlu0 %3372  ;;  %v4519_v7 = vadd.f32 %v4518_v5, %v4517_v32  ;;  %v4590_v55 = vsel %vm1463_vm1, %v7469_v44, -inf  ;;  %v4386_v21 = vmul.f32 0.125, %v4370_v49  ;;  %v4589_v45 = vmax.f32 %v4584_v17, %v4588_v20 }
 0xc76   : > { %v3374_v39 = vmul.f32 0.0625, %v3373_v60  ;;  %v4405_v23 = vmul.f32 %v7696_v37, %v7696_v37  ;;  %v4630_v16 = vrot.slane %v4629_v14, 2  ;;  %v4591_v60 = vmax.f32 %v4585_v42, %v4590_v55 }
 0xc77   : > { %v7731_v33 = vsub.f32 %v7596_v61, %v4386_v21  ;;  %v4388_v32 = vmul.f32 0.125, %v4376_v25  ;;  %v4390_v35 = vmul.f32 0.125, %v4382_v28  ;;  %v4410_v5 = vsel %vm1463_vm1, %v4400_v54, 0.0 }
 0xc78   : > { %v7704_v27 = vsub.f32 %v7626_v43, %v3374_v39  ;;  %v4425_v10 = vsel %vm1463_vm1, %v4405_v23, 0.0  ;;  %v4520_v43 = vrot.slane %v4519_v7, 2  ;;  %v4631_v58 = vadd.f32 %v4630_v16, %v4629_v14 }
 0xc79   : > { %4426 = vadd.xlane.f32.xlu0 %v4425_v10  ;;  %v4593_v39 = vmax.f32 %v4586_v3, %v4592_v52  ;;  %v4595_v23 = vmax.f32 %v4587_v40, %v4594_v47  ;;  %v4596_v10 = vmax.f32 %v4589_v45, %v4591_v60  ;;  %v7736_v48 = vsub.f32 %v7607_v31, %v4388_v32  ;;  %v4526_v26 = vpop.permute.xlu0 %4525  ;;  %v7755_v47 = vld [vmem:[%s8113_s17 + $0x2] ss:$0 sm:$0xff]  ;;  %v7759_v60 = vld [vmem:[%s8113_s17 + $0x3] ss:$0 sm:$0xff] }
 0xc7a   : > { %v3376_v19 = vmul.f32 %v7704_v27, %v7704_v27  ;;  %v4521_v56 = vadd.f32 %v4520_v43, %v4519_v7  ;;  %v4632_v53 = vrot.slane %v4631_v58, 1  ;;  %v4402_v12 = vmul.f32 %v7731_v33, %v7731_v33 }
 0xc7b   : > { %v7742_v61 = vsub.f32 %v7618_v30, %v4390_v35  ;;  %v4404_v24 = vmul.f32 %v7736_v48, %v7736_v48 }
 0xc7c   : > { %v3377_v1 = vsel %vm1287_vm2, %v3376_v19, 0.0  ;;  %v4522_v22 = vrot.slane %v4521_v56, 1  ;;  %v4633_v59 = vadd.f32 %v4632_v53, %v4631_v58  ;;  %v4597_v19 = vmax.f32 %v4593_v39, %v4595_v23 }
 0xc7d   : > { %3378 = vadd.xlane.f32.xlu1 %v3377_v1  ;;  %v4416_v1 = vsel %vm1463_vm1, %v4402_v12, 0.0  ;;  %v4422_v7 = vsel %vm1463_vm1, %v4404_v24, 0.0  ;;  %v4406_v8 = vmul.f32 %v7742_v61, %v7742_v61 }
 0xc7e   : > { %v4523_v50 = vadd.f32 %v4522_v22, %v4521_v56  ;;  %v4598_v9 = vmax.f32 %v4596_v10, %v4597_v19  ;;  %v5726_v56 = vld [vmem:[%s6640_s6] sm:$0xff]  ;;  %s7766_s6 = scalar_lea.vmem [#allocation16], %s5073_s22  ;;  %s8012_s22 = scalar_lea.vmem [#allocation18], %s6594_s10 }
 0xc7f   : > { %v4428_v46 = vsel %vm1463_vm1, %v4406_v8, 0.0  ;;  %v4495_v15 = vsel %vm1287_vm2, %v5726_v56, 0.0 }
 0xc80   : > { %v4599_v31 = vrot.slane %v4598_v9, 4  ;;  %v4496_v58 = vrot.slane %v4495_v15, 4 }
 0xc82   : > { %v4600_v14 = vmax.f32 %v4598_v9, %v4599_v31 }
 0xc84   : > { %v4601_v30 = vrot.slane %v4600_v14, 2 }
 0xc86   : > { %v4602_v43 = vmax.f32 %v4600_v14, %v4601_v30 }
 0xc88   : > { %v4603_v2 = vrot.slane %v4602_v43, 1 }
 0xc8a   : > { %v4604_v16 = vmax.f32 %v4602_v43, %v4603_v2  ;;  %v5121_v43 = vld [vmem:[%s8107_s27 + $0x2] ss:$0 sm:$0xff]  ;;  %v4542_v2 = vsel %vm1463_vm1, %v7453_v18, 0.0  ;;  %v4545_v18 = vsel %vm1463_vm1, %v7463_v36, 0.0 }
 0xc8e   : > { %4529 = vrot.lane.b32.xlu1 %v4515_v13, %s6181_s30  ;;  %s8117_s30 = sld [smem:[#allocation52_spill]] }
 0xc8f   : > { %4635 = vrot.lane.b32.xlu0 %v4583_v51, %s8010_s16  ;;  %v4497_v51 = vadd.f32 %v4496_v58, %v4495_v15 }
 0xc91   : > { %v4498_v34 = vrot.slane %v4497_v51, 2 }
 0xc92   : > { %4533 = vrot.lane.b32.xlu1 %v4523_v50, %s6182_s23  ;;  %s8118_s23 = sld [smem:[#allocation60_spill]] }
 0xc93   : > { %4643 = vrot.lane.b32.xlu0 %v4633_v59, %s6183_s2  ;;  %v4499_v42 = vadd.f32 %v4498_v34, %v4497_v51  ;;  %s5156_s2 = sshll.u32 %s6107_s0, 7 }
 0xc95   : > { %v4500_v52 = vrot.slane %v4499_v42, 1 }
 0xc97   : > { %v4501_v54 = vadd.f32 %v4500_v52, %v4499_v42 }
 0xc98   : > { %p8119_p8 = scmp.ne.s32.totalorder %s8118_s23, 0 }
 0xc99   : > { %v4536_v12 = vsel %vm1287_vm2, %v4501_v54, %v4526_v26 }
 0xcb6   : > { %4411 = vadd.xlane.f32.xlu1 %v4410_v5 }
 0xcba   : > { %4417 = vadd.xlane.f32.xlu1 %v4416_v1 }
 0xcbe   : > { %4423 = vadd.xlane.f32.xlu1 %v4422_v7 }
 0xcc2   : > { %4429 = vadd.xlane.f32.xlu1 %v4428_v46 }
 0xcd3   : > { %4639 = vrot.lane.b32.xlu1 %v4604_v16, %s6180_s4  ;;  %s5078_s4 = sshll.u32 %s6594_s10, 3  ;;  %v4543_v16 = vsel %vm1463_vm1, %v7449_v0, 0.0 }
 0xcd4   : > { %s1218_s16 = scalar_lea.vmem [#allocation15], %s5078_s4  ;;  %v4544_v58 = vadd.f32 %v4543_v16, %v4542_v2  ;;  %s4653_s4 = scalar_lea.sflag [#allocation5], %s6594_s10 }
 0xcd5   : > { %s4680_s28 = sshll.u32 %s1218_s16, 4  ;;  %s7803_s28 = int_to_ptr.vmem [resolvable:$true] %s4680_s28 }
 0xcd6   : > { %v4546_v0 = vadd.f32 %v4545_v18, %v4544_v58  ;;  %s5929_s3 = scalar_lea.vmem %s7803_s28, 128  ;;  %p5936_p1 = scmp.lt.s32.totalorder %s7803_s28, %s5934_s8 }
 0xcd7   : > { %p5930_p13 = scmp.ne.s32.totalorder %s7803_s28, %s5929_s3  ;;  %p5937_p2 = scmp.lt.s32.totalorder %s5935_s9, %s5929_s3 }
 0xcd9   : > { %p5931_p11 = pnand %p5930_p13, %p8119_p8  ;;  %p5938_p7 = por %p5937_p2, %p5936_p1 }
 0xcdb   : > { %p5932_p5 = pneg %p5931_p11 }
 0xcdd   : > { %p5939_p9 = pnand %p5938_p7, %p5932_p5 }
 0xcfa   : > { %v4409_v13 = vpop.xlane.xlu0 %4408 }
 0xcfb   : > { %v4431_v22 = vmul.f32 0.125, %v4409_v13 }
 0xcfd   : > { %v4439_v53 = vadd.f32 1e-05, %v4431_v22 }
 0xcfe   : > { %v4415_v50 = vpop.xlane.xlu0 %4414 }
 0xcff   : > { %5694 = vrsqrt.f32 %v4439_v53  ;;  %v4433_v59 = vmul.f32 0.125, %v4415_v50 }
 0xd01   : > { %v4441_v49 = vadd.f32 1e-05, %v4433_v59 }
 0xd02   : > { %v4421_v57 = vpop.xlane.xlu0 %4420 }
 0xd03   : > { %5696 = vrsqrt.f32 %v4441_v49  ;;  %v4435_v17 = vmul.f32 0.125, %v4421_v57 }
 0xd05   : > { %v4443_v3 = vadd.f32 1e-05, %v4435_v17 }
 0xd06   : > { %v4427_v40 = vpop.xlane.xlu0 %4426 }
 0xd07   : > { %5698 = vrsqrt.f32 %v4443_v3  ;;  %v4437_v20 = vmul.f32 0.125, %v4427_v40 }
 0xd09   : > { %v5695_v55 = vpop.eup %5694  ;;  %v4445_v25 = vadd.f32 1e-05, %v4437_v20 }
 0xd0a   : > { %v4455_v21 = vmul.f32 %v5695_v55, %v7669_v11  ;;  %v3379_v45 = vpop.xlane.xlu1 %3378 }
 0xd0b   : > { %5700 = vrsqrt.f32 %v4445_v25  ;;  %v3380_v39 = vmul.f32 0.0625, %v3379_v45 }
 0xd0c   : > { %v4467_v23 = vmul.f32 %v7755_v47, %v4455_v21 }
 0xd0d   : > { %v5697_v32 = vpop.eup %5696  ;;  %v3381_v28 = vadd.f32 1e-05, %v3380_v39 }
 0xd0e   : > { %v4479_v10 = vadd.f32 %v7759_v60, %v4467_v23  ;;  %v4457_v19 = vmul.f32 %v5697_v32, %v7676_v63  ;;  %v4530_v35 = vpop.permute.xlu1 %4529 }
 0xd0f   : > { %5702 = vrsqrt.f32 %v3381_v28  ;;  %v4537_v1 = vsel %vm3294_vm3, %v4536_v12, %v4530_v35 }
 0xd10   : > { %4487 = vst.msk [vmem:[%s7766_s6] sm:$0xff] %vm1463_vm1, %v4479_v10  ;;  %v4469_v11 = vmul.f32 %v7755_v47, %v4457_v19 }
 0xd11   : > { %v5699_v5 = vpop.eup %5698 }
 0xd12   : > { %v4481_v63 = vadd.f32 %v7759_v60, %v4469_v11  ;;  %v4459_v9 = vmul.f32 %v5699_v5, %v7683_v38  ;;  %v4534_v24 = vpop.permute.xlu1 %4533 }
 0xd13   : > { %v4539_v31 = vsel %vm4538_vm4, %v4537_v1, %v4534_v24 }
 0xd14   : > { %4489 = vst.msk [vmem:[%s7766_s6 + $0x10] sm:$0xff] %vm1463_vm1, %v4481_v63  ;;  %v4471_v7 = vmul.f32 %v7755_v47, %v4459_v9 }
 0xd15   : > { %4541 = vst.msk [vmem:[%s8012_s22] sm:$0x1] %vm4540_vm6, %v4539_v31  ;;  %v5701_v8 = vpop.eup %5700  ;;  %s7801_s22 = scalar_lea.hbm %s8117_s30, %s5156_s2 }
 0xd16   : > { %v4483_v14 = vadd.f32 %v7759_v60, %v4471_v7  ;;  %v4461_v46 = vmul.f32 %v5701_v8, %v7696_v37  ;;  %v5122_v37 = vld [vmem:[%s8107_s27 + $0x3] ss:$0 sm:$0xff] }
 0xd18   : > { %4491 = vst.msk [vmem:[%s7766_s6 + $0x20] sm:$0xff] %vm1463_vm1, %v4483_v14  ;;  %v4473_v38 = vmul.f32 %v7755_v47, %v4461_v46 }
 0xd19   : > { %v5703_v30 = vpop.eup %5702 }
 0xd1a   : > { %v4485_v26 = vadd.f32 %v7759_v60, %v4473_v38  ;;  %v3383_v56 = vmul.f32 %v5703_v30, %v7704_v27 }
 0xd1c   : > { %4493 = vst.msk [vmem:[%s7766_s6 + $0x30] sm:$0xff] %vm1463_vm1, %v4485_v26  ;;  %v3388_v15 = vmul.f32 %v5121_v43, %v3383_v56 }
 0xd1e   : > { %v3393_v13 = vadd.f32 %v5122_v37, %v3388_v15 }
 0xd20   : > { %3394 = vst.msk [vmem:[%s1218_s16] sm:$0xff] %vm1287_vm2, %v3393_v13 }
 0xd21   : > { %5942 = shalt.err (!%p5939_p9)
}
 0xd22   : > { %s5943_s16 = scalar_lea.hbm %s7801_s22, 128  ;;  %s5947_s5 = scalar_lea.hbm %s8117_s30, 256 }
 0xd23   : > { %p5944_p6 = scmp.ne.s32.totalorder %s7801_s22, %s5943_s16  ;;  %p5948_p12 = scmp.lt.u32.totalorder %s7801_s22, %s8117_s30 }
 0xd24   : > { %p5949_p3 = scmp.lt.u32.totalorder %s5947_s5, %s5943_s16  ;;  %p5951_p13 = scmp.lt.u32.totalorder %s5943_s16, %s7801_s22 }
 0xd25   : > { %p5945_p0 = pnand %p5944_p6, %p8119_p8 }
 0xd26   : > { %p5950_p4 = por %p5949_p3, %p5948_p12 }
 0xd27   : > { %p5946_p10 = pneg %p5945_p0 }
 0xd28   : > { %p5952_p11 = por %p5951_p13, %p5950_p4 }
 0xd2a   : > { %p5953_p5 = pnand %p5952_p11, %p5946_p10 }
 0xd2c   : > { %5956 = shalt.err (!%p5953_p5)
}
 0xd2d   : > { %5449 = dma.vmem_to_hbm [thread:$0]  (%p8119_p8), %s7803_s28, 128, %s7801_s22, %s4653_s4   ;;  %v4547_v36 = vsel %vm1463_vm1, %v7459_v4, 0.0  ;;  %v4549_v22 = vsel %vm1463_vm1, %v7473_v6, 0.0  ;;  %v4551_v53 = vsel %vm1463_vm1, %v7469_v44, 0.0  ;;  %v4553_v59 = vsel %vm1463_vm1, %v7483_v62, 0.0  ;;  %v4636_v45 = vpop.permute.xlu0 %4635 }
 0xd2e   : > { %v4548_v27 = vadd.f32 %v4547_v36, %v4546_v0  ;;  %v4555_v49 = vsel %vm1463_vm1, %v7479_v41, 0.0  ;;  %s8120_s3 = sld [smem:[#allocation55_spill]]  ;;  %s8016_s28 = sshll.u32 %s6107_s0, 4  ;;  %vm4648_vm7 = vcmask 195584   ;;  %vm4650_vm8 = vcmask 253952  }
 0xd2f   : > { %s1237_s8 = scalar_lea.vmem [#allocation19], %s6594_s10  ;;  %s4667_s2 = scalar_lea.sflag [#allocation20], %s6594_s10 }
 0xd30   : > { %v4550_v51 = vadd.f32 %v4549_v22, %v4548_v27  ;;  %s4726_s9 = sshll.u32 %s1237_s8, 4  ;;  %s6185_s16 = smov [#allocation19]   ;;  %s7844_s9 = int_to_ptr.vmem [resolvable:$true] %s4726_s9 }
 0xd31   : > { %v4644_v19 = vpop.permute.xlu0 %4643  ;;  %s5957_s4 = scalar_lea.vmem %s7844_s9, 16  ;;  %s5961_s5 = sshll.u32 %s6185_s16, 4  ;;  %s5962_s5 = int_to_ptr.vmem [resolvable:$false] %s5961_s5 }
 0xd32   : > { %v4552_v50 = vadd.f32 %v4551_v53, %v4550_v51  ;;  %p5958_p1 = scmp.ne.s32.totalorder %s7844_s9, %s5957_s4  ;;  %p5964_p9 = scmp.lt.s32.totalorder %s7844_s9, %s5962_s5 }
 0xd34   : > { %v4554_v34 = vadd.f32 %v4553_v59, %v4552_v50  ;;  %s7842_s22 = scalar_lea.hbm %s8120_s3, %s8016_s28  ;;  %p5959_p2 = pnand %p5958_p1, %p8119_p8 }
 0xd35   : > { %s5963_s28 = scalar_lea.vmem %s5962_s5, 32 }
 0xd36   : > { %v4556_v57 = vadd.f32 %v4555_v49, %v4554_v34  ;;  %p5960_p7 = pneg %p5959_p2  ;;  %p5965_p6 = scmp.lt.s32.totalorder %s5963_s28, %s5957_s4 }
 0xd38   : > { %v4557_v17 = vrot.slane %v4556_v57, 4  ;;  %p5966_p0 = por %p5965_p6, %p5964_p9 }
 0xd3a   : > { %v4558_v42 = vadd.f32 %v4557_v17, %v4556_v57  ;;  %p5967_p10 = pnand %p5966_p0, %p5960_p7 }
 0xd3c   : > { %v4559_v4 = vrot.slane %v4558_v42, 2 }
 0xd3e   : > { %v4560_v20 = vadd.f32 %v4559_v4, %v4558_v42 }
 0xd40   : > { %v4561_v52 = vrot.slane %v4560_v20, 1 }
 0xd42   : > { %v4562_v41 = vadd.f32 %v4561_v52, %v4560_v20 }
 0xd43   : > { %v4412_v3 = vpop.xlane.xlu1 %4411 }
 0xd44   : > { %v4432_v40 = vmul.f32 0.125, %v4412_v3  ;;  %v4646_v54 = vsel %vm1463_vm1, %v4562_v41, %v4636_v45 }
 0xd46   : > { %v4440_v6 = vadd.f32 1e-05, %v4432_v40 }
 0xd47   : > { %v4418_v55 = vpop.xlane.xlu1 %4417 }
 0xd48   : > { %5704 = vrsqrt.f32 %v4440_v6  ;;  %v4434_v44 = vmul.f32 0.125, %v4418_v55 }
 0xd4a   : > { %v4442_v25 = vadd.f32 1e-05, %v4434_v44 }
 0xd4b   : > { %v4424_v62 = vpop.xlane.xlu1 %4423 }
 0xd4c   : > { %5706 = vrsqrt.f32 %v4442_v25  ;;  %v4436_v21 = vmul.f32 0.125, %v4424_v62 }
 0xd4e   : > { %v4444_v39 = vadd.f32 1e-05, %v4436_v21 }
 0xd4f   : > { %v4430_v23 = vpop.xlane.xlu1 %4429 }
 0xd50   : > { %5708 = vrsqrt.f32 %v4444_v39  ;;  %v4438_v32 = vmul.f32 0.125, %v4430_v23 }
 0xd52   : > { %v5705_v28 = vpop.eup %5704  ;;  %v4446_v10 = vadd.f32 1e-05, %v4438_v32 }
 0xd53   : > { %v4456_v35 = vmul.f32 %v5705_v28, %v7728_v29  ;;  %v4640_v11 = vpop.permute.xlu1 %4639 }
 0xd54   : > { %5710 = vrsqrt.f32 %v4446_v10  ;;  %v4647_v5 = vsel %vm1287_vm2, %v4646_v54, %v4640_v11 }
 0xd55   : > { %v4468_v12 = vmul.f32 %v7755_v47, %v4456_v35  ;;  %v4649_v63 = vsel %vm4648_vm7, %v4647_v5, %v4644_v19 }
 0xd56   : > { %v5707_v9 = vpop.eup %5706  ;;  %4651 = vst.msk [vmem:[%s1237_s8] sm:$0x1] %vm4650_vm8, %v4649_v63 }
 0xd57   : > { %v4480_v29 = vadd.f32 %v7759_v60, %v4468_v12  ;;  %v4458_v1 = vmul.f32 %v5707_v9, %v7731_v33 }
 0xd58   : > { %5970 = shalt.err (!%p5967_p10)
}
 0xd59   : > { %s5971_s8 = scalar_lea.hbm %s7842_s22, 16  ;;  %s5975_s16 = scalar_lea.hbm %s8120_s3, 32 }
 0xd5a   : > { %p5972_p12 = scmp.ne.s32.totalorder %s7842_s22, %s5971_s8  ;;  %p5976_p13 = scmp.lt.u32.totalorder %s7842_s22, %s8120_s3 }
 0xd5b   : > { %p5977_p11 = scmp.lt.u32.totalorder %s5975_s16, %s5971_s8  ;;  %p5979_p1 = scmp.lt.u32.totalorder %s5971_s8, %s7842_s22 }
 0xd5c   : > { %p5973_p3 = pnand %p5972_p12, %p8119_p8 }
 0xd5d   : > { %p5978_p5 = por %p5977_p11, %p5976_p13 }
 0xd5e   : > { %p5974_p4 = pneg %p5973_p3 }
 0xd5f   : > { %p5980_p2 = por %p5979_p1, %p5978_p5 }
 0xd61   : > { %p5981_p7 = pnand %p5980_p2, %p5974_p4 }
 0xd63   : > { %5984 = shalt.err (!%p5981_p7)
}
 0xd64   : > { %5452 = dma.vmem_to_hbm [thread:$0]  (%p8119_p8), %s7844_s9, 16, %s7842_s22, %s4667_s2   ;;  %4488 = vst.msk [vmem:[%s7766_s6 + $0x8] sm:$0xff] %vm1463_vm1, %v4480_v29  ;;  %v4470_v33 = vmul.f32 %v7755_v47, %v4458_v1  ;;  %v5709_v24 = vpop.eup %5708 }
 0xd65   : > { %s8121_s28 = sld [smem:[#allocation53_spill]]  ;;  %s8123_s5 = sld [smem:[#allocation54_spill]]  ;;  %v4460_v7 = vmul.f32 %v5709_v24, %v7736_v48  ;;  %v5711_v14 = vpop.eup %5710 }
 0xd66   : > { %v4482_v31 = vadd.f32 %v7759_v60, %v4470_v33  ;;  %v4462_v38 = vmul.f32 %v5711_v14, %v7742_v61  ;;  %s5164_s9 = sshll.u32 %s6107_s0, 10  ;;  %s4695_s22 = sshll.u32 %s7766_s6, 4  ;;  %s7888_s22 = int_to_ptr.vmem [resolvable:$true] %s4695_s22 }
 0xd67   : > { %v4472_v8 = vmul.f32 %v7755_v47, %v4460_v7  ;;  %s8124_s2 = scalar_lea.vmem [#allocation18], %s6594_s10  ;;  %s8125_s3 = sshll.u32 %s6107_s0, 4 }
 0xd68   : > { %4490 = vst.msk [vmem:[%s7766_s6 + $0x18] sm:$0xff] %vm1463_vm1, %v4482_v31  ;;  %v4474_v30 = vmul.f32 %v7755_v47, %v4462_v38  ;;  %s4712_s8 = sshll.u32 %s8124_s2, 4  ;;  %s8126_s13 = sand.u32 1, %s6390_s11   ;;  %s7895_s8 = int_to_ptr.vmem [resolvable:$true] %s4712_s8 }
 0xd69   : > { %v4484_v46 = vadd.f32 %v7759_v60, %v4472_v8  ;;  %s7901_s14 = scalar_lea.sflag [#allocation17], %s8126_s13  ;;  %s5985_s10 = scalar_lea.vmem %s7888_s22, 1024 }
 0xd6a   : > { %v4486_v48 = vadd.f32 %v7759_v60, %v4474_v30  ;;  %p5986_p9 = scmp.ne.s32.totalorder %s7888_s22, %s5985_s10 }
 0xd6b   : > { %s8122_s4 = smov %s8121_s28  ;;  %4492 = vst.msk [vmem:[%s7766_s6 + $0x28] sm:$0xff] %vm1463_vm1, %v4484_v46  ;;  %s7885_s16 = scalar_lea.hbm %s8121_s28, %s5164_s9 }
 0xd6c   : > { %s7893_s12 = scalar_lea.hbm %s8123_s5, %s8125_s3  ;;  %4494 = vst.msk [vmem:[%s7766_s6 + $0x38] sm:$0xff] %vm1463_vm1, %v4486_v48  ;;  %p5987_p6 = pnand %p5986_p9, %p8119_p8 }
 0xd6d   : > { %s6186_s28 = smov [#allocation16]  }
 0xd6e   : > { %p5988_p0 = pneg %p5987_p6  ;;  %s5989_s9 = sshll.u32 %s6186_s28, 4  ;;  %s5990_s9 = int_to_ptr.vmem [resolvable:$false] %s5989_s9 }
 0xd6f   : > { %s5991_s0 = scalar_lea.vmem %s5990_s9, 2048  ;;  %p5992_p10 = scmp.lt.s32.totalorder %s7888_s22, %s5990_s9 }
 0xd70   : > { %p5993_p12 = scmp.lt.s32.totalorder %s5991_s0, %s5985_s10 }
 0xd72   : > { %p5994_p3 = por %p5993_p12, %p5992_p10 }
 0xd74   : > { %p5995_p4 = pnand %p5994_p3, %p5988_p0 }
 0xd76   : > { %5998 = shalt.err (!%p5995_p4)
}
 0xd77   : > { %s5999_s13 = scalar_lea.hbm %s7885_s16, 1024  ;;  %s6003_s11 = scalar_lea.hbm %s8122_s4, 2048 }
 0xd78   : > { %p6000_p13 = scmp.ne.s32.totalorder %s7885_s16, %s5999_s13  ;;  %p6004_p1 = scmp.lt.u32.totalorder %s7885_s16, %s8122_s4 }
 0xd79   : > { %p6005_p2 = scmp.lt.u32.totalorder %s6003_s11, %s5999_s13  ;;  %p6007_p9 = scmp.lt.u32.totalorder %s5999_s13, %s7885_s16 }
 0xd7a   : > { %p6001_p11 = pnand %p6000_p13, %p8119_p8 }
 0xd7b   : > { %p6006_p7 = por %p6005_p2, %p6004_p1 }
 0xd7c   : > { %p6002_p5 = pneg %p6001_p11 }
 0xd7d   : > { %p6008_p6 = por %p6007_p9, %p6006_p7 }
 0xd7f   : > { %p6009_p0 = pnand %p6008_p6, %p6002_p5 }
 0xd81   : > { %6012 = shalt.err (!%p6009_p0)
}
 0xd82   : > { %s6187_s6 = smov 128   ;;  %s8127_s3 = smov 8  }
 0xd83   : > { %5450 = dma.vmem_to_hbm [thread:$0]  (%p8119_p8), %s7888_s22, 1024, %s7885_s16, %s7901_s14, %s6187_s6, %s6187_s6, %s8127_s3  }
 0xd84   : > { %s6013_s2 = scalar_lea.vmem %s7895_s8, 16  ;;  %s6188_s10 = smov [#allocation18]  }
 0xd85   : > { %p6014_p10 = scmp.ne.s32.totalorder %s7895_s8, %s6013_s2  ;;  %s6017_s28 = sshll.u32 %s6188_s10, 4  ;;  %s6018_s28 = int_to_ptr.vmem [resolvable:$false] %s6017_s28 }
 0xd86   : > { %s6019_s9 = scalar_lea.vmem %s6018_s28, 32  ;;  %p6020_p4 = scmp.lt.s32.totalorder %s7895_s8, %s6018_s28 }
 0xd87   : > { %p6015_p12 = pnand %p6014_p10, %p8119_p8  ;;  %p6021_p13 = scmp.lt.s32.totalorder %s6019_s9, %s6013_s2 }
 0xd89   : > { %p6016_p3 = pneg %p6015_p12  ;;  %p6022_p11 = por %p6021_p13, %p6020_p4 }
 0xd8b   : > { %p6023_p5 = pnand %p6022_p11, %p6016_p3 }
 0xd8d   : > { %6026 = shalt.err (!%p6023_p5)
}
 0xd8e   : > { %s6027_s22 = scalar_lea.hbm %s7893_s12, 16  ;;  %s6031_s16 = scalar_lea.hbm %s8123_s5, 32 }
 0xd8f   : > { %p6028_p1 = scmp.ne.s32.totalorder %s7893_s12, %s6027_s22  ;;  %p6032_p9 = scmp.lt.u32.totalorder %s7893_s12, %s8123_s5 }
 0xd90   : > { %p6033_p6 = scmp.lt.u32.totalorder %s6031_s16, %s6027_s22  ;;  %p6035_p10 = scmp.lt.u32.totalorder %s6027_s22, %s7893_s12 }
 0xd91   : > { %p6029_p2 = pnand %p6028_p1, %p8119_p8 }
 0xd92   : > { %p6034_p0 = por %p6033_p6, %p6032_p9 }
 0xd93   : > { %p6030_p7 = pneg %p6029_p2 }
 0xd94   : > { %p6036_p12 = por %p6035_p10, %p6034_p0 }
 0xd96   : > { %p6037_p3 = pnand %p6036_p12, %p6030_p7 }
 0xd98   : > { %6040 = shalt.err (!%p6037_p3)
}
 0xd99   : > { %5451 = dma.vmem_to_hbm [thread:$0]  (%p8119_p8), %s7895_s8, 16, %s7893_s12, %s7901_s14  }
 0xd9a PF: > { %s8128_s0 = sld [smem:[#allocation56_spill]]  ;;  %s8129_s13 = sld [smem:[#allocation62_spill]] }
 0xd9b   : > { %s8130_s11 = sld [smem:[#allocation58_spill]] }
 0xda0   : > { %s4738_s6 = sand.u32 1, %s8128_s0   ;;  %p8131_p4 = scmp.ne.s32.totalorder %s8129_s13, 0 }
 0xda1   : > { %p8132_p13 = scmp.ge.s32.totalorder %s8130_s11, 2  ;;  %s4739_s3 = scalar_lea.sflag [#allocation5], %s4738_s6 }
 0xda3   : > { %p5481_p11 = pnand %p8132_p13, %p8131_p4 }
 0xda5   : > { %6082 = dma.done.wait (!%p5481_p11), %s4739_s3, 128  }
 0xda6   : > { %6084 = vsyncadd (!%p5481_p11), %s4739_s3, 4294967168  ;;  %s8133_s2 = sadd.s32 4294967294, %s8130_s11  }
 0xda7   : > { %s4747_s10 = sand.u32 1, %s8133_s2  }
 0xda8   : > { %s4748_s28 = scalar_lea.sflag [#allocation17], %s4747_s10 }
 0xda9   : > { %6086 = dma.done.wait (!%p5481_p11), %s4748_s28, 1040  }
 0xdaa   : > { %6088 = vsyncadd (!%p5481_p11), %s4748_s28, 4294966256  ;;  %s4765_s23 = scalar_lea.sflag [#allocation20], %s4738_s6 }
 0xdab   : > { %6090 = dma.done.wait (!%p5481_p11), %s4765_s23, 16  }
 0xdac   : > { %6092 = vsyncadd (!%p5481_p11), %s4765_s23, 4294967280  ;;  %s93_s10 = sadd.s32 1, %s8130_s11   ;;  %s8134_s14 = sld [smem:[#allocation57_spill]] }
 0xdad   : > { %p90_p8 = scmp.ge.s32.totalorder %s93_s10, 4   ;;  %s8135_s2 = sld [smem:[#allocation61_spill]] }
 0xdae   : > { %s8136_s12 = sld [smem:[#allocation59_spill]]  ;;  %s8137_s28 = smov %s6099_s1 }
 0xdaf   : > { %s8139_s0 = smov %s6111_s7  ;;  %92 = sbr.rel (!%p90_p8) target bundleno = 81 (0x51), region = 314 }
 0xdb2   : > { %s8138_s1 = smov %s8134_s14 }
 0xdb4   : > { %s8140_s7 = smov %s8136_s12 }
 0xdb6   :  { %4769 = vsyncpa [#allocation4], 1 }
 0xdb7   :  { %4771 = vsyncpa [#allocation4 + $0x1], 1 }
 0xdb8   :  { %4772 = vsyncpa [#allocation7], 1 }
 0xdb9   :  { %4774 = vsyncpa [#allocation7 + $0x1], 1 }
 0xdba   :  { %4775 = vsyncpa [#allocation10], 1 }
 0xdbb   :  { %4776 = vsyncpa [#allocation13], 1 }
 0xdbc   :  { %4777 = vsyncpa [#allocation5], 1 }
 0xdbd   :  { %4779 = vsyncpa [#allocation5 + $0x1], 1 }
 0xdbe   :  { %4780 = vsyncpa [#allocation17], 1 }
 0xdbf   :  { %4782 = vsyncpa [#allocation17 + $0x1], 1 }
 0xdc0   :  { %4783 = vsyncpa [#allocation20], 1 }
 0xdc1   :  { %4785 = vsyncpa [#allocation20 + $0x1], 1 }

</bundles_post_ra>
